<compile_context>
chip_gen: v7x
topology: tpu7x:2x2x1
jax: 0.10.0
libtpu: 0.0.40
codegen_flags: <defaults>
</compile_context>

<pallas_src>
import jax
import jax.numpy as jnp
from jax.experimental import pallas as pl
from jax.experimental.pallas import tpu as pltpu

LANES = 128


def _round_up(x, m):
    return (x + m - 1) // m * m


def _pick_k_tile(dim, K, queue_slab_budget_bytes=16 * 1024 * 1024):
    """Largest K tile whose double-buffered bf16 queue slab fits the budget.

    16 MiB keeps k_tile >= 2048 even at dim=2048 (fewer K steps, >=4 KiB DMA row
    chunks) while the total VMEM need stays well under v7x's 64 MiB.
    """
    for kt in (4096, 2048, 1024, 512, 256, 128):
        if K % kt == 0 and 2 * dim * kt * 2 <= queue_slab_budget_bytes:
            return kt
    raise ValueError("queue length K must be a multiple of 128")


def _moco_loss_kernel(q_ref, queue_ref, invn_ref, ispos_ref,
                      num_ref, den_ref, l_scr, p_scr):
    """One (k_split, batch_tile, k_tile) grid step.

    q_ref      : (B_T, dim)       bf16  row-normalized queries
    queue_ref  : (dim, K_T)       bf16  raw (un-normalized) queue columns
    invn_ref   : (1, K_T)         f32   1 / ||queue column||
    ispos_ref  : (B_T, K_T)       f32   is_pos[b, k] = sim[queue_label[k], target[b]]
    num_ref    : (1, B_T, 128)    f32   partial sum_k is_pos * exp(s)   (lane-bcast)
    den_ref    : (1, B_T, 128)    f32   partial sum_k exp(s)            (lane-bcast)
    l_scr/p_scr: (B_T, 1)         f32   running denominator / masked numerator
    """
    kt = pl.program_id(2)

    @pl.when(kt == 0)
    def _init():
        l_scr[...] = jnp.zeros_like(l_scr)
        p_scr[...] = jnp.zeros_like(p_scr)

    # Cosine-similarity logits: bf16 MXU matmul with f32 accumulation, then a
    # per-lane scale by the cached inverse queue-column norms (queries were
    # row-normalized once in the wrapper).
    s = jnp.dot(q_ref[...], queue_ref[...], preferred_element_type=jnp.float32)
    s = s * invn_ref[...]                                       # (B_T, K_T) f32

    # Logits are true cosine similarities (|s| <~ 1.01 incl. bf16 rounding), so a
    # fixed-max softmax is safe: exp(s) <= e, the K-sum <= K*e fits comfortably in
    # f32, and no online max / rescaling is needed.  Mathematically identical to
    # softmax with max subtraction.
    p = jnp.exp(s)
    l_scr[...] += p.sum(axis=-1, keepdims=True)
    p_scr[...] += (ispos_ref[...] * p).sum(axis=-1, keepdims=True)

    @pl.when(kt == pl.num_programs(2) - 1)
    def _finalize():
        num_ref[...] = jnp.broadcast_to(p_scr[...], num_ref.shape)
        den_ref[...] = jnp.broadcast_to(l_scr[...], den_ref.shape)


def pos_prob_row_sums(queries, queue_bf16, inv_col_norm, is_pos):
    """For each query row b: sum_k is_pos[b,k] * softmax_k(cos(queries, queue.T))[b,k].

    queries      : (B, dim) f32   un-normalized query rows
    queue_bf16   : (dim, K) bf16  raw queue columns (persistent bf16 mirror)
    inv_col_norm : (1, K)   f32   cached 1 / ||queue column|| (f32 norms)
    is_pos       : (B, K)   f32   is_pos[b, k] = sim[queue_label[k], target[b]]
    Returns a (B,) f32 vector.
    """
    B, dim = queries.shape
    dim2, K = queue_bf16.shape
    assert dim == dim2 and inv_col_norm.shape == (1, K) and is_pos.shape == (B, K)

    k_tile = _pick_k_tile(dim, K)
    k_steps_total = K // k_tile
    # Split the K reduction into two independent "parallel" partitions so both
    # v7x TensorCores get work even when there is a single batch tile; the merge
    # is a plain add in the wrapper.  On single-core chips this is a no-op loop.
    n_split = 2 if (k_steps_total % 2 == 0 and k_steps_total >= 2) else 1
    k_steps = k_steps_total // n_split

    # bf16 packs two rows per sublane -> keep the batch tile a multiple of 16.
    b_tile = min(128, _round_up(B, 16))
    b_pad = _round_up(B, b_tile)

    # Query rows: normalized once in f32 (F.normalize semantics), bf16 MXU operand.
    qn = queries / jnp.maximum(
        jnp.linalg.norm(queries, axis=1, keepdims=True), 1e-12)
    qn = jnp.pad(qn, ((0, b_pad - B), (0, 0))).astype(jnp.bfloat16)

    is_pos_p = jnp.pad(is_pos.astype(jnp.float32), ((0, b_pad - B), (0, 0)))
    invn = inv_col_norm.astype(jnp.float32)

    grid = (n_split, b_pad // b_tile, k_steps)

    def q_map(s, b, k):
        return (b, 0)

    def queue_map(s, b, k):
        return (0, s * k_steps + k)

    def invn_map(s, b, k):
        return (0, s * k_steps + k)

    def ispos_map(s, b, k):
        return (b, s * k_steps + k)

    def out_map(s, b, k):
        return (s, b, 0)

    # Size the scoped-VMEM limit to ~1.5x the actual need (double-buffered inputs
    # + (B_T, K_T) f32 intermediates), clamped to [24 MiB, 48 MiB]: big enough for
    # v5e's 16 MiB default limit, small enough to leave headroom on v7x's 64 MiB.
    est = (2 * dim * k_tile * 2            # queue slab, double-buffered bf16
           + 2 * b_tile * k_tile * 4       # is_pos stream, double-buffered f32
           + 2 * k_tile * 4                # inv col norms
           + 2 * b_tile * dim * 2          # queries
           + 4 * b_tile * LANES * 4        # the two lane-broadcast outputs
           + 3 * b_tile * k_tile * 4)      # s / exp(s) / masked intermediates
    vmem_limit = int(min(48 * 1024 * 1024,
                         max(24 * 1024 * 1024, est + est // 2)))

    num, den = pl.pallas_call(
        _moco_loss_kernel,
        grid_spec=pltpu.PrefetchScalarGridSpec(
            num_scalar_prefetch=0,
            grid=grid,
            in_specs=[
                pl.BlockSpec((b_tile, dim), q_map),       # queries (bf16)
                pl.BlockSpec((dim, k_tile), queue_map),   # queue columns (bf16)
                pl.BlockSpec((1, k_tile), invn_map),      # 1 / col-norm
                pl.BlockSpec((b_tile, k_tile), ispos_map),  # is_pos tile
            ],
            out_specs=(
                pl.BlockSpec((1, b_tile, LANES), out_map),  # partial numerator
                pl.BlockSpec((1, b_tile, LANES), out_map),  # partial denominator
            ),
            scratch_shapes=[
                pltpu.VMEM((b_tile, 1), jnp.float32),   # running denominator
                pltpu.VMEM((b_tile, 1), jnp.float32),   # running masked numerator
            ],
        ),
        out_shape=(
            jax.ShapeDtypeStruct((n_split, b_pad, LANES), jnp.float32),
            jax.ShapeDtypeStruct((n_split, b_pad, LANES), jnp.float32),
        ),
        compiler_params=pltpu.CompilerParams(
            dimension_semantics=("parallel", "parallel", "arbitrary"),
            vmem_limit_bytes=vmem_limit,
        ),
    )(qn, queue_bf16, invn, is_pos_p)

    # Merge the per-split partial sums (plain add: fixed-max softmax) and divide.
    num_b = num.sum(axis=0)[:B, 0]
    den_b = den.sum(axis=0)[:B, 0]
    return num_b / den_b


def memory_forward(queue, queue_label, queue_ptr, queue_bf16, queue_inv_norm,
                   emb_u_w, emb_u_s, emb_l_w, emb_l_s,
                   index_u, index_l, sim):
    """Functional equivalent of losses.Memory.forward.

    State carried across calls: the f32 queue (the module's registered buffer),
    its labels and pointer, plus two derived caches that avoid full-queue HBM
    passes every call: a persistent bf16 mirror of the queue and the (1, K)
    inverse column norms.  Only the B newly-enqueued columns are touched.

    Returns (loss, new_queue, new_label, new_ptr, new_queue_bf16, new_inv_norm).
    Donate the state buffers when jitting so the enqueue is an in-place update.
    """
    dim, K = queue.shape
    keys = jnp.concatenate([emb_u_w, emb_l_w], axis=0)             # (B, dim)
    targets = jnp.concatenate([index_u, index_l], axis=0)          # (B,)
    B = keys.shape[0]
    assert K % B == 0

    ptr = queue_ptr[0].astype(jnp.int32)
    zero = jnp.zeros((), jnp.int32)
    keys_T = keys.T                                                # (dim, B)

    new_queue = jax.lax.dynamic_update_slice(
        queue, keys_T.astype(queue.dtype), (zero, ptr))
    new_queue_bf16 = jax.lax.dynamic_update_slice(
        queue_bf16, keys_T.astype(jnp.bfloat16), (zero, ptr))
    new_cols_inv = 1.0 / jnp.maximum(
        jnp.linalg.norm(keys_T.astype(jnp.float32), axis=0, keepdims=True), 1e-12)
    new_inv_norm = jax.lax.dynamic_update_slice(
        queue_inv_norm, new_cols_inv, (zero, ptr))
    new_label = jax.lax.dynamic_update_slice(
        queue_label, targets.astype(queue_label.dtype)[None, :], (zero, ptr))
    new_ptr = (queue_ptr + B) % K

    # is_pos[b, k] = sim[queue_label[k], targets[b]]  (small (B, K) gather).
    is_pos = jnp.take(jnp.take(sim.T, targets, axis=0), new_label[0], axis=1)

    queries = jnp.concatenate([emb_u_s, emb_l_s], axis=0)          # (B, dim)
    sums = pos_prob_row_sums(queries, new_queue_bf16, new_inv_norm, is_pos)

    # loss_con: torch.log((is_pos*probs + 1e-6).sum(1)) adds the epsilon per
    # element *inside* the sum, i.e. sum(is_pos*probs) + K*1e-6.
    loss = jnp.mean(jax.nn.softplus(jnp.log(sums + K * 1e-6)))
    return loss, new_queue, new_label, new_ptr, new_queue_bf16, new_inv_norm


def memory_forward_reference(queue, queue_label, queue_ptr,
                             emb_u_w, emb_u_s, emb_l_w, emb_l_s,
                             index_u, index_l, sim):
    """Dense pure-JAX re-implementation of the PyTorch module (for checking)."""
    keys = jnp.concatenate([emb_u_w, emb_l_w], axis=0)
    targets = jnp.concatenate([index_u, index_l], axis=0)
    B = keys.shape[0]
    ptr = int(queue_ptr[0])
    queue = queue.at[:, ptr:ptr + B].set(keys.T)
    queue_label = queue_label.at[:, ptr:ptr + B].set(targets)
    is_pos = sim[queue_label[0]][:, targets].T                     # (B, K)
    d1 = jnp.concatenate([emb_u_s, emb_l_s], axis=0)
    d2 = queue.T
    x = d1 / jnp.maximum(jnp.linalg.norm(d1, axis=1, keepdims=True), 1e-12)
    y = d2 / jnp.maximum(jnp.linalg.norm(d2, axis=1, keepdims=True), 1e-12)
    probs = jax.nn.softmax(x @ y.T, axis=1)
    return jnp.mean(jax.nn.softplus(jnp.log((is_pos * probs + 1e-6).sum(axis=1))))


if __name__ == "__main__":
    dim, K, n_classes = 128, 8192, 10          # small version of dim=512, K=8192
    bu = bl = 4                                 # batch per branch -> B = 8

    key = jax.random.PRNGKey(0)
    ks = jax.random.split(key, 8)

    queue = jax.random.normal(ks[0], (dim, K), dtype=jnp.float32)
    queue = queue / jnp.linalg.norm(queue, axis=0, keepdims=True)
    queue_label = jax.random.randint(ks[1], (1, K), 0, n_classes, dtype=jnp.int32)
    queue_ptr = jnp.zeros((1,), dtype=jnp.int32)

    # One-time derived caches (module-init cost, amortized over all steps):
    # persistent bf16 queue mirror and (1, K) inverse column norms.
    queue_bf16 = queue.astype(jnp.bfloat16)
    queue_inv_norm = 1.0 / jnp.maximum(
        jnp.linalg.norm(queue, axis=0, keepdims=True), 1e-12)

    emb_u_w = jax.random.normal(ks[2], (bu, dim), dtype=jnp.float32)
    emb_u_s = jax.random.normal(ks[3], (bu, dim), dtype=jnp.float32)
    emb_l_w = jax.random.normal(ks[4], (bl, dim), dtype=jnp.float32)
    emb_l_s = jax.random.normal(ks[5], (bl, dim), dtype=jnp.float32)
    index_u = jax.random.randint(ks[6], (bu,), 0, n_classes, dtype=jnp.int32)
    index_l = jax.random.randint(ks[7], (bl,), 0, n_classes, dtype=jnp.int32)
    sim = jnp.eye(n_classes, dtype=jnp.float32)   # class-similarity table

    # Reference (run first: the Pallas path below donates the state buffers).
    ref = jax.block_until_ready(memory_forward_reference(
        queue, queue_label, queue_ptr,
        emb_u_w, emb_u_s, emb_l_w, emb_l_s, index_u, index_l, sim))

    fwd = jax.jit(memory_forward, donate_argnums=(0, 1, 3, 4))
    loss, new_queue, new_label, new_ptr, new_qbf16, new_invn = fwd(
        queue, queue_label, queue_ptr, queue_bf16, queue_inv_norm,
        emb_u_w, emb_u_s, emb_l_w, emb_l_s, index_u, index_l, sim)
    jax.block_until_ready((loss, new_queue, new_label, new_ptr,
                           new_qbf16, new_invn))

    loss_f, ref_f = float(loss), float(ref)
    if not (abs(loss_f - ref_f) <= 2e-2 + 2e-2 * abs(ref_f)):
        raise AssertionError(f"mismatch: pallas={loss_f} reference={ref_f}")
    print("KERNEL_OK")
</pallas_src>

<mosaic_0001>
module attributes {stable_mosaic.version = 11 : i64} {
  func.func @_moco_loss_kernel(%arg0: i32, %arg1: i32, %arg2: i32, %arg3: memref<16x128xbf16, #tpu.memory_space<vmem>>, %arg4: memref<128x4096xbf16, #tpu.memory_space<vmem>>, %arg5: memref<1x4096xf32, #tpu.memory_space<vmem>>, %arg6: memref<16x4096xf32, #tpu.memory_space<vmem>>, %arg7: memref<1x16x128xf32, #tpu.memory_space<vmem>>, %arg8: memref<1x16x128xf32, #tpu.memory_space<vmem>>, %arg9: memref<16x1xf32, #tpu.memory_space<vmem>>, %arg10: memref<16x1xf32, #tpu.memory_space<vmem>>) attributes {dimension_semantics = [#tpu.dimension_semantics<parallel>, #tpu.dimension_semantics<parallel>, #tpu.dimension_semantics<arbitrary>], iteration_bounds = array<i64: 2, 1, 1>, scalar_prefetch = 0 : i64, scratch_operands = 2 : i64, tpu.core_type = #tpu.core_type<tc>, window_params = [{transform_indices = @transform_0, window_bounds = array<i64: 16, 128>}, {transform_indices = @transform_1, window_bounds = array<i64: 128, 4096>}, {transform_indices = @transform_2, window_bounds = array<i64: 1, 4096>}, {transform_indices = @transform_3, window_bounds = array<i64: 16, 4096>}, {transform_indices = @transform_4, window_bounds = array<i64: 1, 16, 128>}, {transform_indices = @transform_5, window_bounds = array<i64: 1, 16, 128>}]} {
    %c0_i32 = arith.constant 0 : i32
    %0 = arith.cmpi eq, %arg2, %c0_i32 : i32
    %1 = arith.extui %0 : i1 to i32
    %c0_i32_0 = arith.constant 0 : i32
    %2 = arith.cmpi ne, %1, %c0_i32_0 : i32
    scf.if %2 {
      %cst_20 = arith.constant 0.000000e+00 : f32
      %25 = vector.broadcast %cst_20 : f32 to vector<16x1xf32>
      %c0_21 = arith.constant 0 : index
      %c0_22 = arith.constant 0 : index
      %26 = vector.load %arg9[%c0_21, %c0_22] : memref<16x1xf32, #tpu.memory_space<vmem>>, vector<16x1xf32>
      tpu.vector_store %arg9[%c0_21, %c0_22], %25 {strides = array<i32>} : memref<16x1xf32, #tpu.memory_space<vmem>>, vector<16x1xf32>,
      %cst_23 = arith.constant 0.000000e+00 : f32
      %27 = vector.broadcast %cst_23 : f32 to vector<16x1xf32>
      %c0_24 = arith.constant 0 : index
      %c0_25 = arith.constant 0 : index
      %28 = vector.load %arg10[%c0_24, %c0_25] : memref<16x1xf32, #tpu.memory_space<vmem>>, vector<16x1xf32>
      tpu.vector_store %arg10[%c0_24, %c0_25], %27 {strides = array<i32>} : memref<16x1xf32, #tpu.memory_space<vmem>>, vector<16x1xf32>,
    } else {
    }
    %c0 = arith.constant 0 : index
    %c0_1 = arith.constant 0 : index
    %3 = vector.load %arg3[%c0, %c0_1] : memref<16x128xbf16, #tpu.memory_space<vmem>>, vector<16x128xbf16>
    %c0_2 = arith.constant 0 : index
    %c0_3 = arith.constant 0 : index
    %4 = vector.load %arg4[%c0_2, %c0_3] : memref<128x4096xbf16, #tpu.memory_space<vmem>>, vector<128x4096xbf16>
    %cst = arith.constant dense<0.000000e+00> : vector<16x4096xf32>
    %5 = tpu.matmul %3, %4, %cst {dimension_numbers = #tpu.dot_dimension_numbers<[1], [0], [0], [1], [0, 0, 1, 1], [], []>} : vector<16x128xbf16>, vector<128x4096xbf16>, vector<16x4096xf32> -> vector<16x4096xf32>
    %c0_4 = arith.constant 0 : index
    %c0_5 = arith.constant 0 : index
    %6 = vector.load %arg5[%c0_4, %c0_5] : memref<1x4096xf32, #tpu.memory_space<vmem>>, vector<1x4096xf32>
    %7 = vector.broadcast %6 : vector<1x4096xf32> to vector<16x4096xf32>
    %8 = arith.mulf %5, %7 : vector<16x4096xf32>
    %9 = math.exp %8 : vector<16x4096xf32>
    %c0_6 = arith.constant 0 : index
    %c0_7 = arith.constant 0 : index
    %10 = vector.load %arg9[%c0_6, %c0_7] : memref<16x1xf32, #tpu.memory_space<vmem>>, vector<16x1xf32>
    %cst_8 = arith.constant dense<0.000000e+00> : vector<16xf32>
    %11 = vector.multi_reduction <add>, %9, %cst_8 [1] : vector<16x4096xf32> to vector<16xf32>
    %12 = vector.shape_cast %11 : vector<16xf32> to vector<16x1xf32>
    %13 = arith.addf %10, %12 : vector<16x1xf32>
    %c0_9 = arith.constant 0 : index
    %c0_10 = arith.constant 0 : index
    %14 = vector.load %arg9[%c0_9, %c0_10] : memref<16x1xf32, #tpu.memory_space<vmem>>, vector<16x1xf32>
    tpu.vector_store %arg9[%c0_9, %c0_10], %13 {strides = array<i32>} : memref<16x1xf32, #tpu.memory_space<vmem>>, vector<16x1xf32>,
    %c0_11 = arith.constant 0 : index
    %c0_12 = arith.constant 0 : index
    %15 = vector.load %arg10[%c0_11, %c0_12] : memref<16x1xf32, #tpu.memory_space<vmem>>, vector<16x1xf32>
    %c0_13 = arith.constant 0 : index
    %c0_14 = arith.constant 0 : index
    %16 = vector.load %arg6[%c0_13, %c0_14] : memref<16x4096xf32, #tpu.memory_space<vmem>>, vector<16x4096xf32>
    %17 = arith.mulf %16, %9 : vector<16x4096xf32>
    %cst_15 = arith.constant dense<0.000000e+00> : vector<16xf32>
    %18 = vector.multi_reduction <add>, %17, %cst_15 [1] : vector<16x4096xf32> to vector<16xf32>
    %19 = vector.shape_cast %18 : vector<16xf32> to vector<16x1xf32>
    %20 = arith.addf %15, %19 : vector<16x1xf32>
    %c0_16 = arith.constant 0 : index
    %c0_17 = arith.constant 0 : index
    %21 = vector.load %arg10[%c0_16, %c0_17] : memref<16x1xf32, #tpu.memory_space<vmem>>, vector<16x1xf32>
    tpu.vector_store %arg10[%c0_16, %c0_17], %20 {strides = array<i32>} : memref<16x1xf32, #tpu.memory_space<vmem>>, vector<16x1xf32>,
    %c0_i32_18 = arith.constant 0 : i32
    %22 = arith.cmpi eq, %arg2, %c0_i32_18 : i32
    %23 = arith.extui %22 : i1 to i32
    %c0_i32_19 = arith.constant 0 : i32
    %24 = arith.cmpi ne, %23, %c0_i32_19 : i32
    scf.if %24 {
      %c0_20 = arith.constant 0 : index
      %c0_21 = arith.constant 0 : index
      %25 = vector.load %arg10[%c0_20, %c0_21] : memref<16x1xf32, #tpu.memory_space<vmem>>, vector<16x1xf32>
      %26 = vector.shape_cast %25 : vector<16x1xf32> to vector<1x16x1xf32>
      %27 = vector.broadcast %26 : vector<1x16x1xf32> to vector<1x16x128xf32>
      %c0_22 = arith.constant 0 : index
      %c0_23 = arith.constant 0 : index
      %c0_24 = arith.constant 0 : index
      %28 = vector.load %arg7[%c0_22, %c0_23, %c0_24] : memref<1x16x128xf32, #tpu.memory_space<vmem>>, vector<1x16x128xf32>
      tpu.vector_store %arg7[%c0_22, %c0_23, %c0_24], %27 {strides = array<i32>} : memref<1x16x128xf32, #tpu.memory_space<vmem>>, vector<1x16x128xf32>,
      %c0_25 = arith.constant 0 : index
      %c0_26 = arith.constant 0 : index
      %29 = vector.load %arg9[%c0_25, %c0_26] : memref<16x1xf32, #tpu.memory_space<vmem>>, vector<16x1xf32>
      %30 = vector.shape_cast %29 : vector<16x1xf32> to vector<1x16x1xf32>
      %31 = vector.broadcast %30 : vector<1x16x1xf32> to vector<1x16x128xf32>
      %c0_27 = arith.constant 0 : index
      %c0_28 = arith.constant 0 : index
      %c0_29 = arith.constant 0 : index
      %32 = vector.load %arg8[%c0_27, %c0_28, %c0_29] : memref<1x16x128xf32, #tpu.memory_space<vmem>>, vector<1x16x128xf32>
      tpu.vector_store %arg8[%c0_27, %c0_28, %c0_29], %31 {strides = array<i32>} : memref<1x16x128xf32, #tpu.memory_space<vmem>>, vector<1x16x128xf32>,
    } else {
    }
    return
  }
  func.func @transform_0(%arg0: i32, %arg1: i32, %arg2: i32) -> (i32, i32) {
    %c0_i32 = arith.constant 0 : i32
    %c0_i32_0 = arith.constant 0 : i32
    return %arg1, %c0_i32 : i32, i32
  }
  func.func @transform_1(%arg0: i32, %arg1: i32, %arg2: i32) -> (i32, i32) {
    %c1_i32 = arith.constant 1 : i32
    %0 = arith.muli %arg0, %c1_i32 : i32
    %1 = arith.addi %0, %arg2 : i32
    %c0_i32 = arith.constant 0 : i32
    %c0_i32_0 = arith.constant 0 : i32
    return %c0_i32, %1 : i32, i32
  }
  func.func @transform_2(%arg0: i32, %arg1: i32, %arg2: i32) -> (i32, i32) {
    %c1_i32 = arith.constant 1 : i32
    %0 = arith.muli %arg0, %c1_i32 : i32
    %1 = arith.addi %0, %arg2 : i32
    %c0_i32 = arith.constant 0 : i32
    %c0_i32_0 = arith.constant 0 : i32
    return %c0_i32, %1 : i32, i32
  }
  func.func @transform_3(%arg0: i32, %arg1: i32, %arg2: i32) -> (i32, i32) {
    %c1_i32 = arith.constant 1 : i32
    %0 = arith.muli %arg0, %c1_i32 : i32
    %1 = arith.addi %0, %arg2 : i32
    %c0_i32 = arith.constant 0 : i32
    return %arg1, %1 : i32, i32
  }
  func.func @transform_4(%arg0: i32, %arg1: i32, %arg2: i32) -> (i32, i32, i32) {
    %c0_i32 = arith.constant 0 : i32
    %c0_i32_0 = arith.constant 0 : i32
    return %arg0, %arg1, %c0_i32 : i32, i32, i32
  }
  func.func @transform_5(%arg0: i32, %arg1: i32, %arg2: i32) -> (i32, i32, i32) {
    %c0_i32 = arith.constant 0 : i32
    %c0_i32_0 = arith.constant 0 : i32
    return %arg0, %arg1, %c0_i32 : i32, i32, i32
  }
}

</mosaic_0001>

<bundles_post_ra>
// kernel: memory_forward.1
= control target key start
LH: loop header
LB: loop body
LE: loop exit
PB: predicated region body
PF: predicated region fallthrough
CT: control target
= control target key end

     0   :  { %s4660_s18 = smov 0   ;;  %s4662_s19 = smov 0   ;;  %s5890_s0 = inlined_call_operand.vmem [shape: bf16[16,128], index: 0, kind: input, shape index: {}]   ;;  %s5891_s1 = inlined_call_operand.vmem [shape: bf16[128,8192], index: 1, kind: input, shape index: {}]   ;;  %s5892_s2 = inlined_call_operand.vmem [shape: f32[1,8192], index: 2, kind: input, shape index: {}]   ;;  %s5893_s3 = inlined_call_operand.vmem [shape: f32[16,8192], index: 3, kind: input, shape index: {}]   ;;  %s5894_s4 = inlined_call_operand.vmem [shape: f32[2,16,128], index: 4, kind: output, shape index: {0}]   ;;  %s5895_s5 = inlined_call_operand.vmem [shape: f32[2,16,128], index: 5, kind: output, shape index: {1}]  }
   0x1   :  { %s4664_s20 = smov 0   ;;  %s4666_s21 = smov 0  }
   0x2   :  { %s4668_s22 = smov 0  }
   0x3 LB: > { %s35_s23 = sadd.s32 1, %s4622_s21  ;;  %p77_p1 = scmp.ne.s32.totalorder %s4614_s19, %s4610_s18  ;;  %s4626_s22 = sphi %s4668_s22, %s16_s22   ;;  %s4622_s21 = sphi %s4666_s21, %s5901_s21   ;;  %s4618_s20 = sphi %s4664_s20, %s5900_s20   ;;  %s4614_s19 = sphi %s4662_s19, %s5899_s19   ;;  %s4610_s18 = sphi %s4660_s18, %s5898_s18  }
   0x4   : > { %p37_p0 = scmp.ge.s32.totalorder %s35_s23, 2  ;;  %p78_p2 = scmp.eq.s32.totalorder %s4626_s22, 0 }
   0x5   : > { %s70_s26 = sadd.s32 1, %s4614_s19  ;;  %p4136_p5 = scmp.ge.s32.totalorder %s4626_s22, 2 }
   0x6   : > { %s5903_s23 = smov (%p37_p0, %s35_s23), 0  ;;  %p4691_p3 = por %p78_p2, %p77_p1 }
   0x7   : > { %s67_s25 = ssub.s32 %s4622_s21, %s5903_s23  ;;  %226 = sbr.rel (%p4136_p5) target bundleno = 182 (0xb6), region = 20 }
   0x8   : > { %p68_p4 = scmp.eq.s32.totalorder %s67_s25, 0 }
   0xa   : > { %s4699_s27 = scalar_select %p68_p4, %s4614_s19, %s70_s26  }
   0xe   : > { %229 = sbr.rel (!%p4691_p3) target bundleno = 146 (0x92), region = 24  ;;  %s231_s28 = sand.u32 (%p4691_p3), 1, %s4614_s19  }
   0xf   : > { %s4410_s29 = sshll.u32 (%p4691_p3), %s4622_s21, 7  ;;  %s4137_s30 = sshll.u32 (%p4691_p3), %s231_s28, 11 }
  0x10   : > { %s4709_s8 = scalar_lea.vmem (%p4691_p3), %s5891_s1, %s4410_s29  ;;  %s4714_s9 = scalar_lea.vmem (%p4691_p3), [#allocation4], %s4137_s30 }
  0x11   : > { %v250_v0 = vld [vmem:[%s4709_s8] sm:$0xff] (%p4691_p3)  ;;  %v252_v1 = vld [vmem:[%s4709_s8 + $0x8] sm:$0xff] (%p4691_p3)  ;;  %v254_v2 = vld [vmem:[%s4709_s8 + $0x10] sm:$0xff] (%p4691_p3) }
  0x12   : > { %251 = vst [vmem:[%s4714_s9] sm:$0xff] (%p4691_p3), %v250_v0  ;;  %253 = vst [vmem:[%s4714_s9 + $0x8] sm:$0xff] (%p4691_p3), %v252_v1  ;;  %v256_v3 = vld [vmem:[%s4709_s8 + $0x18] sm:$0xff] (%p4691_p3)  ;;  %v258_v4 = vld [vmem:[%s4709_s8 + $0x20] sm:$0xff] (%p4691_p3) }
  0x13   : > { %255 = vst [vmem:[%s4714_s9 + $0x10] sm:$0xff] (%p4691_p3), %v254_v2  ;;  %v260_v5 = vld [vmem:[%s4709_s8 + $0x28] sm:$0xff] (%p4691_p3)  ;;  %257 = vst [vmem:[%s4714_s9 + $0x18] sm:$0xff] (%p4691_p3), %v256_v3  ;;  %v262_v6 = vld [vmem:[%s4709_s8 + $0x30] sm:$0xff] (%p4691_p3) }
  0x14   : > { %259 = vst [vmem:[%s4714_s9 + $0x20] sm:$0xff] (%p4691_p3), %v258_v4  ;;  %261 = vst [vmem:[%s4714_s9 + $0x28] sm:$0xff] (%p4691_p3), %v260_v5  ;;  %v264_v7 = vld [vmem:[%s4709_s8 + $0x38] sm:$0xff] (%p4691_p3)  ;;  %v266_v8 = vld [vmem:[%s4709_s8 + $0x40] sm:$0xff] (%p4691_p3) }
  0x15   : > { %263 = vst [vmem:[%s4714_s9 + $0x30] sm:$0xff] %v262_v6  ;;  %265 = vst [vmem:[%s4714_s9 + $0x38] sm:$0xff] %v264_v7  ;;  %v268_v9 = vld [vmem:[%s4709_s8 + $0x48] sm:$0xff]  ;;  %v270_v10 = vld [vmem:[%s4709_s8 + $0x50] sm:$0xff] }
  0x16   : > { %267 = vst [vmem:[%s4714_s9 + $0x40] sm:$0xff] %v266_v8  ;;  %v272_v11 = vld [vmem:[%s4709_s8 + $0x58] sm:$0xff]  ;;  %269 = vst [vmem:[%s4714_s9 + $0x48] sm:$0xff] %v268_v9  ;;  %v274_v12 = vld [vmem:[%s4709_s8 + $0x60] sm:$0xff] }
  0x17   : > { %271 = vst [vmem:[%s4714_s9 + $0x50] sm:$0xff] %v270_v10  ;;  %273 = vst [vmem:[%s4714_s9 + $0x58] sm:$0xff] %v272_v11  ;;  %v276_v13 = vld [vmem:[%s4709_s8 + $0x68] sm:$0xff]  ;;  %v278_v14 = vld [vmem:[%s4709_s8 + $0x70] sm:$0xff] }
  0x18   : > { %275 = vst [vmem:[%s4714_s9 + $0x60] sm:$0xff] %v274_v12  ;;  %277 = vst [vmem:[%s4714_s9 + $0x68] sm:$0xff] %v276_v13  ;;  %v280_v15 = vld [vmem:[%s4709_s8 + $0x78] sm:$0xff]  ;;  %v282_v16 = vld [vmem:[%s4709_s8 + $0x100] sm:$0xff] }
  0x19   : > { %279 = vst [vmem:[%s4714_s9 + $0x70] sm:$0xff] %v278_v14  ;;  %v284_v17 = vld [vmem:[%s4709_s8 + $0x108] sm:$0xff]  ;;  %281 = vst [vmem:[%s4714_s9 + $0x78] sm:$0xff] %v280_v15  ;;  %v286_v18 = vld [vmem:[%s4709_s8 + $0x110] sm:$0xff] }
  0x1a   : > { %283 = vst [vmem:[%s4714_s9 + $0x80] sm:$0xff] %v282_v16  ;;  %285 = vst [vmem:[%s4714_s9 + $0x88] sm:$0xff] %v284_v17  ;;  %v288_v19 = vld [vmem:[%s4709_s8 + $0x118] sm:$0xff]  ;;  %v290_v20 = vld [vmem:[%s4709_s8 + $0x120] sm:$0xff] }
  0x1b   : > { %287 = vst [vmem:[%s4714_s9 + $0x90] sm:$0xff] %v286_v18  ;;  %289 = vst [vmem:[%s4714_s9 + $0x98] sm:$0xff] %v288_v19  ;;  %v292_v21 = vld [vmem:[%s4709_s8 + $0x128] sm:$0xff]  ;;  %v294_v22 = vld [vmem:[%s4709_s8 + $0x130] sm:$0xff] }
  0x1c   : > { %291 = vst [vmem:[%s4714_s9 + $0xa0] sm:$0xff] %v290_v20  ;;  %v296_v23 = vld [vmem:[%s4709_s8 + $0x138] sm:$0xff]  ;;  %293 = vst [vmem:[%s4714_s9 + $0xa8] sm:$0xff] %v292_v21  ;;  %v298_v24 = vld [vmem:[%s4709_s8 + $0x140] sm:$0xff] }
  0x1d   : > { %295 = vst [vmem:[%s4714_s9 + $0xb0] sm:$0xff] %v294_v22  ;;  %297 = vst [vmem:[%s4714_s9 + $0xb8] sm:$0xff] %v296_v23  ;;  %v300_v25 = vld [vmem:[%s4709_s8 + $0x148] sm:$0xff]  ;;  %v302_v26 = vld [vmem:[%s4709_s8 + $0x150] sm:$0xff] }
  0x1e   : > { %299 = vst [vmem:[%s4714_s9 + $0xc0] sm:$0xff] %v298_v24  ;;  %301 = vst [vmem:[%s4714_s9 + $0xc8] sm:$0xff] %v300_v25  ;;  %v304_v27 = vld [vmem:[%s4709_s8 + $0x158] sm:$0xff]  ;;  %v306_v28 = vld [vmem:[%s4709_s8 + $0x160] sm:$0xff] }
  0x1f   : > { %303 = vst [vmem:[%s4714_s9 + $0xd0] sm:$0xff] %v302_v26  ;;  %v308_v29 = vld [vmem:[%s4709_s8 + $0x168] sm:$0xff]  ;;  %305 = vst [vmem:[%s4714_s9 + $0xd8] sm:$0xff] %v304_v27  ;;  %v310_v30 = vld [vmem:[%s4709_s8 + $0x170] sm:$0xff] }
  0x20   : > { %307 = vst [vmem:[%s4714_s9 + $0xe0] sm:$0xff] %v306_v28  ;;  %309 = vst [vmem:[%s4714_s9 + $0xe8] sm:$0xff] %v308_v29  ;;  %v312_v31 = vld [vmem:[%s4709_s8 + $0x178] sm:$0xff]  ;;  %v314_v32 = vld [vmem:[%s4709_s8 + $0x200] sm:$0xff] }
  0x21   : > { %311 = vst [vmem:[%s4714_s9 + $0xf0] sm:$0xff] %v310_v30  ;;  %313 = vst [vmem:[%s4714_s9 + $0xf8] sm:$0xff] %v312_v31  ;;  %v316_v33 = vld [vmem:[%s4709_s8 + $0x208] sm:$0xff]  ;;  %v318_v34 = vld [vmem:[%s4709_s8 + $0x210] sm:$0xff] }
  0x22   : > { %315 = vst [vmem:[%s4714_s9 + $0x100] sm:$0xff] %v314_v32  ;;  %v320_v35 = vld [vmem:[%s4709_s8 + $0x218] sm:$0xff]  ;;  %317 = vst [vmem:[%s4714_s9 + $0x108] sm:$0xff] %v316_v33  ;;  %v322_v36 = vld [vmem:[%s4709_s8 + $0x220] sm:$0xff] }
  0x23   : > { %319 = vst [vmem:[%s4714_s9 + $0x110] sm:$0xff] %v318_v34  ;;  %321 = vst [vmem:[%s4714_s9 + $0x118] sm:$0xff] %v320_v35  ;;  %v324_v37 = vld [vmem:[%s4709_s8 + $0x228] sm:$0xff]  ;;  %v326_v38 = vld [vmem:[%s4709_s8 + $0x230] sm:$0xff] }
  0x24   : > { %323 = vst [vmem:[%s4714_s9 + $0x120] sm:$0xff] %v322_v36  ;;  %325 = vst [vmem:[%s4714_s9 + $0x128] sm:$0xff] %v324_v37  ;;  %v328_v39 = vld [vmem:[%s4709_s8 + $0x238] sm:$0xff]  ;;  %v330_v40 = vld [vmem:[%s4709_s8 + $0x240] sm:$0xff] }
  0x25   : > { %327 = vst [vmem:[%s4714_s9 + $0x130] sm:$0xff] %v326_v38  ;;  %v332_v41 = vld [vmem:[%s4709_s8 + $0x248] sm:$0xff]  ;;  %329 = vst [vmem:[%s4714_s9 + $0x138] sm:$0xff] %v328_v39  ;;  %v334_v42 = vld [vmem:[%s4709_s8 + $0x250] sm:$0xff] }
  0x26   : > { %331 = vst [vmem:[%s4714_s9 + $0x140] sm:$0xff] %v330_v40  ;;  %333 = vst [vmem:[%s4714_s9 + $0x148] sm:$0xff] %v332_v41  ;;  %v336_v43 = vld [vmem:[%s4709_s8 + $0x258] sm:$0xff]  ;;  %v338_v44 = vld [vmem:[%s4709_s8 + $0x260] sm:$0xff] }
  0x27   : > { %335 = vst [vmem:[%s4714_s9 + $0x150] sm:$0xff] %v334_v42  ;;  %337 = vst [vmem:[%s4714_s9 + $0x158] sm:$0xff] %v336_v43  ;;  %v340_v45 = vld [vmem:[%s4709_s8 + $0x268] sm:$0xff]  ;;  %v342_v46 = vld [vmem:[%s4709_s8 + $0x270] sm:$0xff] }
  0x28   : > { %339 = vst [vmem:[%s4714_s9 + $0x160] sm:$0xff] %v338_v44  ;;  %v344_v47 = vld [vmem:[%s4709_s8 + $0x278] sm:$0xff]  ;;  %341 = vst [vmem:[%s4714_s9 + $0x168] sm:$0xff] %v340_v45  ;;  %v346_v48 = vld [vmem:[%s4709_s8 + $0x300] sm:$0xff] }
  0x29   : > { %343 = vst [vmem:[%s4714_s9 + $0x170] sm:$0xff] %v342_v46  ;;  %345 = vst [vmem:[%s4714_s9 + $0x178] sm:$0xff] %v344_v47  ;;  %v348_v49 = vld [vmem:[%s4709_s8 + $0x308] sm:$0xff]  ;;  %v350_v50 = vld [vmem:[%s4709_s8 + $0x310] sm:$0xff] }
  0x2a   : > { %347 = vst [vmem:[%s4714_s9 + $0x180] sm:$0xff] %v346_v48  ;;  %349 = vst [vmem:[%s4714_s9 + $0x188] sm:$0xff] %v348_v49  ;;  %v352_v51 = vld [vmem:[%s4709_s8 + $0x318] sm:$0xff]  ;;  %v354_v52 = vld [vmem:[%s4709_s8 + $0x320] sm:$0xff] }
  0x2b   : > { %351 = vst [vmem:[%s4714_s9 + $0x190] sm:$0xff] %v350_v50  ;;  %v356_v53 = vld [vmem:[%s4709_s8 + $0x328] sm:$0xff]  ;;  %353 = vst [vmem:[%s4714_s9 + $0x198] sm:$0xff] %v352_v51  ;;  %v358_v54 = vld [vmem:[%s4709_s8 + $0x330] sm:$0xff] }
  0x2c   : > { %355 = vst [vmem:[%s4714_s9 + $0x1a0] sm:$0xff] %v354_v52  ;;  %357 = vst [vmem:[%s4714_s9 + $0x1a8] sm:$0xff] %v356_v53  ;;  %v360_v55 = vld [vmem:[%s4709_s8 + $0x338] sm:$0xff]  ;;  %v362_v56 = vld [vmem:[%s4709_s8 + $0x340] sm:$0xff] }
  0x2d   : > { %359 = vst [vmem:[%s4714_s9 + $0x1b0] sm:$0xff] %v358_v54  ;;  %361 = vst [vmem:[%s4714_s9 + $0x1b8] sm:$0xff] %v360_v55  ;;  %v364_v57 = vld [vmem:[%s4709_s8 + $0x348] sm:$0xff]  ;;  %v366_v58 = vld [vmem:[%s4709_s8 + $0x350] sm:$0xff] }
  0x2e   : > { %363 = vst [vmem:[%s4714_s9 + $0x1c0] sm:$0xff] %v362_v56  ;;  %v368_v59 = vld [vmem:[%s4709_s8 + $0x358] sm:$0xff]  ;;  %365 = vst [vmem:[%s4714_s9 + $0x1c8] sm:$0xff] %v364_v57  ;;  %v370_v60 = vld [vmem:[%s4709_s8 + $0x360] sm:$0xff] }
  0x2f   : > { %367 = vst [vmem:[%s4714_s9 + $0x1d0] sm:$0xff] %v366_v58  ;;  %369 = vst [vmem:[%s4714_s9 + $0x1d8] sm:$0xff] %v368_v59  ;;  %v372_v61 = vld [vmem:[%s4709_s8 + $0x368] sm:$0xff]  ;;  %v374_v62 = vld [vmem:[%s4709_s8 + $0x370] sm:$0xff] }
  0x30   : > { %371 = vst [vmem:[%s4714_s9 + $0x1e0] sm:$0xff] %v370_v60  ;;  %373 = vst [vmem:[%s4714_s9 + $0x1e8] sm:$0xff] %v372_v61  ;;  %v376_v63 = vld [vmem:[%s4709_s8 + $0x378] sm:$0xff]  ;;  %v378_v0 = vld [vmem:[%s4709_s8 + $0x400] sm:$0xff] }
  0x31   : > { %375 = vst [vmem:[%s4714_s9 + $0x1f0] sm:$0xff] %v374_v62  ;;  %v380_v1 = vld [vmem:[%s4709_s8 + $0x408] sm:$0xff]  ;;  %377 = vst [vmem:[%s4714_s9 + $0x1f8] sm:$0xff] %v376_v63  ;;  %v382_v2 = vld [vmem:[%s4709_s8 + $0x410] sm:$0xff] }
  0x32   : > { %379 = vst [vmem:[%s4714_s9 + $0x200] sm:$0xff] %v378_v0  ;;  %381 = vst [vmem:[%s4714_s9 + $0x208] sm:$0xff] %v380_v1  ;;  %v384_v3 = vld [vmem:[%s4709_s8 + $0x418] sm:$0xff]  ;;  %v386_v4 = vld [vmem:[%s4709_s8 + $0x420] sm:$0xff] }
  0x33   : > { %383 = vst [vmem:[%s4714_s9 + $0x210] sm:$0xff] %v382_v2  ;;  %385 = vst [vmem:[%s4714_s9 + $0x218] sm:$0xff] %v384_v3  ;;  %v388_v5 = vld [vmem:[%s4709_s8 + $0x428] sm:$0xff]  ;;  %v390_v6 = vld [vmem:[%s4709_s8 + $0x430] sm:$0xff] }
  0x34   : > { %387 = vst [vmem:[%s4714_s9 + $0x220] sm:$0xff] %v386_v4  ;;  %v392_v7 = vld [vmem:[%s4709_s8 + $0x438] sm:$0xff]  ;;  %389 = vst [vmem:[%s4714_s9 + $0x228] sm:$0xff] %v388_v5  ;;  %v394_v8 = vld [vmem:[%s4709_s8 + $0x440] sm:$0xff] }
  0x35   : > { %391 = vst [vmem:[%s4714_s9 + $0x230] sm:$0xff] %v390_v6  ;;  %393 = vst [vmem:[%s4714_s9 + $0x238] sm:$0xff] %v392_v7  ;;  %v396_v9 = vld [vmem:[%s4709_s8 + $0x448] sm:$0xff]  ;;  %v398_v10 = vld [vmem:[%s4709_s8 + $0x450] sm:$0xff] }
  0x36   : > { %395 = vst [vmem:[%s4714_s9 + $0x240] sm:$0xff] %v394_v8  ;;  %397 = vst [vmem:[%s4714_s9 + $0x248] sm:$0xff] %v396_v9  ;;  %v400_v11 = vld [vmem:[%s4709_s8 + $0x458] sm:$0xff]  ;;  %v402_v12 = vld [vmem:[%s4709_s8 + $0x460] sm:$0xff] }
  0x37   : > { %399 = vst [vmem:[%s4714_s9 + $0x250] sm:$0xff] %v398_v10  ;;  %v404_v13 = vld [vmem:[%s4709_s8 + $0x468] sm:$0xff]  ;;  %401 = vst [vmem:[%s4714_s9 + $0x258] sm:$0xff] %v400_v11  ;;  %v406_v14 = vld [vmem:[%s4709_s8 + $0x470] sm:$0xff] }
  0x38   : > { %403 = vst [vmem:[%s4714_s9 + $0x260] sm:$0xff] %v402_v12  ;;  %405 = vst [vmem:[%s4714_s9 + $0x268] sm:$0xff] %v404_v13  ;;  %v408_v15 = vld [vmem:[%s4709_s8 + $0x478] sm:$0xff]  ;;  %v410_v16 = vld [vmem:[%s4709_s8 + $0x500] sm:$0xff] }
  0x39   : > { %407 = vst [vmem:[%s4714_s9 + $0x270] sm:$0xff] %v406_v14  ;;  %409 = vst [vmem:[%s4714_s9 + $0x278] sm:$0xff] %v408_v15  ;;  %v412_v17 = vld [vmem:[%s4709_s8 + $0x508] sm:$0xff]  ;;  %v414_v18 = vld [vmem:[%s4709_s8 + $0x510] sm:$0xff] }
  0x3a   : > { %411 = vst [vmem:[%s4714_s9 + $0x280] sm:$0xff] %v410_v16  ;;  %v416_v19 = vld [vmem:[%s4709_s8 + $0x518] sm:$0xff]  ;;  %413 = vst [vmem:[%s4714_s9 + $0x288] sm:$0xff] %v412_v17  ;;  %v418_v20 = vld [vmem:[%s4709_s8 + $0x520] sm:$0xff] }
  0x3b   : > { %415 = vst [vmem:[%s4714_s9 + $0x290] sm:$0xff] %v414_v18  ;;  %417 = vst [vmem:[%s4714_s9 + $0x298] sm:$0xff] %v416_v19  ;;  %v420_v21 = vld [vmem:[%s4709_s8 + $0x528] sm:$0xff]  ;;  %v422_v22 = vld [vmem:[%s4709_s8 + $0x530] sm:$0xff] }
  0x3c   : > { %419 = vst [vmem:[%s4714_s9 + $0x2a0] sm:$0xff] %v418_v20  ;;  %421 = vst [vmem:[%s4714_s9 + $0x2a8] sm:$0xff] %v420_v21  ;;  %v424_v23 = vld [vmem:[%s4709_s8 + $0x538] sm:$0xff]  ;;  %v426_v24 = vld [vmem:[%s4709_s8 + $0x540] sm:$0xff] }
  0x3d   : > { %423 = vst [vmem:[%s4714_s9 + $0x2b0] sm:$0xff] %v422_v22  ;;  %v428_v25 = vld [vmem:[%s4709_s8 + $0x548] sm:$0xff]  ;;  %425 = vst [vmem:[%s4714_s9 + $0x2b8] sm:$0xff] %v424_v23  ;;  %v430_v26 = vld [vmem:[%s4709_s8 + $0x550] sm:$0xff] }
  0x3e   : > { %427 = vst [vmem:[%s4714_s9 + $0x2c0] sm:$0xff] %v426_v24  ;;  %429 = vst [vmem:[%s4714_s9 + $0x2c8] sm:$0xff] %v428_v25  ;;  %v432_v27 = vld [vmem:[%s4709_s8 + $0x558] sm:$0xff]  ;;  %v434_v28 = vld [vmem:[%s4709_s8 + $0x560] sm:$0xff] }
  0x3f   : > { %431 = vst [vmem:[%s4714_s9 + $0x2d0] sm:$0xff] %v430_v26  ;;  %433 = vst [vmem:[%s4714_s9 + $0x2d8] sm:$0xff] %v432_v27  ;;  %v436_v29 = vld [vmem:[%s4709_s8 + $0x568] sm:$0xff]  ;;  %v438_v30 = vld [vmem:[%s4709_s8 + $0x570] sm:$0xff] }
  0x40   : > { %435 = vst [vmem:[%s4714_s9 + $0x2e0] sm:$0xff] %v434_v28  ;;  %v440_v31 = vld [vmem:[%s4709_s8 + $0x578] sm:$0xff]  ;;  %437 = vst [vmem:[%s4714_s9 + $0x2e8] sm:$0xff] %v436_v29  ;;  %v442_v32 = vld [vmem:[%s4709_s8 + $0x600] sm:$0xff] }
  0x41   : > { %439 = vst [vmem:[%s4714_s9 + $0x2f0] sm:$0xff] %v438_v30  ;;  %441 = vst [vmem:[%s4714_s9 + $0x2f8] sm:$0xff] %v440_v31  ;;  %v444_v33 = vld [vmem:[%s4709_s8 + $0x608] sm:$0xff]  ;;  %v446_v34 = vld [vmem:[%s4709_s8 + $0x610] sm:$0xff] }
  0x42   : > { %443 = vst [vmem:[%s4714_s9 + $0x300] sm:$0xff] %v442_v32  ;;  %445 = vst [vmem:[%s4714_s9 + $0x308] sm:$0xff] %v444_v33  ;;  %v448_v35 = vld [vmem:[%s4709_s8 + $0x618] sm:$0xff]  ;;  %v450_v36 = vld [vmem:[%s4709_s8 + $0x620] sm:$0xff] }
  0x43   : > { %447 = vst [vmem:[%s4714_s9 + $0x310] sm:$0xff] %v446_v34  ;;  %v452_v37 = vld [vmem:[%s4709_s8 + $0x628] sm:$0xff]  ;;  %449 = vst [vmem:[%s4714_s9 + $0x318] sm:$0xff] %v448_v35  ;;  %v454_v38 = vld [vmem:[%s4709_s8 + $0x630] sm:$0xff] }
  0x44   : > { %451 = vst [vmem:[%s4714_s9 + $0x320] sm:$0xff] %v450_v36  ;;  %453 = vst [vmem:[%s4714_s9 + $0x328] sm:$0xff] %v452_v37  ;;  %v456_v39 = vld [vmem:[%s4709_s8 + $0x638] sm:$0xff]  ;;  %v458_v40 = vld [vmem:[%s4709_s8 + $0x640] sm:$0xff] }
  0x45   : > { %455 = vst [vmem:[%s4714_s9 + $0x330] sm:$0xff] %v454_v38  ;;  %457 = vst [vmem:[%s4714_s9 + $0x338] sm:$0xff] %v456_v39  ;;  %v460_v41 = vld [vmem:[%s4709_s8 + $0x648] sm:$0xff]  ;;  %v462_v42 = vld [vmem:[%s4709_s8 + $0x650] sm:$0xff] }
  0x46   : > { %459 = vst [vmem:[%s4714_s9 + $0x340] sm:$0xff] %v458_v40  ;;  %v464_v43 = vld [vmem:[%s4709_s8 + $0x658] sm:$0xff]  ;;  %461 = vst [vmem:[%s4714_s9 + $0x348] sm:$0xff] %v460_v41  ;;  %v466_v44 = vld [vmem:[%s4709_s8 + $0x660] sm:$0xff] }
  0x47   : > { %463 = vst [vmem:[%s4714_s9 + $0x350] sm:$0xff] %v462_v42  ;;  %465 = vst [vmem:[%s4714_s9 + $0x358] sm:$0xff] %v464_v43  ;;  %v468_v45 = vld [vmem:[%s4709_s8 + $0x668] sm:$0xff]  ;;  %v470_v46 = vld [vmem:[%s4709_s8 + $0x670] sm:$0xff] }
  0x48   : > { %467 = vst [vmem:[%s4714_s9 + $0x360] sm:$0xff] %v466_v44  ;;  %469 = vst [vmem:[%s4714_s9 + $0x368] sm:$0xff] %v468_v45  ;;  %v472_v47 = vld [vmem:[%s4709_s8 + $0x678] sm:$0xff]  ;;  %v474_v48 = vld [vmem:[%s4709_s8 + $0x700] sm:$0xff] }
  0x49   : > { %471 = vst [vmem:[%s4714_s9 + $0x370] sm:$0xff] %v470_v46  ;;  %v476_v49 = vld [vmem:[%s4709_s8 + $0x708] sm:$0xff]  ;;  %473 = vst [vmem:[%s4714_s9 + $0x378] sm:$0xff] %v472_v47  ;;  %v478_v50 = vld [vmem:[%s4709_s8 + $0x710] sm:$0xff] }
  0x4a   : > { %475 = vst [vmem:[%s4714_s9 + $0x380] sm:$0xff] %v474_v48  ;;  %477 = vst [vmem:[%s4714_s9 + $0x388] sm:$0xff] %v476_v49  ;;  %v480_v51 = vld [vmem:[%s4709_s8 + $0x718] sm:$0xff]  ;;  %v482_v52 = vld [vmem:[%s4709_s8 + $0x720] sm:$0xff] }
  0x4b   : > { %479 = vst [vmem:[%s4714_s9 + $0x390] sm:$0xff] %v478_v50  ;;  %481 = vst [vmem:[%s4714_s9 + $0x398] sm:$0xff] %v480_v51  ;;  %v484_v53 = vld [vmem:[%s4709_s8 + $0x728] sm:$0xff]  ;;  %v486_v54 = vld [vmem:[%s4709_s8 + $0x730] sm:$0xff] }
  0x4c   : > { %483 = vst [vmem:[%s4714_s9 + $0x3a0] sm:$0xff] %v482_v52  ;;  %v488_v55 = vld [vmem:[%s4709_s8 + $0x738] sm:$0xff]  ;;  %485 = vst [vmem:[%s4714_s9 + $0x3a8] sm:$0xff] %v484_v53  ;;  %v490_v56 = vld [vmem:[%s4709_s8 + $0x740] sm:$0xff] }
  0x4d   : > { %487 = vst [vmem:[%s4714_s9 + $0x3b0] sm:$0xff] %v486_v54  ;;  %489 = vst [vmem:[%s4714_s9 + $0x3b8] sm:$0xff] %v488_v55  ;;  %v492_v57 = vld [vmem:[%s4709_s8 + $0x748] sm:$0xff]  ;;  %v494_v58 = vld [vmem:[%s4709_s8 + $0x750] sm:$0xff] }
  0x4e   : > { %491 = vst [vmem:[%s4714_s9 + $0x3c0] sm:$0xff] %v490_v56  ;;  %493 = vst [vmem:[%s4714_s9 + $0x3c8] sm:$0xff] %v492_v57  ;;  %v496_v59 = vld [vmem:[%s4709_s8 + $0x758] sm:$0xff]  ;;  %v498_v60 = vld [vmem:[%s4709_s8 + $0x760] sm:$0xff] }
  0x4f   : > { %495 = vst [vmem:[%s4714_s9 + $0x3d0] sm:$0xff] %v494_v58  ;;  %v500_v61 = vld [vmem:[%s4709_s8 + $0x768] sm:$0xff]  ;;  %497 = vst [vmem:[%s4714_s9 + $0x3d8] sm:$0xff] %v496_v59  ;;  %v502_v62 = vld [vmem:[%s4709_s8 + $0x770] sm:$0xff] }
  0x50   : > { %499 = vst [vmem:[%s4714_s9 + $0x3e0] sm:$0xff] %v498_v60  ;;  %501 = vst [vmem:[%s4714_s9 + $0x3e8] sm:$0xff] %v500_v61  ;;  %v504_v63 = vld [vmem:[%s4709_s8 + $0x778] sm:$0xff]  ;;  %v506_v0 = vld [vmem:[%s4709_s8 + $0x800] sm:$0xff] }
  0x51   : > { %503 = vst [vmem:[%s4714_s9 + $0x3f0] sm:$0xff] %v502_v62  ;;  %505 = vst [vmem:[%s4714_s9 + $0x3f8] sm:$0xff] %v504_v63  ;;  %v508_v1 = vld [vmem:[%s4709_s8 + $0x808] sm:$0xff]  ;;  %v510_v2 = vld [vmem:[%s4709_s8 + $0x810] sm:$0xff] }
  0x52   : > { %507 = vst [vmem:[%s4714_s9 + $0x400] sm:$0xff] %v506_v0  ;;  %v512_v3 = vld [vmem:[%s4709_s8 + $0x818] sm:$0xff]  ;;  %509 = vst [vmem:[%s4714_s9 + $0x408] sm:$0xff] %v508_v1  ;;  %v514_v4 = vld [vmem:[%s4709_s8 + $0x820] sm:$0xff] }
  0x53   : > { %511 = vst [vmem:[%s4714_s9 + $0x410] sm:$0xff] %v510_v2  ;;  %513 = vst [vmem:[%s4714_s9 + $0x418] sm:$0xff] %v512_v3  ;;  %v516_v5 = vld [vmem:[%s4709_s8 + $0x828] sm:$0xff]  ;;  %v518_v6 = vld [vmem:[%s4709_s8 + $0x830] sm:$0xff] }
  0x54   : > { %515 = vst [vmem:[%s4714_s9 + $0x420] sm:$0xff] %v514_v4  ;;  %517 = vst [vmem:[%s4714_s9 + $0x428] sm:$0xff] %v516_v5  ;;  %v520_v7 = vld [vmem:[%s4709_s8 + $0x838] sm:$0xff]  ;;  %v522_v8 = vld [vmem:[%s4709_s8 + $0x840] sm:$0xff] }
  0x55   : > { %519 = vst [vmem:[%s4714_s9 + $0x430] sm:$0xff] %v518_v6  ;;  %v524_v9 = vld [vmem:[%s4709_s8 + $0x848] sm:$0xff]  ;;  %521 = vst [vmem:[%s4714_s9 + $0x438] sm:$0xff] %v520_v7  ;;  %v526_v10 = vld [vmem:[%s4709_s8 + $0x850] sm:$0xff] }
  0x56   : > { %523 = vst [vmem:[%s4714_s9 + $0x440] sm:$0xff] %v522_v8  ;;  %525 = vst [vmem:[%s4714_s9 + $0x448] sm:$0xff] %v524_v9  ;;  %v528_v11 = vld [vmem:[%s4709_s8 + $0x858] sm:$0xff]  ;;  %v530_v12 = vld [vmem:[%s4709_s8 + $0x860] sm:$0xff] }
  0x57   : > { %527 = vst [vmem:[%s4714_s9 + $0x450] sm:$0xff] %v526_v10  ;;  %529 = vst [vmem:[%s4714_s9 + $0x458] sm:$0xff] %v528_v11  ;;  %v532_v13 = vld [vmem:[%s4709_s8 + $0x868] sm:$0xff]  ;;  %v534_v14 = vld [vmem:[%s4709_s8 + $0x870] sm:$0xff] }
  0x58   : > { %531 = vst [vmem:[%s4714_s9 + $0x460] sm:$0xff] %v530_v12  ;;  %v536_v15 = vld [vmem:[%s4709_s8 + $0x878] sm:$0xff]  ;;  %533 = vst [vmem:[%s4714_s9 + $0x468] sm:$0xff] %v532_v13  ;;  %v538_v16 = vld [vmem:[%s4709_s8 + $0x900] sm:$0xff] }
  0x59   : > { %535 = vst [vmem:[%s4714_s9 + $0x470] sm:$0xff] %v534_v14  ;;  %537 = vst [vmem:[%s4714_s9 + $0x478] sm:$0xff] %v536_v15  ;;  %v540_v17 = vld [vmem:[%s4709_s8 + $0x908] sm:$0xff]  ;;  %v542_v18 = vld [vmem:[%s4709_s8 + $0x910] sm:$0xff] }
  0x5a   : > { %539 = vst [vmem:[%s4714_s9 + $0x480] sm:$0xff] %v538_v16  ;;  %541 = vst [vmem:[%s4714_s9 + $0x488] sm:$0xff] %v540_v17  ;;  %v544_v19 = vld [vmem:[%s4709_s8 + $0x918] sm:$0xff]  ;;  %v546_v20 = vld [vmem:[%s4709_s8 + $0x920] sm:$0xff] }
  0x5b   : > { %543 = vst [vmem:[%s4714_s9 + $0x490] sm:$0xff] %v542_v18  ;;  %v548_v21 = vld [vmem:[%s4709_s8 + $0x928] sm:$0xff]  ;;  %545 = vst [vmem:[%s4714_s9 + $0x498] sm:$0xff] %v544_v19  ;;  %v550_v22 = vld [vmem:[%s4709_s8 + $0x930] sm:$0xff] }
  0x5c   : > { %547 = vst [vmem:[%s4714_s9 + $0x4a0] sm:$0xff] %v546_v20  ;;  %549 = vst [vmem:[%s4714_s9 + $0x4a8] sm:$0xff] %v548_v21  ;;  %v552_v23 = vld [vmem:[%s4709_s8 + $0x938] sm:$0xff]  ;;  %v554_v24 = vld [vmem:[%s4709_s8 + $0x940] sm:$0xff] }
  0x5d   : > { %551 = vst [vmem:[%s4714_s9 + $0x4b0] sm:$0xff] %v550_v22  ;;  %553 = vst [vmem:[%s4714_s9 + $0x4b8] sm:$0xff] %v552_v23  ;;  %v556_v25 = vld [vmem:[%s4709_s8 + $0x948] sm:$0xff]  ;;  %v558_v26 = vld [vmem:[%s4709_s8 + $0x950] sm:$0xff] }
  0x5e   : > { %555 = vst [vmem:[%s4714_s9 + $0x4c0] sm:$0xff] %v554_v24  ;;  %v560_v27 = vld [vmem:[%s4709_s8 + $0x958] sm:$0xff]  ;;  %557 = vst [vmem:[%s4714_s9 + $0x4c8] sm:$0xff] %v556_v25  ;;  %v562_v28 = vld [vmem:[%s4709_s8 + $0x960] sm:$0xff] }
  0x5f   : > { %559 = vst [vmem:[%s4714_s9 + $0x4d0] sm:$0xff] %v558_v26  ;;  %561 = vst [vmem:[%s4714_s9 + $0x4d8] sm:$0xff] %v560_v27  ;;  %v564_v29 = vld [vmem:[%s4709_s8 + $0x968] sm:$0xff]  ;;  %v566_v30 = vld [vmem:[%s4709_s8 + $0x970] sm:$0xff] }
  0x60   : > { %563 = vst [vmem:[%s4714_s9 + $0x4e0] sm:$0xff] %v562_v28  ;;  %565 = vst [vmem:[%s4714_s9 + $0x4e8] sm:$0xff] %v564_v29  ;;  %v568_v31 = vld [vmem:[%s4709_s8 + $0x978] sm:$0xff]  ;;  %v570_v32 = vld [vmem:[%s4709_s8 + $0xa00] sm:$0xff] }
  0x61   : > { %567 = vst [vmem:[%s4714_s9 + $0x4f0] sm:$0xff] %v566_v30  ;;  %v572_v33 = vld [vmem:[%s4709_s8 + $0xa08] sm:$0xff]  ;;  %569 = vst [vmem:[%s4714_s9 + $0x4f8] sm:$0xff] %v568_v31  ;;  %v574_v34 = vld [vmem:[%s4709_s8 + $0xa10] sm:$0xff] }
  0x62   : > { %571 = vst [vmem:[%s4714_s9 + $0x500] sm:$0xff] %v570_v32  ;;  %573 = vst [vmem:[%s4714_s9 + $0x508] sm:$0xff] %v572_v33  ;;  %v576_v35 = vld [vmem:[%s4709_s8 + $0xa18] sm:$0xff]  ;;  %v578_v36 = vld [vmem:[%s4709_s8 + $0xa20] sm:$0xff] }
  0x63   : > { %575 = vst [vmem:[%s4714_s9 + $0x510] sm:$0xff] %v574_v34  ;;  %577 = vst [vmem:[%s4714_s9 + $0x518] sm:$0xff] %v576_v35  ;;  %v580_v37 = vld [vmem:[%s4709_s8 + $0xa28] sm:$0xff]  ;;  %v582_v38 = vld [vmem:[%s4709_s8 + $0xa30] sm:$0xff] }
  0x64   : > { %579 = vst [vmem:[%s4714_s9 + $0x520] sm:$0xff] %v578_v36  ;;  %v584_v39 = vld [vmem:[%s4709_s8 + $0xa38] sm:$0xff]  ;;  %581 = vst [vmem:[%s4714_s9 + $0x528] sm:$0xff] %v580_v37  ;;  %v586_v40 = vld [vmem:[%s4709_s8 + $0xa40] sm:$0xff] }
  0x65   : > { %583 = vst [vmem:[%s4714_s9 + $0x530] sm:$0xff] %v582_v38  ;;  %585 = vst [vmem:[%s4714_s9 + $0x538] sm:$0xff] %v584_v39  ;;  %v588_v41 = vld [vmem:[%s4709_s8 + $0xa48] sm:$0xff]  ;;  %v590_v42 = vld [vmem:[%s4709_s8 + $0xa50] sm:$0xff] }
  0x66   : > { %587 = vst [vmem:[%s4714_s9 + $0x540] sm:$0xff] %v586_v40  ;;  %589 = vst [vmem:[%s4714_s9 + $0x548] sm:$0xff] %v588_v41  ;;  %v592_v43 = vld [vmem:[%s4709_s8 + $0xa58] sm:$0xff]  ;;  %v594_v44 = vld [vmem:[%s4709_s8 + $0xa60] sm:$0xff] }
  0x67   : > { %591 = vst [vmem:[%s4714_s9 + $0x550] sm:$0xff] %v590_v42  ;;  %v596_v45 = vld [vmem:[%s4709_s8 + $0xa68] sm:$0xff]  ;;  %593 = vst [vmem:[%s4714_s9 + $0x558] sm:$0xff] %v592_v43  ;;  %v598_v46 = vld [vmem:[%s4709_s8 + $0xa70] sm:$0xff] }
  0x68   : > { %595 = vst [vmem:[%s4714_s9 + $0x560] sm:$0xff] %v594_v44  ;;  %597 = vst [vmem:[%s4714_s9 + $0x568] sm:$0xff] %v596_v45  ;;  %v600_v47 = vld [vmem:[%s4709_s8 + $0xa78] sm:$0xff]  ;;  %v602_v48 = vld [vmem:[%s4709_s8 + $0xb00] sm:$0xff] }
  0x69   : > { %599 = vst [vmem:[%s4714_s9 + $0x570] sm:$0xff] %v598_v46  ;;  %601 = vst [vmem:[%s4714_s9 + $0x578] sm:$0xff] %v600_v47  ;;  %v604_v49 = vld [vmem:[%s4709_s8 + $0xb08] sm:$0xff]  ;;  %v606_v50 = vld [vmem:[%s4709_s8 + $0xb10] sm:$0xff] }
  0x6a   : > { %603 = vst [vmem:[%s4714_s9 + $0x580] sm:$0xff] %v602_v48  ;;  %v608_v51 = vld [vmem:[%s4709_s8 + $0xb18] sm:$0xff]  ;;  %605 = vst [vmem:[%s4714_s9 + $0x588] sm:$0xff] %v604_v49  ;;  %v610_v52 = vld [vmem:[%s4709_s8 + $0xb20] sm:$0xff] }
  0x6b   : > { %607 = vst [vmem:[%s4714_s9 + $0x590] sm:$0xff] %v606_v50  ;;  %609 = vst [vmem:[%s4714_s9 + $0x598] sm:$0xff] %v608_v51  ;;  %v612_v53 = vld [vmem:[%s4709_s8 + $0xb28] sm:$0xff]  ;;  %v614_v54 = vld [vmem:[%s4709_s8 + $0xb30] sm:$0xff] }
  0x6c   : > { %611 = vst [vmem:[%s4714_s9 + $0x5a0] sm:$0xff] %v610_v52  ;;  %613 = vst [vmem:[%s4714_s9 + $0x5a8] sm:$0xff] %v612_v53  ;;  %v616_v55 = vld [vmem:[%s4709_s8 + $0xb38] sm:$0xff]  ;;  %v618_v56 = vld [vmem:[%s4709_s8 + $0xb40] sm:$0xff] }
  0x6d   : > { %615 = vst [vmem:[%s4714_s9 + $0x5b0] sm:$0xff] %v614_v54  ;;  %v620_v57 = vld [vmem:[%s4709_s8 + $0xb48] sm:$0xff]  ;;  %617 = vst [vmem:[%s4714_s9 + $0x5b8] sm:$0xff] %v616_v55  ;;  %v622_v58 = vld [vmem:[%s4709_s8 + $0xb50] sm:$0xff] }
  0x6e   : > { %619 = vst [vmem:[%s4714_s9 + $0x5c0] sm:$0xff] %v618_v56  ;;  %621 = vst [vmem:[%s4714_s9 + $0x5c8] sm:$0xff] %v620_v57  ;;  %v624_v59 = vld [vmem:[%s4709_s8 + $0xb58] sm:$0xff]  ;;  %v626_v60 = vld [vmem:[%s4709_s8 + $0xb60] sm:$0xff] }
  0x6f   : > { %623 = vst [vmem:[%s4714_s9 + $0x5d0] sm:$0xff] %v622_v58  ;;  %625 = vst [vmem:[%s4714_s9 + $0x5d8] sm:$0xff] %v624_v59  ;;  %v628_v61 = vld [vmem:[%s4709_s8 + $0xb68] sm:$0xff]  ;;  %v630_v62 = vld [vmem:[%s4709_s8 + $0xb70] sm:$0xff] }
  0x70   : > { %627 = vst [vmem:[%s4714_s9 + $0x5e0] sm:$0xff] %v626_v60  ;;  %v632_v63 = vld [vmem:[%s4709_s8 + $0xb78] sm:$0xff]  ;;  %629 = vst [vmem:[%s4714_s9 + $0x5e8] sm:$0xff] %v628_v61  ;;  %v634_v0 = vld [vmem:[%s4709_s8 + $0xc00] sm:$0xff] }
  0x71   : > { %631 = vst [vmem:[%s4714_s9 + $0x5f0] sm:$0xff] %v630_v62  ;;  %633 = vst [vmem:[%s4714_s9 + $0x5f8] sm:$0xff] %v632_v63  ;;  %v636_v1 = vld [vmem:[%s4709_s8 + $0xc08] sm:$0xff]  ;;  %v638_v2 = vld [vmem:[%s4709_s8 + $0xc10] sm:$0xff] }
  0x72   : > { %635 = vst [vmem:[%s4714_s9 + $0x600] sm:$0xff] %v634_v0  ;;  %637 = vst [vmem:[%s4714_s9 + $0x608] sm:$0xff] %v636_v1  ;;  %v640_v3 = vld [vmem:[%s4709_s8 + $0xc18] sm:$0xff]  ;;  %v642_v4 = vld [vmem:[%s4709_s8 + $0xc20] sm:$0xff] }
  0x73   : > { %639 = vst [vmem:[%s4714_s9 + $0x610] sm:$0xff] %v638_v2  ;;  %v644_v5 = vld [vmem:[%s4709_s8 + $0xc28] sm:$0xff]  ;;  %641 = vst [vmem:[%s4714_s9 + $0x618] sm:$0xff] %v640_v3  ;;  %v646_v6 = vld [vmem:[%s4709_s8 + $0xc30] sm:$0xff] }
  0x74   : > { %643 = vst [vmem:[%s4714_s9 + $0x620] sm:$0xff] %v642_v4  ;;  %645 = vst [vmem:[%s4714_s9 + $0x628] sm:$0xff] %v644_v5  ;;  %v648_v7 = vld [vmem:[%s4709_s8 + $0xc38] sm:$0xff]  ;;  %v650_v8 = vld [vmem:[%s4709_s8 + $0xc40] sm:$0xff] }
  0x75   : > { %647 = vst [vmem:[%s4714_s9 + $0x630] sm:$0xff] %v646_v6  ;;  %649 = vst [vmem:[%s4714_s9 + $0x638] sm:$0xff] %v648_v7  ;;  %v652_v9 = vld [vmem:[%s4709_s8 + $0xc48] sm:$0xff]  ;;  %v654_v10 = vld [vmem:[%s4709_s8 + $0xc50] sm:$0xff] }
  0x76   : > { %651 = vst [vmem:[%s4714_s9 + $0x640] sm:$0xff] %v650_v8  ;;  %v656_v11 = vld [vmem:[%s4709_s8 + $0xc58] sm:$0xff]  ;;  %653 = vst [vmem:[%s4714_s9 + $0x648] sm:$0xff] %v652_v9  ;;  %v658_v12 = vld [vmem:[%s4709_s8 + $0xc60] sm:$0xff] }
  0x77   : > { %655 = vst [vmem:[%s4714_s9 + $0x650] sm:$0xff] %v654_v10  ;;  %657 = vst [vmem:[%s4714_s9 + $0x658] sm:$0xff] %v656_v11  ;;  %v660_v13 = vld [vmem:[%s4709_s8 + $0xc68] sm:$0xff]  ;;  %v662_v14 = vld [vmem:[%s4709_s8 + $0xc70] sm:$0xff] }
  0x78   : > { %659 = vst [vmem:[%s4714_s9 + $0x660] sm:$0xff] %v658_v12  ;;  %661 = vst [vmem:[%s4714_s9 + $0x668] sm:$0xff] %v660_v13  ;;  %v664_v15 = vld [vmem:[%s4709_s8 + $0xc78] sm:$0xff]  ;;  %v666_v16 = vld [vmem:[%s4709_s8 + $0xd00] sm:$0xff] }
  0x79   : > { %663 = vst [vmem:[%s4714_s9 + $0x670] sm:$0xff] %v662_v14  ;;  %v668_v17 = vld [vmem:[%s4709_s8 + $0xd08] sm:$0xff]  ;;  %665 = vst [vmem:[%s4714_s9 + $0x678] sm:$0xff] %v664_v15  ;;  %v670_v18 = vld [vmem:[%s4709_s8 + $0xd10] sm:$0xff] }
  0x7a   : > { %667 = vst [vmem:[%s4714_s9 + $0x680] sm:$0xff] %v666_v16  ;;  %669 = vst [vmem:[%s4714_s9 + $0x688] sm:$0xff] %v668_v17  ;;  %v672_v19 = vld [vmem:[%s4709_s8 + $0xd18] sm:$0xff]  ;;  %v674_v20 = vld [vmem:[%s4709_s8 + $0xd20] sm:$0xff] }
  0x7b   : > { %671 = vst [vmem:[%s4714_s9 + $0x690] sm:$0xff] %v670_v18  ;;  %673 = vst [vmem:[%s4714_s9 + $0x698] sm:$0xff] %v672_v19  ;;  %v676_v21 = vld [vmem:[%s4709_s8 + $0xd28] sm:$0xff]  ;;  %v678_v22 = vld [vmem:[%s4709_s8 + $0xd30] sm:$0xff] }
  0x7c   : > { %675 = vst [vmem:[%s4714_s9 + $0x6a0] sm:$0xff] %v674_v20  ;;  %v680_v23 = vld [vmem:[%s4709_s8 + $0xd38] sm:$0xff]  ;;  %677 = vst [vmem:[%s4714_s9 + $0x6a8] sm:$0xff] %v676_v21  ;;  %v682_v24 = vld [vmem:[%s4709_s8 + $0xd40] sm:$0xff] }
  0x7d   : > { %679 = vst [vmem:[%s4714_s9 + $0x6b0] sm:$0xff] %v678_v22  ;;  %681 = vst [vmem:[%s4714_s9 + $0x6b8] sm:$0xff] %v680_v23  ;;  %v684_v25 = vld [vmem:[%s4709_s8 + $0xd48] sm:$0xff]  ;;  %v686_v26 = vld [vmem:[%s4709_s8 + $0xd50] sm:$0xff] }
  0x7e   : > { %683 = vst [vmem:[%s4714_s9 + $0x6c0] sm:$0xff] %v682_v24  ;;  %685 = vst [vmem:[%s4714_s9 + $0x6c8] sm:$0xff] %v684_v25  ;;  %v688_v27 = vld [vmem:[%s4709_s8 + $0xd58] sm:$0xff]  ;;  %v690_v28 = vld [vmem:[%s4709_s8 + $0xd60] sm:$0xff] }
  0x7f   : > { %687 = vst [vmem:[%s4714_s9 + $0x6d0] sm:$0xff] %v686_v26  ;;  %v692_v29 = vld [vmem:[%s4709_s8 + $0xd68] sm:$0xff]  ;;  %689 = vst [vmem:[%s4714_s9 + $0x6d8] sm:$0xff] %v688_v27  ;;  %v694_v30 = vld [vmem:[%s4709_s8 + $0xd70] sm:$0xff] }
  0x80   : > { %691 = vst [vmem:[%s4714_s9 + $0x6e0] sm:$0xff] %v690_v28  ;;  %693 = vst [vmem:[%s4714_s9 + $0x6e8] sm:$0xff] %v692_v29  ;;  %v696_v31 = vld [vmem:[%s4709_s8 + $0xd78] sm:$0xff]  ;;  %v698_v32 = vld [vmem:[%s4709_s8 + $0xe00] sm:$0xff] }
  0x81   : > { %695 = vst [vmem:[%s4714_s9 + $0x6f0] sm:$0xff] %v694_v30  ;;  %697 = vst [vmem:[%s4714_s9 + $0x6f8] sm:$0xff] %v696_v31  ;;  %v700_v33 = vld [vmem:[%s4709_s8 + $0xe08] sm:$0xff]  ;;  %v702_v34 = vld [vmem:[%s4709_s8 + $0xe10] sm:$0xff] }
  0x82   : > { %699 = vst [vmem:[%s4714_s9 + $0x700] sm:$0xff] %v698_v32  ;;  %v704_v35 = vld [vmem:[%s4709_s8 + $0xe18] sm:$0xff]  ;;  %701 = vst [vmem:[%s4714_s9 + $0x708] sm:$0xff] %v700_v33  ;;  %v706_v36 = vld [vmem:[%s4709_s8 + $0xe20] sm:$0xff] }
  0x83   : > { %703 = vst [vmem:[%s4714_s9 + $0x710] sm:$0xff] %v702_v34  ;;  %705 = vst [vmem:[%s4714_s9 + $0x718] sm:$0xff] %v704_v35  ;;  %v708_v37 = vld [vmem:[%s4709_s8 + $0xe28] sm:$0xff]  ;;  %v710_v38 = vld [vmem:[%s4709_s8 + $0xe30] sm:$0xff] }
  0x84   : > { %707 = vst [vmem:[%s4714_s9 + $0x720] sm:$0xff] %v706_v36  ;;  %709 = vst [vmem:[%s4714_s9 + $0x728] sm:$0xff] %v708_v37  ;;  %v712_v39 = vld [vmem:[%s4709_s8 + $0xe38] sm:$0xff]  ;;  %v714_v40 = vld [vmem:[%s4709_s8 + $0xe40] sm:$0xff] }
  0x85   : > { %711 = vst [vmem:[%s4714_s9 + $0x730] sm:$0xff] %v710_v38  ;;  %v716_v41 = vld [vmem:[%s4709_s8 + $0xe48] sm:$0xff]  ;;  %713 = vst [vmem:[%s4714_s9 + $0x738] sm:$0xff] %v712_v39  ;;  %v718_v42 = vld [vmem:[%s4709_s8 + $0xe50] sm:$0xff] }
  0x86   : > { %715 = vst [vmem:[%s4714_s9 + $0x740] sm:$0xff] %v714_v40  ;;  %717 = vst [vmem:[%s4714_s9 + $0x748] sm:$0xff] %v716_v41  ;;  %v720_v43 = vld [vmem:[%s4709_s8 + $0xe58] sm:$0xff]  ;;  %v722_v44 = vld [vmem:[%s4709_s8 + $0xe60] sm:$0xff] }
  0x87   : > { %719 = vst [vmem:[%s4714_s9 + $0x750] sm:$0xff] %v718_v42  ;;  %721 = vst [vmem:[%s4714_s9 + $0x758] sm:$0xff] %v720_v43  ;;  %v724_v45 = vld [vmem:[%s4709_s8 + $0xe68] sm:$0xff]  ;;  %v726_v46 = vld [vmem:[%s4709_s8 + $0xe70] sm:$0xff] }
  0x88   : > { %723 = vst [vmem:[%s4714_s9 + $0x760] sm:$0xff] %v722_v44  ;;  %v728_v47 = vld [vmem:[%s4709_s8 + $0xe78] sm:$0xff]  ;;  %725 = vst [vmem:[%s4714_s9 + $0x768] sm:$0xff] %v724_v45  ;;  %v730_v48 = vld [vmem:[%s4709_s8 + $0xf00] sm:$0xff] }
  0x89   : > { %727 = vst [vmem:[%s4714_s9 + $0x770] sm:$0xff] %v726_v46  ;;  %729 = vst [vmem:[%s4714_s9 + $0x778] sm:$0xff] %v728_v47  ;;  %v732_v49 = vld [vmem:[%s4709_s8 + $0xf08] sm:$0xff]  ;;  %v734_v50 = vld [vmem:[%s4709_s8 + $0xf10] sm:$0xff] }
  0x8a   : > { %731 = vst [vmem:[%s4714_s9 + $0x780] sm:$0xff] %v730_v48  ;;  %733 = vst [vmem:[%s4714_s9 + $0x788] sm:$0xff] %v732_v49  ;;  %v736_v51 = vld [vmem:[%s4709_s8 + $0xf18] sm:$0xff]  ;;  %v738_v52 = vld [vmem:[%s4709_s8 + $0xf20] sm:$0xff] }
  0x8b   : > { %735 = vst [vmem:[%s4714_s9 + $0x790] sm:$0xff] %v734_v50  ;;  %v740_v53 = vld [vmem:[%s4709_s8 + $0xf28] sm:$0xff]  ;;  %737 = vst [vmem:[%s4714_s9 + $0x798] sm:$0xff] %v736_v51  ;;  %v742_v54 = vld [vmem:[%s4709_s8 + $0xf30] sm:$0xff] }
  0x8c   : > { %739 = vst [vmem:[%s4714_s9 + $0x7a0] sm:$0xff] %v738_v52  ;;  %741 = vst [vmem:[%s4714_s9 + $0x7a8] sm:$0xff] %v740_v53  ;;  %v744_v55 = vld [vmem:[%s4709_s8 + $0xf38] sm:$0xff]  ;;  %v746_v56 = vld [vmem:[%s4709_s8 + $0xf40] sm:$0xff] }
  0x8d   : > { %743 = vst [vmem:[%s4714_s9 + $0x7b0] sm:$0xff] %v742_v54  ;;  %745 = vst [vmem:[%s4714_s9 + $0x7b8] sm:$0xff] %v744_v55  ;;  %v748_v57 = vld [vmem:[%s4709_s8 + $0xf48] sm:$0xff]  ;;  %v750_v58 = vld [vmem:[%s4709_s8 + $0xf50] sm:$0xff] }
  0x8e   : > { %747 = vst [vmem:[%s4714_s9 + $0x7c0] sm:$0xff] %v746_v56  ;;  %v752_v59 = vld [vmem:[%s4709_s8 + $0xf58] sm:$0xff]  ;;  %749 = vst [vmem:[%s4714_s9 + $0x7c8] sm:$0xff] %v748_v57  ;;  %v754_v60 = vld [vmem:[%s4709_s8 + $0xf60] sm:$0xff] }
  0x8f   : > { %751 = vst [vmem:[%s4714_s9 + $0x7d0] sm:$0xff] %v750_v58  ;;  %753 = vst [vmem:[%s4714_s9 + $0x7d8] sm:$0xff] %v752_v59  ;;  %v756_v61 = vld [vmem:[%s4709_s8 + $0xf68] sm:$0xff]  ;;  %v758_v62 = vld [vmem:[%s4709_s8 + $0xf70] sm:$0xff] }
  0x90   : > { %755 = vst [vmem:[%s4714_s9 + $0x7e0] sm:$0xff] %v754_v60  ;;  %757 = vst [vmem:[%s4714_s9 + $0x7e8] sm:$0xff] %v756_v61  ;;  %v760_v63 = vld [vmem:[%s4709_s8 + $0xf78] sm:$0xff] }
  0x91   : > { %759 = vst [vmem:[%s4714_s9 + $0x7f0] sm:$0xff] %v758_v62  ;;  %761 = vst [vmem:[%s4714_s9 + $0x7f8] sm:$0xff] %v760_v63 }
  0x92 PF: > { %777 = sbr.rel (!%p4691_p3) target bundleno = 182 (0xb6), region = 51  ;;  %s779_s10 = sand.u32 (%p4691_p3), 1, %s4614_s19  }
  0x93   : > { %s4411_s11 = sshll.u32 (%p4691_p3), %s4622_s21, 8  ;;  %s4140_s12 = sshll.u32 (%p4691_p3), %s779_s10, 9 }
  0x94   : > { %s5232_s15 = scalar_lea.vmem (%p4691_p3), %s5893_s3, %s4411_s11  ;;  %s5237_s16 = scalar_lea.vmem (%p4691_p3), [#allocation5], %s4140_s12 }
  0x95   : > { %v801_v0 = vld [vmem:[%s5232_s15] sm:$0xff] (%p4691_p3)  ;;  %v803_v1 = vld [vmem:[%s5232_s15 + $0x8] sm:$0xff] (%p4691_p3)  ;;  %v805_v2 = vld [vmem:[%s5232_s15 + $0x10] sm:$0xff] (%p4691_p3) }
  0x96   : > { %802 = vst [vmem:[%s5237_s16] sm:$0xff] (%p4691_p3), %v801_v0  ;;  %804 = vst [vmem:[%s5237_s16 + $0x8] sm:$0xff] (%p4691_p3), %v803_v1  ;;  %v807_v3 = vld [vmem:[%s5232_s15 + $0x18] sm:$0xff] (%p4691_p3)  ;;  %v809_v4 = vld [vmem:[%s5232_s15 + $0x20] sm:$0xff] (%p4691_p3) }
  0x97   : > { %806 = vst [vmem:[%s5237_s16 + $0x10] sm:$0xff] (%p4691_p3), %v805_v2  ;;  %v811_v5 = vld [vmem:[%s5232_s15 + $0x28] sm:$0xff] (%p4691_p3)  ;;  %808 = vst [vmem:[%s5237_s16 + $0x18] sm:$0xff] (%p4691_p3), %v807_v3  ;;  %v813_v6 = vld [vmem:[%s5232_s15 + $0x30] sm:$0xff] (%p4691_p3) }
  0x98   : > { %810 = vst [vmem:[%s5237_s16 + $0x20] sm:$0xff] (%p4691_p3), %v809_v4  ;;  %812 = vst [vmem:[%s5237_s16 + $0x28] sm:$0xff] (%p4691_p3), %v811_v5  ;;  %v815_v7 = vld [vmem:[%s5232_s15 + $0x38] sm:$0xff] (%p4691_p3)  ;;  %v817_v8 = vld [vmem:[%s5232_s15 + $0x40] sm:$0xff] (%p4691_p3) }
  0x99   : > { %814 = vst [vmem:[%s5237_s16 + $0x30] sm:$0xff] %v813_v6  ;;  %816 = vst [vmem:[%s5237_s16 + $0x38] sm:$0xff] %v815_v7  ;;  %v819_v9 = vld [vmem:[%s5232_s15 + $0x48] sm:$0xff]  ;;  %v821_v10 = vld [vmem:[%s5232_s15 + $0x50] sm:$0xff] }
  0x9a   : > { %818 = vst [vmem:[%s5237_s16 + $0x40] sm:$0xff] %v817_v8  ;;  %v823_v11 = vld [vmem:[%s5232_s15 + $0x58] sm:$0xff]  ;;  %820 = vst [vmem:[%s5237_s16 + $0x48] sm:$0xff] %v819_v9  ;;  %v825_v12 = vld [vmem:[%s5232_s15 + $0x60] sm:$0xff] }
  0x9b   : > { %822 = vst [vmem:[%s5237_s16 + $0x50] sm:$0xff] %v821_v10  ;;  %824 = vst [vmem:[%s5237_s16 + $0x58] sm:$0xff] %v823_v11  ;;  %v827_v13 = vld [vmem:[%s5232_s15 + $0x68] sm:$0xff]  ;;  %v829_v14 = vld [vmem:[%s5232_s15 + $0x70] sm:$0xff] }
  0x9c   : > { %826 = vst [vmem:[%s5237_s16 + $0x60] sm:$0xff] %v825_v12  ;;  %828 = vst [vmem:[%s5237_s16 + $0x68] sm:$0xff] %v827_v13  ;;  %v831_v15 = vld [vmem:[%s5232_s15 + $0x78] sm:$0xff]  ;;  %v833_v16 = vld [vmem:[%s5232_s15 + $0x80] sm:$0xff] }
  0x9d   : > { %830 = vst [vmem:[%s5237_s16 + $0x70] sm:$0xff] %v829_v14  ;;  %v835_v17 = vld [vmem:[%s5232_s15 + $0x88] sm:$0xff]  ;;  %832 = vst [vmem:[%s5237_s16 + $0x78] sm:$0xff] %v831_v15  ;;  %v837_v18 = vld [vmem:[%s5232_s15 + $0x90] sm:$0xff] }
  0x9e   : > { %834 = vst [vmem:[%s5237_s16 + $0x80] sm:$0xff] %v833_v16  ;;  %836 = vst [vmem:[%s5237_s16 + $0x88] sm:$0xff] %v835_v17  ;;  %v839_v19 = vld [vmem:[%s5232_s15 + $0x98] sm:$0xff]  ;;  %v841_v20 = vld [vmem:[%s5232_s15 + $0xa0] sm:$0xff] }
  0x9f   : > { %838 = vst [vmem:[%s5237_s16 + $0x90] sm:$0xff] %v837_v18  ;;  %840 = vst [vmem:[%s5237_s16 + $0x98] sm:$0xff] %v839_v19  ;;  %v843_v21 = vld [vmem:[%s5232_s15 + $0xa8] sm:$0xff]  ;;  %v845_v22 = vld [vmem:[%s5232_s15 + $0xb0] sm:$0xff] }
  0xa0   : > { %842 = vst [vmem:[%s5237_s16 + $0xa0] sm:$0xff] %v841_v20  ;;  %v847_v23 = vld [vmem:[%s5232_s15 + $0xb8] sm:$0xff]  ;;  %844 = vst [vmem:[%s5237_s16 + $0xa8] sm:$0xff] %v843_v21  ;;  %v849_v24 = vld [vmem:[%s5232_s15 + $0xc0] sm:$0xff] }
  0xa1   : > { %846 = vst [vmem:[%s5237_s16 + $0xb0] sm:$0xff] %v845_v22  ;;  %848 = vst [vmem:[%s5237_s16 + $0xb8] sm:$0xff] %v847_v23  ;;  %v851_v25 = vld [vmem:[%s5232_s15 + $0xc8] sm:$0xff]  ;;  %v853_v26 = vld [vmem:[%s5232_s15 + $0xd0] sm:$0xff] }
  0xa2   : > { %850 = vst [vmem:[%s5237_s16 + $0xc0] sm:$0xff] %v849_v24  ;;  %852 = vst [vmem:[%s5237_s16 + $0xc8] sm:$0xff] %v851_v25  ;;  %v855_v27 = vld [vmem:[%s5232_s15 + $0xd8] sm:$0xff]  ;;  %v857_v28 = vld [vmem:[%s5232_s15 + $0xe0] sm:$0xff] }
  0xa3   : > { %854 = vst [vmem:[%s5237_s16 + $0xd0] sm:$0xff] %v853_v26  ;;  %v859_v29 = vld [vmem:[%s5232_s15 + $0xe8] sm:$0xff]  ;;  %856 = vst [vmem:[%s5237_s16 + $0xd8] sm:$0xff] %v855_v27  ;;  %v861_v30 = vld [vmem:[%s5232_s15 + $0xf0] sm:$0xff] }
  0xa4   : > { %858 = vst [vmem:[%s5237_s16 + $0xe0] sm:$0xff] %v857_v28  ;;  %860 = vst [vmem:[%s5237_s16 + $0xe8] sm:$0xff] %v859_v29  ;;  %v863_v31 = vld [vmem:[%s5232_s15 + $0xf8] sm:$0xff]  ;;  %v865_v32 = vld [vmem:[%s5232_s15 + $0x200] sm:$0xff] }
  0xa5   : > { %862 = vst [vmem:[%s5237_s16 + $0xf0] sm:$0xff] %v861_v30  ;;  %864 = vst [vmem:[%s5237_s16 + $0xf8] sm:$0xff] %v863_v31  ;;  %v867_v33 = vld [vmem:[%s5232_s15 + $0x208] sm:$0xff]  ;;  %v869_v34 = vld [vmem:[%s5232_s15 + $0x210] sm:$0xff] }
  0xa6   : > { %866 = vst [vmem:[%s5237_s16 + $0x100] sm:$0xff] %v865_v32  ;;  %v871_v35 = vld [vmem:[%s5232_s15 + $0x218] sm:$0xff]  ;;  %868 = vst [vmem:[%s5237_s16 + $0x108] sm:$0xff] %v867_v33  ;;  %v873_v36 = vld [vmem:[%s5232_s15 + $0x220] sm:$0xff] }
  0xa7   : > { %870 = vst [vmem:[%s5237_s16 + $0x110] sm:$0xff] %v869_v34  ;;  %872 = vst [vmem:[%s5237_s16 + $0x118] sm:$0xff] %v871_v35  ;;  %v875_v37 = vld [vmem:[%s5232_s15 + $0x228] sm:$0xff]  ;;  %v877_v38 = vld [vmem:[%s5232_s15 + $0x230] sm:$0xff] }
  0xa8   : > { %874 = vst [vmem:[%s5237_s16 + $0x120] sm:$0xff] %v873_v36  ;;  %876 = vst [vmem:[%s5237_s16 + $0x128] sm:$0xff] %v875_v37  ;;  %v879_v39 = vld [vmem:[%s5232_s15 + $0x238] sm:$0xff]  ;;  %v881_v40 = vld [vmem:[%s5232_s15 + $0x240] sm:$0xff] }
  0xa9   : > { %878 = vst [vmem:[%s5237_s16 + $0x130] sm:$0xff] %v877_v38  ;;  %v883_v41 = vld [vmem:[%s5232_s15 + $0x248] sm:$0xff]  ;;  %880 = vst [vmem:[%s5237_s16 + $0x138] sm:$0xff] %v879_v39  ;;  %v885_v42 = vld [vmem:[%s5232_s15 + $0x250] sm:$0xff] }
  0xaa   : > { %882 = vst [vmem:[%s5237_s16 + $0x140] sm:$0xff] %v881_v40  ;;  %884 = vst [vmem:[%s5237_s16 + $0x148] sm:$0xff] %v883_v41  ;;  %v887_v43 = vld [vmem:[%s5232_s15 + $0x258] sm:$0xff]  ;;  %v889_v44 = vld [vmem:[%s5232_s15 + $0x260] sm:$0xff] }
  0xab   : > { %886 = vst [vmem:[%s5237_s16 + $0x150] sm:$0xff] %v885_v42  ;;  %888 = vst [vmem:[%s5237_s16 + $0x158] sm:$0xff] %v887_v43  ;;  %v891_v45 = vld [vmem:[%s5232_s15 + $0x268] sm:$0xff]  ;;  %v893_v46 = vld [vmem:[%s5232_s15 + $0x270] sm:$0xff] }
  0xac   : > { %890 = vst [vmem:[%s5237_s16 + $0x160] sm:$0xff] %v889_v44  ;;  %v895_v47 = vld [vmem:[%s5232_s15 + $0x278] sm:$0xff]  ;;  %892 = vst [vmem:[%s5237_s16 + $0x168] sm:$0xff] %v891_v45  ;;  %v897_v48 = vld [vmem:[%s5232_s15 + $0x280] sm:$0xff] }
  0xad   : > { %894 = vst [vmem:[%s5237_s16 + $0x170] sm:$0xff] %v893_v46  ;;  %896 = vst [vmem:[%s5237_s16 + $0x178] sm:$0xff] %v895_v47  ;;  %v899_v49 = vld [vmem:[%s5232_s15 + $0x288] sm:$0xff]  ;;  %v901_v50 = vld [vmem:[%s5232_s15 + $0x290] sm:$0xff] }
  0xae   : > { %898 = vst [vmem:[%s5237_s16 + $0x180] sm:$0xff] %v897_v48  ;;  %900 = vst [vmem:[%s5237_s16 + $0x188] sm:$0xff] %v899_v49  ;;  %v903_v51 = vld [vmem:[%s5232_s15 + $0x298] sm:$0xff]  ;;  %v905_v52 = vld [vmem:[%s5232_s15 + $0x2a0] sm:$0xff] }
  0xaf   : > { %902 = vst [vmem:[%s5237_s16 + $0x190] sm:$0xff] %v901_v50  ;;  %v907_v53 = vld [vmem:[%s5232_s15 + $0x2a8] sm:$0xff]  ;;  %904 = vst [vmem:[%s5237_s16 + $0x198] sm:$0xff] %v903_v51  ;;  %v909_v54 = vld [vmem:[%s5232_s15 + $0x2b0] sm:$0xff] }
  0xb0   : > { %906 = vst [vmem:[%s5237_s16 + $0x1a0] sm:$0xff] %v905_v52  ;;  %908 = vst [vmem:[%s5237_s16 + $0x1a8] sm:$0xff] %v907_v53  ;;  %v911_v55 = vld [vmem:[%s5232_s15 + $0x2b8] sm:$0xff]  ;;  %v913_v56 = vld [vmem:[%s5232_s15 + $0x2c0] sm:$0xff] }
  0xb1   : > { %910 = vst [vmem:[%s5237_s16 + $0x1b0] sm:$0xff] %v909_v54  ;;  %912 = vst [vmem:[%s5237_s16 + $0x1b8] sm:$0xff] %v911_v55  ;;  %v915_v57 = vld [vmem:[%s5232_s15 + $0x2c8] sm:$0xff]  ;;  %v917_v58 = vld [vmem:[%s5232_s15 + $0x2d0] sm:$0xff] }
  0xb2   : > { %914 = vst [vmem:[%s5237_s16 + $0x1c0] sm:$0xff] %v913_v56  ;;  %v919_v59 = vld [vmem:[%s5232_s15 + $0x2d8] sm:$0xff]  ;;  %916 = vst [vmem:[%s5237_s16 + $0x1c8] sm:$0xff] %v915_v57  ;;  %v921_v60 = vld [vmem:[%s5232_s15 + $0x2e0] sm:$0xff] }
  0xb3   : > { %918 = vst [vmem:[%s5237_s16 + $0x1d0] sm:$0xff] %v917_v58  ;;  %920 = vst [vmem:[%s5237_s16 + $0x1d8] sm:$0xff] %v919_v59  ;;  %v923_v61 = vld [vmem:[%s5232_s15 + $0x2e8] sm:$0xff]  ;;  %v925_v62 = vld [vmem:[%s5232_s15 + $0x2f0] sm:$0xff] }
  0xb4   : > { %922 = vst [vmem:[%s5237_s16 + $0x1e0] sm:$0xff] %v921_v60  ;;  %924 = vst [vmem:[%s5237_s16 + $0x1e8] sm:$0xff] %v923_v61  ;;  %v927_v63 = vld [vmem:[%s5232_s15 + $0x2f8] sm:$0xff] }
  0xb5   : > { %926 = vst [vmem:[%s5237_s16 + $0x1f0] sm:$0xff] %v925_v62  ;;  %928 = vst [vmem:[%s5237_s16 + $0x1f8] sm:$0xff] %v927_v63 }
  0xb6 PF: > { %p4143_p6 = scmp.ge.s32.totalorder %s4626_s22, 1  ;;  %p933_p7 = scmp.lt.s32.totalorder %s4626_s22, 3 }
  0xb8   : > { %p934_p8 = pnand %p4143_p6, %p933_p7 }
  0xb9   : > { %s940_s17 = sand.u32 (!%p934_p8), 1, %s4610_s18   ;;  %v4628_v0 = vmov (!%p934_p8), 0   ;;  %s4146_s6 = sshll.u32 (!%p934_p8), %s4618_s20, 5  ;;  %vm1044_vm0 = vcmask (!%p934_p8), 7168  }
  0xba   : > { %937 = sbr.rel (%p934_p8) target bundleno = 974 (0x3ce), region = 74  ;;  %s4144_s24 = sshll.u32 (!%p934_p8), %s940_s17, 11  ;;  %2625 = vmatprep.mubr.bf16.mxu0 (!%p934_p8), %v4628_v0  ;;  %2668 = vmatprep.mubr.bf16.mxu1 (!%p934_p8), %v4628_v0 }
  0xbb   : > { %4457 = vset.pattern.permute.xlu1 (!%p934_p8), %v4628_v0  ;;  %4456 = vset.pattern.permute.xlu0 (!%p934_p8), %v4628_v0  ;;  %s5373_s25 = scalar_lea.vmem (!%p934_p8), [#allocation4], %s4144_s24  ;;  %p5648_p9 = scmp.lt.s32.totalorder (!%p934_p8), %s4146_s6, 63 }
  0xbc   : > { %v1051_v1 = vld [vmem:[%s5373_s25] sm:$0xff] (!%p934_p8)  ;;  %v1052_v3 = vld [vmem:[%s5373_s25 + $0x8] sm:$0xff] (!%p934_p8)  ;;  %v1053_v63 = vld [vmem:[%s5373_s25 + $0x10] sm:$0xff] (!%p934_p8)  ;;  %s4145_s11 = sshll.u32 (!%p934_p8), %s940_s17, 9  ;;  %p1020_p10 = scmp.lt.s32.totalorder (!%p934_p8), %s4618_s20, 1 }
  0xbd   : > { %v1067_v2 = vld [vmem:[%s5373_s25 + $0x80] sm:$0xff] (!%p934_p8)  ;;  %v1068_v6 = vld [vmem:[%s5373_s25 + $0x88] sm:$0xff] (!%p934_p8)  ;;  %s5708_s12 = scalar_lea.vmem (!%p934_p8), [#allocation5], %s4145_s11 }
  0xbe   : > { %v4153_v4 = vcombine.high (!%p934_p8), %v1051_v1, %v1067_v2  ;;  %v4152_v5 = vcombine.low (!%p934_p8), %v1051_v1, %v1067_v2  ;;  %v1083_v7 = vld [vmem:[%s5373_s25 + $0x100] sm:$0xff] (!%p934_p8)  ;;  %v4155_v9 = vcombine.high (!%p934_p8), %v1052_v3, %v1068_v6  ;;  %v4154_v10 = vcombine.low (!%p934_p8), %v1052_v3, %v1068_v6  ;;  %v1084_v12 = vld [vmem:[%s5373_s25 + $0x108] sm:$0xff] (!%p934_p8)  ;;  %v1069_v1 = vld [vmem:[%s5373_s25 + $0x90] sm:$0xff] (!%p934_p8) }
  0xbf   : > { %v1099_v8 = vld [vmem:[%s5373_s25 + $0x180] sm:$0xff] (!%p934_p8)  ;;  %v1100_v13 = vld [vmem:[%s5373_s25 + $0x188] sm:$0xff] (!%p934_p8)  ;;  %v1054_v2 = vld [vmem:[%s5373_s25 + $0x18] sm:$0xff] (!%p934_p8)  ;;  %v4157_v6 = vcombine.high (!%p934_p8), %v1053_v63, %v1069_v1 }
  0xc0   : > { %v4185_v11 = vcombine.high (!%p934_p8), %v1083_v7, %v1099_v8  ;;  %v1115_v14 = vld [vmem:[%s5373_s25 + $0x200] sm:$0xff] (!%p934_p8)  ;;  %2593 = vmatprep.subr.bf16.mxu0 (!%p934_p8), %v4153_v4  ;;  %v4187_v15 = vcombine.high (!%p934_p8), %v1084_v12, %v1100_v13  ;;  %v1116_v17 = vld [vmem:[%s5373_s25 + $0x208] sm:$0xff] (!%p934_p8)  ;;  %2636 = vmatprep.subr.bf16.mxu1 (!%p934_p8), %v4155_v9  ;;  %v4184_v19 = vcombine.low (!%p934_p8), %v1083_v7, %v1099_v8  ;;  %v1070_v3 = vld [vmem:[%s5373_s25 + $0x98] sm:$0xff] (!%p934_p8) }
  0xc1   : > { %v1131_v16 = vld [vmem:[%s5373_s25 + $0x280] sm:$0xff]  ;;  %v1132_v18 = vld [vmem:[%s5373_s25 + $0x288] sm:$0xff]  ;;  %2594 = vmatpush1.bf16.msra.mxu0 %v4152_v5  ;;  %2637 = vmatpush1.bf16.msra.mxu1 %v4154_v10  ;;  %v4186_v20 = vcombine.low %v1084_v12, %v1100_v13  ;;  %v4159_v7 = vcombine.high %v1054_v2, %v1070_v3  ;;  %v1085_v8 = vld [vmem:[%s5373_s25 + $0x110] sm:$0xff]  ;;  %v4156_v13 = vcombine.low %v1053_v63, %v1069_v1  ;;  %s5905_s6 = smov (!%p5648_p9, %s4146_s6), 63  ;;  %s5907_s20 = smov (!%p1020_p10, %s4618_s20), 1 }
  0xc2   : > { %2595 = vmatprep.subr.bf16.mxu0 %v4185_v11  ;;  %v4217_v21 = vcombine.high %v1115_v14, %v1131_v16  ;;  %2638 = vmatprep.subr.bf16.mxu1 %v4187_v15  ;;  %v4219_v22 = vcombine.high %v1116_v17, %v1132_v18  ;;  %v1147_v23 = vld [vmem:[%s5373_s25 + $0x300] sm:$0xff]  ;;  %v1148_v25 = vld [vmem:[%s5373_s25 + $0x308] sm:$0xff]  ;;  %v4216_v27 = vcombine.low %v1115_v14, %v1131_v16  ;;  %v1101_v9 = vld [vmem:[%s5373_s25 + $0x190] sm:$0xff]  ;;  %s5669_s10 = scalar_lea.vmem %s5892_s2, %s5905_s6  ;;  %s4412_s18 = sshll.u32 %s5907_s20, 4 }
  0xc3   : > { %v1163_v24 = vld [vmem:[%s5373_s25 + $0x380] sm:$0xff]  ;;  %v1164_v26 = vld [vmem:[%s5373_s25 + $0x388] sm:$0xff]  ;;  %v4218_v28 = vcombine.low %v1116_v17, %v1132_v18  ;;  %v1086_v11 = vld [vmem:[%s5373_s25 + $0x118] sm:$0xff]  ;;  %v4158_v14 = vcombine.low %v1054_v2, %v1070_v3  ;;  %v4189_v15 = vcombine.high %v1085_v8, %v1101_v9  ;;  %s1037_s15 = scalar_lea.vmem %s5895_s5, %s4412_s18  ;;  %s1027_s24 = scalar_lea.vmem %s5894_s4, %s4412_s18 }
  0xc4   : > { %v4249_v29 = vcombine.high %v1147_v23, %v1163_v24  ;;  %v4251_v30 = vcombine.high %v1148_v25, %v1164_v26  ;;  %v1179_v31 = vld [vmem:[%s5373_s25 + $0x400] sm:$0xff]  ;;  %v1180_v33 = vld [vmem:[%s5373_s25 + $0x408] sm:$0xff]  ;;  %v4248_v35 = vcombine.low %v1147_v23, %v1163_v24  ;;  %v4250_v36 = vcombine.low %v1148_v25, %v1164_v26  ;;  %v1102_v12 = vld [vmem:[%s5373_s25 + $0x198] sm:$0xff] }
  0xc5   : > { %2596 = vmatpush1.bf16.msra.mxu0 %v4184_v19  ;;  %2639 = vmatpush1.bf16.msra.mxu1 %v4186_v20  ;;  %v1195_v32 = vld [vmem:[%s5373_s25 + $0x480] sm:$0xff]  ;;  %v1196_v34 = vld [vmem:[%s5373_s25 + $0x488] sm:$0xff]  ;;  %v4191_v16 = vcombine.high %v1086_v11, %v1102_v12  ;;  %v1117_v17 = vld [vmem:[%s5373_s25 + $0x210] sm:$0xff] }
  0xc6   : > { %2597 = vmatprep.subr.bf16.mxu0 %v4217_v21  ;;  %2640 = vmatprep.subr.bf16.mxu1 %v4219_v22  ;;  %v4281_v37 = vcombine.high %v1179_v31, %v1195_v32  ;;  %v4283_v38 = vcombine.high %v1180_v33, %v1196_v34  ;;  %v1211_v39 = vld [vmem:[%s5373_s25 + $0x500] sm:$0xff]  ;;  %v1212_v41 = vld [vmem:[%s5373_s25 + $0x508] sm:$0xff]  ;;  %v4280_v43 = vcombine.low %v1179_v31, %v1195_v32  ;;  %v1133_v18 = vld [vmem:[%s5373_s25 + $0x290] sm:$0xff] }
  0xc7   : > { %v1227_v40 = vld [vmem:[%s5373_s25 + $0x580] sm:$0xff]  ;;  %v1228_v42 = vld [vmem:[%s5373_s25 + $0x588] sm:$0xff]  ;;  %v4282_v44 = vcombine.low %v1180_v33, %v1196_v34  ;;  %v1118_v19 = vld [vmem:[%s5373_s25 + $0x218] sm:$0xff]  ;;  %v4188_v21 = vcombine.low %v1085_v8, %v1101_v9  ;;  %v4190_v22 = vcombine.low %v1086_v11, %v1102_v12  ;;  %v4221_v23 = vcombine.high %v1117_v17, %v1133_v18 }
  0xc8   : > { %v4313_v45 = vcombine.high %v1211_v39, %v1227_v40  ;;  %v4315_v46 = vcombine.high %v1212_v41, %v1228_v42  ;;  %v1243_v47 = vld [vmem:[%s5373_s25 + $0x600] sm:$0xff]  ;;  %v1244_v49 = vld [vmem:[%s5373_s25 + $0x608] sm:$0xff]  ;;  %v4312_v51 = vcombine.low %v1211_v39, %v1227_v40  ;;  %v4314_v52 = vcombine.low %v1212_v41, %v1228_v42  ;;  %v1134_v20 = vld [vmem:[%s5373_s25 + $0x298] sm:$0xff] }
  0xc9   : > { %2598 = vmatpush1.bf16.msra.mxu0 %v4216_v27  ;;  %2641 = vmatpush1.bf16.msra.mxu1 %v4218_v28  ;;  %v1259_v48 = vld [vmem:[%s5373_s25 + $0x680] sm:$0xff]  ;;  %v1260_v50 = vld [vmem:[%s5373_s25 + $0x688] sm:$0xff]  ;;  %v4223_v24 = vcombine.high %v1118_v19, %v1134_v20  ;;  %v1149_v25 = vld [vmem:[%s5373_s25 + $0x310] sm:$0xff] }
  0xca   : > { %2599 = vmatprep.subr.bf16.mxu0 %v4249_v29  ;;  %2642 = vmatprep.subr.bf16.mxu1 %v4251_v30  ;;  %v4345_v53 = vcombine.high %v1243_v47, %v1259_v48  ;;  %v4347_v54 = vcombine.high %v1244_v49, %v1260_v50  ;;  %v1275_v55 = vld [vmem:[%s5373_s25 + $0x700] sm:$0xff]  ;;  %v1276_v57 = vld [vmem:[%s5373_s25 + $0x708] sm:$0xff]  ;;  %v4344_v59 = vcombine.low %v1243_v47, %v1259_v48  ;;  %v1165_v26 = vld [vmem:[%s5373_s25 + $0x390] sm:$0xff] }
  0xcb   : > { %v1291_v56 = vld [vmem:[%s5373_s25 + $0x780] sm:$0xff]  ;;  %v1292_v58 = vld [vmem:[%s5373_s25 + $0x788] sm:$0xff]  ;;  %v4346_v60 = vcombine.low %v1244_v49, %v1260_v50  ;;  %v1150_v27 = vld [vmem:[%s5373_s25 + $0x318] sm:$0xff]  ;;  %v4220_v29 = vcombine.low %v1117_v17, %v1133_v18  ;;  %v4222_v30 = vcombine.low %v1118_v19, %v1134_v20  ;;  %v4253_v31 = vcombine.high %v1149_v25, %v1165_v26 }
  0xcc   : > { %v4377_v61 = vcombine.high %v1275_v55, %v1291_v56  ;;  %v4379_v62 = vcombine.high %v1276_v57, %v1292_v58  ;;  %v4376_v4 = vcombine.low %v1275_v55, %v1291_v56  ;;  %v4378_v5 = vcombine.low %v1276_v57, %v1292_v58  ;;  %v5416_v10 = vld [vmem:[%s5890_s0] sm:$0xff]   ;;  %v1166_v28 = vld [vmem:[%s5373_s25 + $0x398] sm:$0xff]  ;;  %v1181_v33 = vld [vmem:[%s5373_s25 + $0x410] sm:$0xff] }
  0xcd   : > { %2600 = vmatpush1.bf16.msra.mxu0 %v4248_v35  ;;  %2643 = vmatpush1.bf16.msra.mxu1 %v4250_v36  ;;  %v4255_v32 = vcombine.high %v1150_v27, %v1166_v28  ;;  %v1197_v34 = vld [vmem:[%s5373_s25 + $0x490] sm:$0xff]  ;;  %v1182_v35 = vld [vmem:[%s5373_s25 + $0x418] sm:$0xff]  ;;  %v1055_v2 = vld [vmem:[%s5373_s25 + $0x20] sm:$0xff] }
  0xce   : > { %2601 = vmatprep.subr.bf16.mxu0 %v4281_v37  ;;  %2644 = vmatprep.subr.bf16.mxu1 %v4283_v38  ;;  %v1198_v36 = vld [vmem:[%s5373_s25 + $0x498] sm:$0xff]  ;;  %v4252_v37 = vcombine.low %v1149_v25, %v1165_v26  ;;  %v4254_v38 = vcombine.low %v1150_v27, %v1166_v28  ;;  %v4285_v39 = vcombine.high %v1181_v33, %v1197_v34  ;;  %v1213_v41 = vld [vmem:[%s5373_s25 + $0x510] sm:$0xff]  ;;  %v1071_v3 = vld [vmem:[%s5373_s25 + $0xa0] sm:$0xff] }
  0xcf   : > { %v4287_v40 = vcombine.high %v1182_v35, %v1198_v36  ;;  %v1229_v42 = vld [vmem:[%s5373_s25 + $0x590] sm:$0xff]  ;;  %v4161_v8 = vcombine.high %v1055_v2, %v1071_v3  ;;  %v1087_v11 = vld [vmem:[%s5373_s25 + $0x120] sm:$0xff] }
  0xd0   : > { %v4317_v47 = vcombine.high %v1213_v41, %v1229_v42  ;;  %v1245_v49 = vld [vmem:[%s5373_s25 + $0x610] sm:$0xff]  ;;  %v1103_v12 = vld [vmem:[%s5373_s25 + $0x1a0] sm:$0xff] }
  0xd1   : > { %2602 = vmatpush1.bf16.msra.mxu0 %v4280_v43  ;;  %2645 = vmatpush1.bf16.msra.mxu1 %v4282_v44  ;;  %v1214_v43 = vld [vmem:[%s5373_s25 + $0x518] sm:$0xff]  ;;  %v1261_v50 = vld [vmem:[%s5373_s25 + $0x690] sm:$0xff]  ;;  %v4193_v17 = vcombine.high %v1087_v11, %v1103_v12  ;;  %v1119_v19 = vld [vmem:[%s5373_s25 + $0x220] sm:$0xff] }
  0xd2   : > { %2603 = vmatprep.subr.bf16.mxu0 %v4313_v45  ;;  %2646 = vmatprep.subr.bf16.mxu1 %v4315_v46  ;;  %v1230_v44 = vld [vmem:[%s5373_s25 + $0x598] sm:$0xff]  ;;  %v4284_v45 = vcombine.low %v1181_v33, %v1197_v34  ;;  %v4286_v46 = vcombine.low %v1182_v35, %v1198_v36  ;;  %v4349_v55 = vcombine.high %v1245_v49, %v1261_v50  ;;  %v1277_v57 = vld [vmem:[%s5373_s25 + $0x710] sm:$0xff]  ;;  %v1135_v20 = vld [vmem:[%s5373_s25 + $0x2a0] sm:$0xff] }
  0xd3   : > { %v4319_v48 = vcombine.high %v1214_v43, %v1230_v44  ;;  %v1293_v58 = vld [vmem:[%s5373_s25 + $0x790] sm:$0xff]  ;;  %v4225_v25 = vcombine.high %v1119_v19, %v1135_v20  ;;  %v1151_v27 = vld [vmem:[%s5373_s25 + $0x320] sm:$0xff] }
  0xd4   : > { %v4381_v63 = vcombine.high %v1277_v57, %v1293_v58  ;;  %v1167_v28 = vld [vmem:[%s5373_s25 + $0x3a0] sm:$0xff] }
  0xd5   : > { %2604 = vmatpush1.bf16.msra.mxu0 %v4312_v51  ;;  %2647 = vmatpush1.bf16.msra.mxu1 %v4314_v52  ;;  %v1246_v51 = vld [vmem:[%s5373_s25 + $0x618] sm:$0xff]  ;;  %v4257_v33 = vcombine.high %v1151_v27, %v1167_v28  ;;  %v1183_v35 = vld [vmem:[%s5373_s25 + $0x420] sm:$0xff] }
  0xd6   : > { %2605 = vmatprep.subr.bf16.mxu0 %v4345_v53  ;;  %2648 = vmatprep.subr.bf16.mxu1 %v4347_v54  ;;  %v1262_v52 = vld [vmem:[%s5373_s25 + $0x698] sm:$0xff]  ;;  %v4316_v53 = vcombine.low %v1213_v41, %v1229_v42  ;;  %v4318_v54 = vcombine.low %v1214_v43, %v1230_v44  ;;  %v1199_v36 = vld [vmem:[%s5373_s25 + $0x4a0] sm:$0xff] }
  0xd7   : > { %v4351_v56 = vcombine.high %v1246_v51, %v1262_v52  ;;  %v4289_v41 = vcombine.high %v1183_v35, %v1199_v36  ;;  %v1215_v43 = vld [vmem:[%s5373_s25 + $0x520] sm:$0xff] }
  0xd8   : > { %v1231_v44 = vld [vmem:[%s5373_s25 + $0x5a0] sm:$0xff] }
  0xd9   : > { %2606 = vmatpush1.bf16.msra.mxu0 %v4344_v59  ;;  %2649 = vmatpush1.bf16.msra.mxu1 %v4346_v60  ;;  %v1278_v59 = vld [vmem:[%s5373_s25 + $0x718] sm:$0xff] }
  0xda   : > { %2607 = vmatprep.subr.bf16.mxu0 %v4377_v61  ;;  %2650 = vmatprep.subr.bf16.mxu1 %v4379_v62  ;;  %v1294_v60 = vld [vmem:[%s5373_s25 + $0x798] sm:$0xff]  ;;  %v4348_v61 = vcombine.low %v1245_v49, %v1261_v50  ;;  %v4350_v62 = vcombine.low %v1246_v51, %v1262_v52  ;;  %v4321_v49 = vcombine.high %v1215_v43, %v1231_v44  ;;  %v1247_v51 = vld [vmem:[%s5373_s25 + $0x620] sm:$0xff] }
  0xdb   : > { %v4383_v1 = vcombine.high %v1278_v59, %v1294_v60  ;;  %v1263_v52 = vld [vmem:[%s5373_s25 + $0x6a0] sm:$0xff] }
  0xdd   : > { %2608 = vmatpush1.bf16.msra.mxu0 %v4376_v4  ;;  %2651 = vmatpush1.bf16.msra.mxu1 %v4378_v5  ;;  %v1056_v4 = vld [vmem:[%s5373_s25 + $0x28] sm:$0xff] }
  0xde   : > { %2679 = vmatprep.subr.bf16.mxu0 %v4157_v6  ;;  %2722 = vmatprep.subr.bf16.mxu1 %v4159_v7  ;;  %v1072_v5 = vld [vmem:[%s5373_s25 + $0xa8] sm:$0xff]  ;;  %v4380_v6 = vcombine.low %v1277_v57, %v1293_v58  ;;  %v4382_v7 = vcombine.low %v1278_v59, %v1294_v60  ;;  %v4353_v57 = vcombine.high %v1247_v51, %v1263_v52  ;;  %v1279_v59 = vld [vmem:[%s5373_s25 + $0x720] sm:$0xff] }
  0xdf   : > { %v4163_v9 = vcombine.high %v1056_v4, %v1072_v5  ;;  %v1295_v60 = vld [vmem:[%s5373_s25 + $0x7a0] sm:$0xff] }
  0xe0   : > { %2626 = vmatmul.mubr.bf16.vlgmr.msra.gmra.mrb[0].mxu0 %v5416_v10  ;;  %2669 = vmatmul.mubr.bf16.vlgmr.msra.gmra.mrb[0].mxu1 %v5416_v10 }
  0xe1   : > { %2680 = vmatpush1.bf16.msra.mxu0 %v4156_v13  ;;  %2723 = vmatpush1.bf16.msra.mxu1 %v4158_v14  ;;  %v1088_v13 = vld [vmem:[%s5373_s25 + $0x128] sm:$0xff] }
  0xe2   : > { %2681 = vmatprep.subr.bf16.mxu0 %v4189_v15  ;;  %2724 = vmatprep.subr.bf16.mxu1 %v4191_v16  ;;  %v1104_v14 = vld [vmem:[%s5373_s25 + $0x1a8] sm:$0xff]  ;;  %v4160_v15 = vcombine.low %v1055_v2, %v1071_v3  ;;  %v4162_v16 = vcombine.low %v1056_v4, %v1072_v5  ;;  %v4385_v2 = vcombine.high %v1279_v59, %v1295_v60  ;;  %v1057_v4 = vld [vmem:[%s5373_s25 + $0x30] sm:$0xff] }
  0xe3   : > { %2711 = vmatprep.mubr.bf16.mxu0 %v4628_v0  ;;  %2754 = vmatprep.mubr.bf16.mxu1 %v4628_v0  ;;  %v4195_v18 = vcombine.high %v1088_v13, %v1104_v14  ;;  %v1073_v5 = vld [vmem:[%s5373_s25 + $0xb0] sm:$0xff] }
  0xe5   : > { %2682 = vmatpush1.bf16.msra.mxu0 %v4188_v21  ;;  %2725 = vmatpush1.bf16.msra.mxu1 %v4190_v22  ;;  %v1120_v21 = vld [vmem:[%s5373_s25 + $0x228] sm:$0xff] }
  0xe6   : > { %2683 = vmatprep.subr.bf16.mxu0 %v4221_v23  ;;  %2726 = vmatprep.subr.bf16.mxu1 %v4223_v24  ;;  %v1136_v22 = vld [vmem:[%s5373_s25 + $0x2a8] sm:$0xff]  ;;  %v4192_v23 = vcombine.low %v1087_v11, %v1103_v12  ;;  %v4194_v24 = vcombine.low %v1088_v13, %v1104_v14  ;;  %v4165_v11 = vcombine.high %v1057_v4, %v1073_v5  ;;  %v1089_v13 = vld [vmem:[%s5373_s25 + $0x130] sm:$0xff] }
  0xe7   : > { %v4227_v26 = vcombine.high %v1120_v21, %v1136_v22  ;;  %v1105_v14 = vld [vmem:[%s5373_s25 + $0x1b0] sm:$0xff] }
  0xe9   : > { %2684 = vmatpush1.bf16.msra.mxu0 %v4220_v29  ;;  %2727 = vmatpush1.bf16.msra.mxu1 %v4222_v30  ;;  %v1152_v29 = vld [vmem:[%s5373_s25 + $0x328] sm:$0xff] }
  0xea   : > { %2685 = vmatprep.subr.bf16.mxu0 %v4253_v31  ;;  %2728 = vmatprep.subr.bf16.mxu1 %v4255_v32  ;;  %v1168_v30 = vld [vmem:[%s5373_s25 + $0x3a8] sm:$0xff]  ;;  %v4224_v31 = vcombine.low %v1119_v19, %v1135_v20  ;;  %v4226_v32 = vcombine.low %v1120_v21, %v1136_v22  ;;  %v4197_v19 = vcombine.high %v1089_v13, %v1105_v14  ;;  %v1121_v21 = vld [vmem:[%s5373_s25 + $0x230] sm:$0xff] }
  0xeb   : > { %v4259_v34 = vcombine.high %v1152_v29, %v1168_v30  ;;  %v1137_v22 = vld [vmem:[%s5373_s25 + $0x2b0] sm:$0xff] }
  0xed   : > { %2686 = vmatpush1.bf16.msra.mxu0 %v4252_v37  ;;  %2729 = vmatpush1.bf16.msra.mxu1 %v4254_v38  ;;  %v1184_v37 = vld [vmem:[%s5373_s25 + $0x428] sm:$0xff] }
  0xee   : > { %2687 = vmatprep.subr.bf16.mxu0 %v4285_v39  ;;  %2730 = vmatprep.subr.bf16.mxu1 %v4287_v40  ;;  %v1200_v38 = vld [vmem:[%s5373_s25 + $0x4a8] sm:$0xff]  ;;  %v4256_v39 = vcombine.low %v1151_v27, %v1167_v28  ;;  %v4258_v40 = vcombine.low %v1152_v29, %v1168_v30  ;;  %v4229_v27 = vcombine.high %v1121_v21, %v1137_v22  ;;  %v1153_v29 = vld [vmem:[%s5373_s25 + $0x330] sm:$0xff] }
  0xef   : > { %v4291_v42 = vcombine.high %v1184_v37, %v1200_v38  ;;  %v1169_v30 = vld [vmem:[%s5373_s25 + $0x3b0] sm:$0xff] }
  0xf1   : > { %2688 = vmatpush1.bf16.msra.mxu0 %v4284_v45  ;;  %2731 = vmatpush1.bf16.msra.mxu1 %v4286_v46  ;;  %v1216_v45 = vld [vmem:[%s5373_s25 + $0x528] sm:$0xff] }
  0xf2   : > { %2689 = vmatprep.subr.bf16.mxu0 %v4317_v47  ;;  %2732 = vmatprep.subr.bf16.mxu1 %v4319_v48  ;;  %v1232_v46 = vld [vmem:[%s5373_s25 + $0x5a8] sm:$0xff]  ;;  %v4288_v47 = vcombine.low %v1183_v35, %v1199_v36  ;;  %v4290_v48 = vcombine.low %v1184_v37, %v1200_v38  ;;  %v4261_v35 = vcombine.high %v1153_v29, %v1169_v30  ;;  %v1185_v37 = vld [vmem:[%s5373_s25 + $0x430] sm:$0xff] }
  0xf3   : > { %v4323_v50 = vcombine.high %v1216_v45, %v1232_v46  ;;  %v1201_v38 = vld [vmem:[%s5373_s25 + $0x4b0] sm:$0xff] }
  0xf5   : > { %2690 = vmatpush1.bf16.msra.mxu0 %v4316_v53  ;;  %2733 = vmatpush1.bf16.msra.mxu1 %v4318_v54  ;;  %v1248_v53 = vld [vmem:[%s5373_s25 + $0x628] sm:$0xff] }
  0xf6   : > { %2691 = vmatprep.subr.bf16.mxu0 %v4349_v55  ;;  %2734 = vmatprep.subr.bf16.mxu1 %v4351_v56  ;;  %v1264_v54 = vld [vmem:[%s5373_s25 + $0x6a8] sm:$0xff]  ;;  %v4320_v55 = vcombine.low %v1215_v43, %v1231_v44  ;;  %v4322_v56 = vcombine.low %v1216_v45, %v1232_v46  ;;  %v4293_v43 = vcombine.high %v1185_v37, %v1201_v38  ;;  %v1217_v45 = vld [vmem:[%s5373_s25 + $0x530] sm:$0xff] }
  0xf7   : > { %v4355_v58 = vcombine.high %v1248_v53, %v1264_v54  ;;  %v1233_v46 = vld [vmem:[%s5373_s25 + $0x5b0] sm:$0xff] }
  0xf9   : > { %2692 = vmatpush1.bf16.msra.mxu0 %v4348_v61  ;;  %2735 = vmatpush1.bf16.msra.mxu1 %v4350_v62  ;;  %v1280_v61 = vld [vmem:[%s5373_s25 + $0x728] sm:$0xff] }
  0xfa   : > { %2693 = vmatprep.subr.bf16.mxu0 %v4381_v63  ;;  %2736 = vmatprep.subr.bf16.mxu1 %v4383_v1  ;;  %v1296_v62 = vld [vmem:[%s5373_s25 + $0x7a8] sm:$0xff]  ;;  %v4352_v63 = vcombine.low %v1247_v51, %v1263_v52  ;;  %v4354_v1 = vcombine.low %v1248_v53, %v1264_v54  ;;  %v4325_v51 = vcombine.high %v1217_v45, %v1233_v46  ;;  %v1249_v53 = vld [vmem:[%s5373_s25 + $0x630] sm:$0xff] }
  0xfb   : > { %v4387_v3 = vcombine.high %v1280_v61, %v1296_v62  ;;  %v1265_v54 = vld [vmem:[%s5373_s25 + $0x6b0] sm:$0xff] }
  0xfd   : > { %2694 = vmatpush1.bf16.msra.mxu0 %v4380_v6  ;;  %2737 = vmatpush1.bf16.msra.mxu1 %v4382_v7  ;;  %v1058_v6 = vld [vmem:[%s5373_s25 + $0x38] sm:$0xff] }
  0xfe   : > { %2765 = vmatprep.subr.bf16.mxu0 %v4161_v8  ;;  %2808 = vmatprep.subr.bf16.mxu1 %v4163_v9  ;;  %v1074_v7 = vld [vmem:[%s5373_s25 + $0xb8] sm:$0xff]  ;;  %v4384_v8 = vcombine.low %v1279_v59, %v1295_v60  ;;  %v4386_v9 = vcombine.low %v1280_v61, %v1296_v62  ;;  %v4357_v59 = vcombine.high %v1249_v53, %v1265_v54  ;;  %v1281_v61 = vld [vmem:[%s5373_s25 + $0x730] sm:$0xff] }
  0xff   : > { %v4167_v12 = vcombine.high %v1058_v6, %v1074_v7  ;;  %v1297_v62 = vld [vmem:[%s5373_s25 + $0x7b0] sm:$0xff] }
 0x100   : > { %2712 = vmatmul.mubr.bf16.vlgmr.msra.gmra.mrb[4].mxu0 %v5416_v10  ;;  %2755 = vmatmul.mubr.bf16.vlgmr.msra.gmra.mrb[4].mxu1 %v5416_v10 }
 0x101   : > { %2766 = vmatpush1.bf16.msra.mxu0 %v4160_v15  ;;  %2809 = vmatpush1.bf16.msra.mxu1 %v4162_v16  ;;  %v1090_v15 = vld [vmem:[%s5373_s25 + $0x138] sm:$0xff] }
 0x102   : > { %2767 = vmatprep.subr.bf16.mxu0 %v4193_v17  ;;  %2810 = vmatprep.subr.bf16.mxu1 %v4195_v18  ;;  %v1106_v16 = vld [vmem:[%s5373_s25 + $0x1b8] sm:$0xff]  ;;  %v4164_v17 = vcombine.low %v1057_v4, %v1073_v5  ;;  %v4166_v18 = vcombine.low %v1058_v6, %v1074_v7  ;;  %v4389_v4 = vcombine.high %v1281_v61, %v1297_v62  ;;  %v1059_v6 = vld [vmem:[%s5373_s25 + $0x40] sm:$0xff] }
 0x103   : > { %2797 = vmatprep.mubr.bf16.mxu0 %v4628_v0  ;;  %2840 = vmatprep.mubr.bf16.mxu1 %v4628_v0  ;;  %v4199_v20 = vcombine.high %v1090_v15, %v1106_v16  ;;  %v1075_v7 = vld [vmem:[%s5373_s25 + $0xc0] sm:$0xff] }
 0x105   : > { %2768 = vmatpush1.bf16.msra.mxu0 %v4192_v23  ;;  %2811 = vmatpush1.bf16.msra.mxu1 %v4194_v24  ;;  %v1122_v23 = vld [vmem:[%s5373_s25 + $0x238] sm:$0xff] }
 0x106   : > { %2769 = vmatprep.subr.bf16.mxu0 %v4225_v25  ;;  %2812 = vmatprep.subr.bf16.mxu1 %v4227_v26  ;;  %v1138_v24 = vld [vmem:[%s5373_s25 + $0x2b8] sm:$0xff]  ;;  %v4196_v25 = vcombine.low %v1089_v13, %v1105_v14  ;;  %v4198_v26 = vcombine.low %v1090_v15, %v1106_v16  ;;  %v4169_v13 = vcombine.high %v1059_v6, %v1075_v7  ;;  %v1091_v15 = vld [vmem:[%s5373_s25 + $0x140] sm:$0xff] }
 0x107   : > { %v4231_v28 = vcombine.high %v1122_v23, %v1138_v24  ;;  %v1107_v16 = vld [vmem:[%s5373_s25 + $0x1c0] sm:$0xff] }
 0x109   : > { %2770 = vmatpush1.bf16.msra.mxu0 %v4224_v31  ;;  %2813 = vmatpush1.bf16.msra.mxu1 %v4226_v32  ;;  %v1154_v31 = vld [vmem:[%s5373_s25 + $0x338] sm:$0xff] }
 0x10a   : > { %2771 = vmatprep.subr.bf16.mxu0 %v4257_v33  ;;  %2814 = vmatprep.subr.bf16.mxu1 %v4259_v34  ;;  %v1170_v32 = vld [vmem:[%s5373_s25 + $0x3b8] sm:$0xff]  ;;  %v4228_v33 = vcombine.low %v1121_v21, %v1137_v22  ;;  %v4230_v34 = vcombine.low %v1122_v23, %v1138_v24  ;;  %v4201_v21 = vcombine.high %v1091_v15, %v1107_v16  ;;  %v1123_v23 = vld [vmem:[%s5373_s25 + $0x240] sm:$0xff] }
 0x10b   : > { %v4263_v36 = vcombine.high %v1154_v31, %v1170_v32  ;;  %v1139_v24 = vld [vmem:[%s5373_s25 + $0x2c0] sm:$0xff] }
 0x10d   : > { %2772 = vmatpush1.bf16.msra.mxu0 %v4256_v39  ;;  %2815 = vmatpush1.bf16.msra.mxu1 %v4258_v40  ;;  %v1186_v39 = vld [vmem:[%s5373_s25 + $0x438] sm:$0xff] }
 0x10e   : > { %2773 = vmatprep.subr.bf16.mxu0 %v4289_v41  ;;  %2816 = vmatprep.subr.bf16.mxu1 %v4291_v42  ;;  %v1202_v40 = vld [vmem:[%s5373_s25 + $0x4b8] sm:$0xff]  ;;  %v4260_v41 = vcombine.low %v1153_v29, %v1169_v30  ;;  %v4262_v42 = vcombine.low %v1154_v31, %v1170_v32  ;;  %v4233_v29 = vcombine.high %v1123_v23, %v1139_v24  ;;  %v1155_v31 = vld [vmem:[%s5373_s25 + $0x340] sm:$0xff] }
 0x10f   : > { %v4295_v44 = vcombine.high %v1186_v39, %v1202_v40  ;;  %v1171_v32 = vld [vmem:[%s5373_s25 + $0x3c0] sm:$0xff] }
 0x111   : > { %2774 = vmatpush1.bf16.msra.mxu0 %v4288_v47  ;;  %2817 = vmatpush1.bf16.msra.mxu1 %v4290_v48  ;;  %v1218_v47 = vld [vmem:[%s5373_s25 + $0x538] sm:$0xff] }
 0x112   : > { %2775 = vmatprep.subr.bf16.mxu0 %v4321_v49  ;;  %2818 = vmatprep.subr.bf16.mxu1 %v4323_v50  ;;  %v1234_v48 = vld [vmem:[%s5373_s25 + $0x5b8] sm:$0xff]  ;;  %v4292_v49 = vcombine.low %v1185_v37, %v1201_v38  ;;  %v4294_v50 = vcombine.low %v1186_v39, %v1202_v40  ;;  %v4265_v37 = vcombine.high %v1155_v31, %v1171_v32  ;;  %v1187_v39 = vld [vmem:[%s5373_s25 + $0x440] sm:$0xff] }
 0x113   : > { %v4327_v52 = vcombine.high %v1218_v47, %v1234_v48  ;;  %v1203_v40 = vld [vmem:[%s5373_s25 + $0x4c0] sm:$0xff] }
 0x115   : > { %2776 = vmatpush1.bf16.msra.mxu0 %v4320_v55  ;;  %2819 = vmatpush1.bf16.msra.mxu1 %v4322_v56  ;;  %v1250_v55 = vld [vmem:[%s5373_s25 + $0x638] sm:$0xff] }
 0x116   : > { %2777 = vmatprep.subr.bf16.mxu0 %v4353_v57  ;;  %2820 = vmatprep.subr.bf16.mxu1 %v4355_v58  ;;  %v1266_v56 = vld [vmem:[%s5373_s25 + $0x6b8] sm:$0xff]  ;;  %v4324_v57 = vcombine.low %v1217_v45, %v1233_v46  ;;  %v4326_v58 = vcombine.low %v1218_v47, %v1234_v48  ;;  %v4297_v45 = vcombine.high %v1187_v39, %v1203_v40  ;;  %v1219_v47 = vld [vmem:[%s5373_s25 + $0x540] sm:$0xff] }
 0x117   : > { %v4359_v60 = vcombine.high %v1250_v55, %v1266_v56  ;;  %v1235_v48 = vld [vmem:[%s5373_s25 + $0x5c0] sm:$0xff] }
 0x119   : > { %2778 = vmatpush1.bf16.msra.mxu0 %v4352_v63  ;;  %2821 = vmatpush1.bf16.msra.mxu1 %v4354_v1  ;;  %v1282_v63 = vld [vmem:[%s5373_s25 + $0x738] sm:$0xff] }
 0x11a   : > { %2779 = vmatprep.subr.bf16.mxu0 %v4385_v2  ;;  %2822 = vmatprep.subr.bf16.mxu1 %v4387_v3  ;;  %v1298_v1 = vld [vmem:[%s5373_s25 + $0x7b8] sm:$0xff]  ;;  %v4356_v2 = vcombine.low %v1249_v53, %v1265_v54  ;;  %v4358_v3 = vcombine.low %v1250_v55, %v1266_v56  ;;  %v4329_v53 = vcombine.high %v1219_v47, %v1235_v48  ;;  %v1251_v55 = vld [vmem:[%s5373_s25 + $0x640] sm:$0xff] }
 0x11b   : > { %v4391_v5 = vcombine.high %v1282_v63, %v1298_v1  ;;  %v1267_v56 = vld [vmem:[%s5373_s25 + $0x6c0] sm:$0xff] }
 0x11d   : > { %2780 = vmatpush1.bf16.msra.mxu0 %v4384_v8  ;;  %2823 = vmatpush1.bf16.msra.mxu1 %v4386_v9  ;;  %v1060_v8 = vld [vmem:[%s5373_s25 + $0x48] sm:$0xff] }
 0x11e   : > { %2851 = vmatprep.subr.bf16.mxu0 %v4165_v11  ;;  %2894 = vmatprep.subr.bf16.mxu1 %v4167_v12  ;;  %v1076_v9 = vld [vmem:[%s5373_s25 + $0xc8] sm:$0xff]  ;;  %v4388_v11 = vcombine.low %v1281_v61, %v1297_v62  ;;  %v4390_v12 = vcombine.low %v1282_v63, %v1298_v1  ;;  %v4361_v61 = vcombine.high %v1251_v55, %v1267_v56  ;;  %v1283_v63 = vld [vmem:[%s5373_s25 + $0x740] sm:$0xff] }
 0x11f   : > { %v4171_v14 = vcombine.high %v1060_v8, %v1076_v9  ;;  %v1299_v1 = vld [vmem:[%s5373_s25 + $0x7c0] sm:$0xff] }
 0x120   : > { %2798 = vmatmul.mubr.bf16.vlgmr.msra.gmra.mrb[8].mxu0 %v5416_v10  ;;  %2841 = vmatmul.mubr.bf16.vlgmr.msra.gmra.mrb[8].mxu1 %v5416_v10 }
 0x121   : > { %2852 = vmatpush1.bf16.msra.mxu0 %v4164_v17  ;;  %2895 = vmatpush1.bf16.msra.mxu1 %v4166_v18  ;;  %v1092_v17 = vld [vmem:[%s5373_s25 + $0x148] sm:$0xff] }
 0x122   : > { %2853 = vmatprep.subr.bf16.mxu0 %v4197_v19  ;;  %2896 = vmatprep.subr.bf16.mxu1 %v4199_v20  ;;  %v1108_v18 = vld [vmem:[%s5373_s25 + $0x1c8] sm:$0xff]  ;;  %v4168_v19 = vcombine.low %v1059_v6, %v1075_v7  ;;  %v4170_v20 = vcombine.low %v1060_v8, %v1076_v9  ;;  %v4393_v6 = vcombine.high %v1283_v63, %v1299_v1  ;;  %v1061_v8 = vld [vmem:[%s5373_s25 + $0x50] sm:$0xff] }
 0x123   : > { %2883 = vmatprep.mubr.bf16.mxu0 %v4628_v0  ;;  %2926 = vmatprep.mubr.bf16.mxu1 %v4628_v0  ;;  %v4203_v22 = vcombine.high %v1092_v17, %v1108_v18  ;;  %v1077_v9 = vld [vmem:[%s5373_s25 + $0xd0] sm:$0xff] }
 0x125   : > { %2854 = vmatpush1.bf16.msra.mxu0 %v4196_v25  ;;  %2897 = vmatpush1.bf16.msra.mxu1 %v4198_v26  ;;  %v1124_v25 = vld [vmem:[%s5373_s25 + $0x248] sm:$0xff] }
 0x126   : > { %2855 = vmatprep.subr.bf16.mxu0 %v4229_v27  ;;  %2898 = vmatprep.subr.bf16.mxu1 %v4231_v28  ;;  %v1140_v26 = vld [vmem:[%s5373_s25 + $0x2c8] sm:$0xff]  ;;  %v4200_v27 = vcombine.low %v1091_v15, %v1107_v16  ;;  %v4202_v28 = vcombine.low %v1092_v17, %v1108_v18  ;;  %v4173_v15 = vcombine.high %v1061_v8, %v1077_v9  ;;  %v1093_v17 = vld [vmem:[%s5373_s25 + $0x150] sm:$0xff] }
 0x127   : > { %v4235_v30 = vcombine.high %v1124_v25, %v1140_v26  ;;  %v1109_v18 = vld [vmem:[%s5373_s25 + $0x1d0] sm:$0xff] }
 0x129   : > { %2856 = vmatpush1.bf16.msra.mxu0 %v4228_v33  ;;  %2899 = vmatpush1.bf16.msra.mxu1 %v4230_v34  ;;  %v1156_v33 = vld [vmem:[%s5373_s25 + $0x348] sm:$0xff] }
 0x12a   : > { %2857 = vmatprep.subr.bf16.mxu0 %v4261_v35  ;;  %2900 = vmatprep.subr.bf16.mxu1 %v4263_v36  ;;  %v1172_v34 = vld [vmem:[%s5373_s25 + $0x3c8] sm:$0xff]  ;;  %v4232_v35 = vcombine.low %v1123_v23, %v1139_v24  ;;  %v4234_v36 = vcombine.low %v1124_v25, %v1140_v26  ;;  %v4205_v23 = vcombine.high %v1093_v17, %v1109_v18  ;;  %v1125_v25 = vld [vmem:[%s5373_s25 + $0x250] sm:$0xff] }
 0x12b   : > { %v4267_v38 = vcombine.high %v1156_v33, %v1172_v34  ;;  %v1141_v26 = vld [vmem:[%s5373_s25 + $0x2d0] sm:$0xff] }
 0x12d   : > { %2858 = vmatpush1.bf16.msra.mxu0 %v4260_v41  ;;  %2901 = vmatpush1.bf16.msra.mxu1 %v4262_v42  ;;  %v1188_v41 = vld [vmem:[%s5373_s25 + $0x448] sm:$0xff] }
 0x12e   : > { %2859 = vmatprep.subr.bf16.mxu0 %v4293_v43  ;;  %2902 = vmatprep.subr.bf16.mxu1 %v4295_v44  ;;  %v1204_v42 = vld [vmem:[%s5373_s25 + $0x4c8] sm:$0xff]  ;;  %v4264_v43 = vcombine.low %v1155_v31, %v1171_v32  ;;  %v4266_v44 = vcombine.low %v1156_v33, %v1172_v34  ;;  %v4237_v31 = vcombine.high %v1125_v25, %v1141_v26  ;;  %v1157_v33 = vld [vmem:[%s5373_s25 + $0x350] sm:$0xff] }
 0x12f   : > { %v4299_v46 = vcombine.high %v1188_v41, %v1204_v42  ;;  %v1173_v34 = vld [vmem:[%s5373_s25 + $0x3d0] sm:$0xff] }
 0x131   : > { %2860 = vmatpush1.bf16.msra.mxu0 %v4292_v49  ;;  %2903 = vmatpush1.bf16.msra.mxu1 %v4294_v50  ;;  %v1220_v49 = vld [vmem:[%s5373_s25 + $0x548] sm:$0xff] }
 0x132   : > { %2861 = vmatprep.subr.bf16.mxu0 %v4325_v51  ;;  %2904 = vmatprep.subr.bf16.mxu1 %v4327_v52  ;;  %v1236_v50 = vld [vmem:[%s5373_s25 + $0x5c8] sm:$0xff]  ;;  %v4296_v51 = vcombine.low %v1187_v39, %v1203_v40  ;;  %v4298_v52 = vcombine.low %v1188_v41, %v1204_v42  ;;  %v1189_v40 = vld [vmem:[%s5373_s25 + $0x450] sm:$0xff]  ;;  %v1190_v42 = vld [vmem:[%s5373_s25 + $0x458] sm:$0xff] }
 0x133   : > { %v4331_v54 = vcombine.high %v1220_v49, %v1236_v50  ;;  %v1205_v41 = vld [vmem:[%s5373_s25 + $0x4d0] sm:$0xff] }
 0x135   : > { %2862 = vmatpush1.bf16.msra.mxu0 %v4324_v57  ;;  %2905 = vmatpush1.bf16.msra.mxu1 %v4326_v58  ;;  %v1252_v57 = vld [vmem:[%s5373_s25 + $0x648] sm:$0xff] }
 0x136   : > { %2863 = vmatprep.subr.bf16.mxu0 %v4357_v59  ;;  %2906 = vmatprep.subr.bf16.mxu1 %v4359_v60  ;;  %v1268_v58 = vld [vmem:[%s5373_s25 + $0x6c8] sm:$0xff]  ;;  %v4328_v59 = vcombine.low %v1219_v47, %v1235_v48  ;;  %v4330_v60 = vcombine.low %v1220_v49, %v1236_v50  ;;  %v1221_v48 = vld [vmem:[%s5373_s25 + $0x550] sm:$0xff]  ;;  %v1222_v50 = vld [vmem:[%s5373_s25 + $0x558] sm:$0xff] }
 0x137   : > { %v4363_v62 = vcombine.high %v1252_v57, %v1268_v58  ;;  %v1237_v49 = vld [vmem:[%s5373_s25 + $0x5d0] sm:$0xff] }
 0x139   : > { %2864 = vmatpush1.bf16.msra.mxu0 %v4356_v2  ;;  %2907 = vmatpush1.bf16.msra.mxu1 %v4358_v3  ;;  %v1284_v2 = vld [vmem:[%s5373_s25 + $0x748] sm:$0xff] }
 0x13a   : > { %2865 = vmatprep.subr.bf16.mxu0 %v4389_v4  ;;  %2908 = vmatprep.subr.bf16.mxu1 %v4391_v5  ;;  %v1300_v3 = vld [vmem:[%s5373_s25 + $0x7c8] sm:$0xff]  ;;  %v4360_v4 = vcombine.low %v1251_v55, %v1267_v56  ;;  %v4362_v5 = vcombine.low %v1252_v57, %v1268_v58  ;;  %v1253_v56 = vld [vmem:[%s5373_s25 + $0x650] sm:$0xff]  ;;  %v1254_v58 = vld [vmem:[%s5373_s25 + $0x658] sm:$0xff] }
 0x13b   : > { %v4395_v7 = vcombine.high %v1284_v2, %v1300_v3  ;;  %v1269_v57 = vld [vmem:[%s5373_s25 + $0x6d0] sm:$0xff] }
 0x13d   : > { %2866 = vmatpush1.bf16.msra.mxu0 %v4388_v11  ;;  %2909 = vmatpush1.bf16.msra.mxu1 %v4390_v12  ;;  %v1062_v11 = vld [vmem:[%s5373_s25 + $0x58] sm:$0xff] }
 0x13e   : > { %2937 = vmatprep.subr.bf16.mxu0 %v4169_v13  ;;  %2980 = vmatprep.subr.bf16.mxu1 %v4171_v14  ;;  %v1078_v12 = vld [vmem:[%s5373_s25 + $0xd8] sm:$0xff]  ;;  %v4392_v13 = vcombine.low %v1283_v63, %v1299_v1  ;;  %v4394_v14 = vcombine.low %v1284_v2, %v1300_v3  ;;  %v1285_v1 = vld [vmem:[%s5373_s25 + $0x750] sm:$0xff] }
 0x13f   : > { %v4175_v16 = vcombine.high %v1062_v11, %v1078_v12  ;;  %v1301_v2 = vld [vmem:[%s5373_s25 + $0x7d0] sm:$0xff]  ;;  %v1286_v3 = vld [vmem:[%s5373_s25 + $0x758] sm:$0xff] }
 0x140   : > { %2884 = vmatmul.mubr.bf16.vlgmr.msra.gmra.mrb[12].mxu0 %v5416_v10  ;;  %2927 = vmatmul.mubr.bf16.vlgmr.msra.gmra.mrb[12].mxu1 %v5416_v10 }
 0x141   : > { %2938 = vmatpush1.bf16.msra.mxu0 %v4168_v19  ;;  %2981 = vmatpush1.bf16.msra.mxu1 %v4170_v20  ;;  %v1094_v19 = vld [vmem:[%s5373_s25 + $0x158] sm:$0xff] }
 0x142   : > { %2939 = vmatprep.subr.bf16.mxu0 %v4201_v21  ;;  %2982 = vmatprep.subr.bf16.mxu1 %v4203_v22  ;;  %v1110_v20 = vld [vmem:[%s5373_s25 + $0x1d8] sm:$0xff]  ;;  %v4172_v21 = vcombine.low %v1061_v8, %v1077_v9  ;;  %v4174_v22 = vcombine.low %v1062_v11, %v1078_v12  ;;  %v1063_v9 = vld [vmem:[%s5373_s25 + $0x60] sm:$0xff]  ;;  %v1064_v12 = vld [vmem:[%s5373_s25 + $0x68] sm:$0xff] }
 0x143   : > { %2969 = vmatprep.mubr.bf16.mxu0 %v4628_v0  ;;  %3012 = vmatprep.mubr.bf16.mxu1 %v4628_v0  ;;  %v4207_v24 = vcombine.high %v1094_v19, %v1110_v20  ;;  %v1079_v11 = vld [vmem:[%s5373_s25 + $0xe0] sm:$0xff] }
 0x145   : > { %2940 = vmatpush1.bf16.msra.mxu0 %v4200_v27  ;;  %2983 = vmatpush1.bf16.msra.mxu1 %v4202_v28  ;;  %v1126_v27 = vld [vmem:[%s5373_s25 + $0x258] sm:$0xff] }
 0x146   : > { %2941 = vmatprep.subr.bf16.mxu0 %v4233_v29  ;;  %2984 = vmatprep.subr.bf16.mxu1 %v4235_v30  ;;  %v1142_v28 = vld [vmem:[%s5373_s25 + $0x2d8] sm:$0xff]  ;;  %v4204_v29 = vcombine.low %v1093_v17, %v1109_v18  ;;  %v4206_v30 = vcombine.low %v1094_v19, %v1110_v20  ;;  %v1095_v18 = vld [vmem:[%s5373_s25 + $0x160] sm:$0xff]  ;;  %v1096_v20 = vld [vmem:[%s5373_s25 + $0x168] sm:$0xff] }
 0x147   : > { %v4239_v32 = vcombine.high %v1126_v27, %v1142_v28  ;;  %v1111_v19 = vld [vmem:[%s5373_s25 + $0x1e0] sm:$0xff] }
 0x149   : > { %2942 = vmatpush1.bf16.msra.mxu0 %v4232_v35  ;;  %2985 = vmatpush1.bf16.msra.mxu1 %v4234_v36  ;;  %v1158_v35 = vld [vmem:[%s5373_s25 + $0x358] sm:$0xff] }
 0x14a   : > { %2943 = vmatprep.subr.bf16.mxu0 %v4265_v37  ;;  %2986 = vmatprep.subr.bf16.mxu1 %v4267_v38  ;;  %v1174_v36 = vld [vmem:[%s5373_s25 + $0x3d8] sm:$0xff]  ;;  %v4238_v37 = vcombine.low %v1126_v27, %v1142_v28  ;;  %v4269_v38 = vcombine.high %v1157_v33, %v1173_v34  ;;  %v1143_v27 = vld [vmem:[%s5373_s25 + $0x2e0] sm:$0xff] }
 0x14b   : > { %v4271_v39 = vcombine.high %v1158_v35, %v1174_v36  ;;  %v5605_v28 = vld [vmem:[%s5890_s0] sm:$0xff]  }
 0x14d   : > { %2944 = vmatpush1.bf16.msra.mxu0 %v4264_v43  ;;  %2987 = vmatpush1.bf16.msra.mxu1 %v4266_v44  ;;  %v1206_v43 = vld [vmem:[%s5373_s25 + $0x4d8] sm:$0xff]  ;;  %v4268_v44 = vcombine.low %v1157_v33, %v1173_v34 }
 0x14e   : > { %2945 = vmatprep.subr.bf16.mxu0 %v4297_v45  ;;  %2988 = vmatprep.subr.bf16.mxu1 %v4299_v46  ;;  %v4270_v45 = vcombine.low %v1158_v35, %v1174_v36  ;;  %v4301_v46 = vcombine.high %v1189_v40, %v1205_v41  ;;  %v4303_v47 = vcombine.high %v1190_v42, %v1206_v43  ;;  %v1159_v35 = vld [vmem:[%s5373_s25 + $0x360] sm:$0xff] }
 0x14f   : > { %v1175_v36 = vld [vmem:[%s5373_s25 + $0x3e0] sm:$0xff] }
 0x151   : > { %2946 = vmatpush1.bf16.msra.mxu0 %v4296_v51  ;;  %2989 = vmatpush1.bf16.msra.mxu1 %v4298_v52  ;;  %v1238_v51 = vld [vmem:[%s5373_s25 + $0x5d8] sm:$0xff]  ;;  %v4300_v52 = vcombine.low %v1189_v40, %v1205_v41  ;;  %v4273_v40 = vcombine.high %v1159_v35, %v1175_v36 }
 0x152   : > { %2947 = vmatprep.subr.bf16.mxu0 %v4329_v53  ;;  %2990 = vmatprep.subr.bf16.mxu1 %v4331_v54  ;;  %v4302_v53 = vcombine.low %v1190_v42, %v1206_v43  ;;  %v4333_v54 = vcombine.high %v1221_v48, %v1237_v49  ;;  %v4335_v55 = vcombine.high %v1222_v50, %v1238_v51  ;;  %v1191_v42 = vld [vmem:[%s5373_s25 + $0x460] sm:$0xff] }
 0x153   : > { %v1207_v43 = vld [vmem:[%s5373_s25 + $0x4e0] sm:$0xff] }
 0x155   : > { %2948 = vmatpush1.bf16.msra.mxu0 %v4328_v59  ;;  %2991 = vmatpush1.bf16.msra.mxu1 %v4330_v60  ;;  %v1270_v59 = vld [vmem:[%s5373_s25 + $0x6d8] sm:$0xff]  ;;  %v4332_v60 = vcombine.low %v1221_v48, %v1237_v49  ;;  %v4305_v48 = vcombine.high %v1191_v42, %v1207_v43 }
 0x156   : > { %2949 = vmatprep.subr.bf16.mxu0 %v4361_v61  ;;  %2992 = vmatprep.subr.bf16.mxu1 %v4363_v62  ;;  %v4334_v61 = vcombine.low %v1222_v50, %v1238_v51  ;;  %v4365_v62 = vcombine.high %v1253_v56, %v1269_v57  ;;  %v4367_v63 = vcombine.high %v1254_v58, %v1270_v59  ;;  %v1223_v50 = vld [vmem:[%s5373_s25 + $0x560] sm:$0xff] }
 0x157   : > { %v1239_v51 = vld [vmem:[%s5373_s25 + $0x5e0] sm:$0xff] }
 0x159   : > { %2950 = vmatpush1.bf16.msra.mxu0 %v4360_v4  ;;  %2993 = vmatpush1.bf16.msra.mxu1 %v4362_v5  ;;  %v1302_v4 = vld [vmem:[%s5373_s25 + $0x7d8] sm:$0xff]  ;;  %v4364_v5 = vcombine.low %v1253_v56, %v1269_v57  ;;  %v4337_v56 = vcombine.high %v1223_v50, %v1239_v51 }
 0x15a   : > { %2951 = vmatprep.subr.bf16.mxu0 %v4393_v6  ;;  %2994 = vmatprep.subr.bf16.mxu1 %v4395_v7  ;;  %v4366_v6 = vcombine.low %v1254_v58, %v1270_v59  ;;  %v4397_v7 = vcombine.high %v1285_v1, %v1301_v2  ;;  %v4399_v8 = vcombine.high %v1286_v3, %v1302_v4  ;;  %v1255_v58 = vld [vmem:[%s5373_s25 + $0x660] sm:$0xff] }
 0x15b   : > { %v1271_v59 = vld [vmem:[%s5373_s25 + $0x6e0] sm:$0xff] }
 0x15d   : > { %2952 = vmatpush1.bf16.msra.mxu0 %v4392_v13  ;;  %2995 = vmatpush1.bf16.msra.mxu1 %v4394_v14  ;;  %v1080_v13 = vld [vmem:[%s5373_s25 + $0xe8] sm:$0xff]  ;;  %v4396_v14 = vcombine.low %v1285_v1, %v1301_v2  ;;  %v4369_v1 = vcombine.high %v1255_v58, %v1271_v59 }
 0x15e   : > { %3023 = vmatprep.subr.bf16.mxu0 %v4173_v15  ;;  %3066 = vmatprep.subr.bf16.mxu1 %v4175_v16  ;;  %v4398_v15 = vcombine.low %v1286_v3, %v1302_v4  ;;  %v4177_v16 = vcombine.high %v1063_v9, %v1079_v11  ;;  %v4179_v17 = vcombine.high %v1064_v12, %v1080_v13  ;;  %v1287_v3 = vld [vmem:[%s5373_s25 + $0x760] sm:$0xff] }
 0x15f   : > { %v1303_v4 = vld [vmem:[%s5373_s25 + $0x7e0] sm:$0xff] }
 0x160   : > { %2970 = vmatmul.mubr.bf16.vlgmr.msra.gmra.mrb[16].mxu0 %v5416_v10  ;;  %3013 = vmatmul.mubr.bf16.vlgmr.msra.gmra.mrb[16].mxu1 %v5416_v10  ;;  %v4236_v10 = vcombine.low %v1125_v25, %v1141_v26  ;;  %v1127_v26 = vld [vmem:[%s5373_s25 + $0x260] sm:$0xff] }
 0x161   : > { %3024 = vmatpush1.bf16.msra.mxu0 %v4172_v21  ;;  %3067 = vmatpush1.bf16.msra.mxu1 %v4174_v22  ;;  %v1112_v21 = vld [vmem:[%s5373_s25 + $0x1e8] sm:$0xff]  ;;  %v4176_v22 = vcombine.low %v1063_v9, %v1079_v11  ;;  %v4241_v33 = vcombine.high %v1127_v26, %v1143_v27  ;;  %v4401_v9 = vcombine.high %v1287_v3, %v1303_v4 }
 0x162   : > { %3025 = vmatprep.subr.bf16.mxu0 %v4205_v23  ;;  %3068 = vmatprep.subr.bf16.mxu1 %v4207_v24  ;;  %v4178_v23 = vcombine.low %v1064_v12, %v1080_v13  ;;  %v4209_v24 = vcombine.high %v1095_v18, %v1111_v19  ;;  %v4211_v25 = vcombine.high %v1096_v20, %v1112_v21  ;;  %v1065_v12 = vld [vmem:[%s5373_s25 + $0x70] sm:$0xff] }
 0x163   : > { %3055 = vmatprep.mubr.bf16.mxu0 %v4628_v0  ;;  %3098 = vmatprep.mubr.bf16.mxu1 %v4628_v0  ;;  %v1081_v13 = vld [vmem:[%s5373_s25 + $0xf0] sm:$0xff] }
 0x165   : > { %3026 = vmatpush1.bf16.msra.mxu0 %v4204_v29  ;;  %3069 = vmatpush1.bf16.msra.mxu1 %v4206_v30  ;;  %v1128_v29 = vld [vmem:[%s5373_s25 + $0x268] sm:$0xff] }
 0x166   : > { %3027 = vmatprep.subr.bf16.mxu0 %v4237_v31  ;;  %3070 = vmatprep.subr.bf16.mxu1 %v4239_v32  ;;  %v1144_v30 = vld [vmem:[%s5373_s25 + $0x2e8] sm:$0xff]  ;;  %v4208_v31 = vcombine.low %v1095_v18, %v1111_v19  ;;  %v4210_v32 = vcombine.low %v1096_v20, %v1112_v21  ;;  %v4181_v18 = vcombine.high %v1065_v12, %v1081_v13  ;;  %v1097_v20 = vld [vmem:[%s5373_s25 + $0x170] sm:$0xff] }
 0x167   : > { %v4243_v34 = vcombine.high %v1128_v29, %v1144_v30  ;;  %v1113_v21 = vld [vmem:[%s5373_s25 + $0x1f0] sm:$0xff] }
 0x169   : > { %3028 = vmatpush1.bf16.msra.mxu0 %v4236_v10  ;;  %3071 = vmatpush1.bf16.msra.mxu1 %v4238_v37  ;;  %v1160_v10 = vld [vmem:[%s5373_s25 + $0x368] sm:$0xff] }
 0x16a   : > { %3029 = vmatprep.subr.bf16.mxu0 %v4269_v38  ;;  %3072 = vmatprep.subr.bf16.mxu1 %v4271_v39  ;;  %v1176_v37 = vld [vmem:[%s5373_s25 + $0x3e8] sm:$0xff]  ;;  %v4240_v38 = vcombine.low %v1127_v26, %v1143_v27  ;;  %v4242_v39 = vcombine.low %v1128_v29, %v1144_v30  ;;  %v4213_v26 = vcombine.high %v1097_v20, %v1113_v21  ;;  %v1129_v29 = vld [vmem:[%s5373_s25 + $0x270] sm:$0xff] }
 0x16b   : > { %v4275_v41 = vcombine.high %v1160_v10, %v1176_v37  ;;  %v1145_v30 = vld [vmem:[%s5373_s25 + $0x2f0] sm:$0xff] }
 0x16d   : > { %3030 = vmatpush1.bf16.msra.mxu0 %v4268_v44  ;;  %3073 = vmatpush1.bf16.msra.mxu1 %v4270_v45  ;;  %v1192_v44 = vld [vmem:[%s5373_s25 + $0x468] sm:$0xff] }
 0x16e   : > { %3031 = vmatprep.subr.bf16.mxu0 %v4301_v46  ;;  %3074 = vmatprep.subr.bf16.mxu1 %v4303_v47  ;;  %v1208_v45 = vld [vmem:[%s5373_s25 + $0x4e8] sm:$0xff]  ;;  %v4272_v46 = vcombine.low %v1159_v35, %v1175_v36  ;;  %v4274_v47 = vcombine.low %v1160_v10, %v1176_v37  ;;  %v4245_v35 = vcombine.high %v1129_v29, %v1145_v30  ;;  %v1161_v10 = vld [vmem:[%s5373_s25 + $0x370] sm:$0xff] }
 0x16f   : > { %v4307_v49 = vcombine.high %v1192_v44, %v1208_v45  ;;  %v1177_v37 = vld [vmem:[%s5373_s25 + $0x3f0] sm:$0xff] }
 0x171   : > { %3032 = vmatpush1.bf16.msra.mxu0 %v4300_v52  ;;  %3075 = vmatpush1.bf16.msra.mxu1 %v4302_v53  ;;  %v1224_v52 = vld [vmem:[%s5373_s25 + $0x568] sm:$0xff] }
 0x172   : > { %3033 = vmatprep.subr.bf16.mxu0 %v4333_v54  ;;  %3076 = vmatprep.subr.bf16.mxu1 %v4335_v55  ;;  %v1240_v53 = vld [vmem:[%s5373_s25 + $0x5e8] sm:$0xff]  ;;  %v4304_v54 = vcombine.low %v1191_v42, %v1207_v43  ;;  %v4306_v55 = vcombine.low %v1192_v44, %v1208_v45  ;;  %v4277_v43 = vcombine.high %v1161_v10, %v1177_v37  ;;  %v1193_v45 = vld [vmem:[%s5373_s25 + $0x470] sm:$0xff] }
 0x173   : > { %v4339_v57 = vcombine.high %v1224_v52, %v1240_v53 }
 0x175   : > { %3034 = vmatpush1.bf16.msra.mxu0 %v4332_v60  ;;  %3077 = vmatpush1.bf16.msra.mxu1 %v4334_v61  ;;  %v1256_v60 = vld [vmem:[%s5373_s25 + $0x668] sm:$0xff] }
 0x176   : > { %3035 = vmatprep.subr.bf16.mxu0 %v4365_v62  ;;  %3078 = vmatprep.subr.bf16.mxu1 %v4367_v63  ;;  %v1272_v61 = vld [vmem:[%s5373_s25 + $0x6e8] sm:$0xff]  ;;  %v4336_v62 = vcombine.low %v1223_v50, %v1239_v51  ;;  %v4338_v63 = vcombine.low %v1224_v52, %v1240_v53  ;;  %v1225_v53 = vld [vmem:[%s5373_s25 + $0x570] sm:$0xff] }
 0x177   : > { %v4371_v2 = vcombine.high %v1256_v60, %v1272_v61 }
 0x179   : > { %3036 = vmatpush1.bf16.msra.mxu0 %v4364_v5  ;;  %3079 = vmatpush1.bf16.msra.mxu1 %v4366_v6  ;;  %v1288_v5 = vld [vmem:[%s5373_s25 + $0x768] sm:$0xff] }
 0x17a   : > { %3037 = vmatprep.subr.bf16.mxu0 %v4397_v7  ;;  %3080 = vmatprep.subr.bf16.mxu1 %v4399_v8  ;;  %v1304_v6 = vld [vmem:[%s5373_s25 + $0x7e8] sm:$0xff]  ;;  %v4368_v7 = vcombine.low %v1255_v58, %v1271_v59  ;;  %v4370_v8 = vcombine.low %v1256_v60, %v1272_v61  ;;  %v5679_v59 = vld [vmem:[%s5669_s10] sm:$0xff] }
 0x17b   : > { %v4403_v11 = vcombine.high %v1288_v5, %v1304_v6 }
 0x17d   : > { %3038 = vmatpush1.bf16.msra.mxu0 %v4396_v14  ;;  %3081 = vmatpush1.bf16.msra.mxu1 %v4398_v15  ;;  %v1066_v14 = vld [vmem:[%s5373_s25 + $0x78] sm:$0xff] }
 0x17e   : > { %3109 = vmatprep.subr.bf16.mxu0 %v4177_v16  ;;  %3152 = vmatprep.subr.bf16.mxu1 %v4179_v17  ;;  %v1082_v15 = vld [vmem:[%s5373_s25 + $0xf8] sm:$0xff]  ;;  %v4400_v16 = vcombine.low %v1287_v3, %v1303_v4  ;;  %v4402_v17 = vcombine.low %v1288_v5, %v1304_v6  ;;  %v1257_v3 = vld [vmem:[%s5373_s25 + $0x670] sm:$0xff] }
 0x17f   : > { %v4183_v19 = vcombine.high %v1066_v14, %v1082_v15  ;;  %v1273_v4 = vld [vmem:[%s5373_s25 + $0x6f0] sm:$0xff]  ;;  %v1258_v6 = vld [vmem:[%s5373_s25 + $0x678] sm:$0xff] }
 0x180   : > { %3056 = vmatmul.mubr.bf16.vlgmr.msra.gmra.mrb[20].mxu0 %v5605_v28  ;;  %3099 = vmatmul.mubr.bf16.vlgmr.msra.gmra.mrb[20].mxu1 %v5605_v28 }
 0x181   : > { %3110 = vmatpush1.bf16.msra.mxu0 %v4176_v22  ;;  %3153 = vmatpush1.bf16.msra.mxu1 %v4178_v23  ;;  %v1098_v22 = vld [vmem:[%s5373_s25 + $0x178] sm:$0xff] }
 0x182   : > { %3111 = vmatprep.subr.bf16.mxu0 %v4209_v24  ;;  %3154 = vmatprep.subr.bf16.mxu1 %v4211_v25  ;;  %v1114_v23 = vld [vmem:[%s5373_s25 + $0x1f8] sm:$0xff]  ;;  %v4180_v24 = vcombine.low %v1065_v12, %v1081_v13  ;;  %v4182_v25 = vcombine.low %v1066_v14, %v1082_v15  ;;  %v4373_v14 = vcombine.high %v1257_v3, %v1273_v4  ;;  %v1289_v15 = vld [vmem:[%s5373_s25 + $0x770] sm:$0xff] }
 0x183   : > { %3141 = vmatprep.mubr.bf16.mxu0 %v4628_v0  ;;  %3184 = vmatprep.mubr.bf16.mxu1 %v4628_v0  ;;  %v4215_v27 = vcombine.high %v1098_v22, %v1114_v23 }
 0x185   : > { %3112 = vmatpush1.bf16.msra.mxu0 %v4208_v31  ;;  %3155 = vmatpush1.bf16.msra.mxu1 %v4210_v32  ;;  %v1130_v31 = vld [vmem:[%s5373_s25 + $0x278] sm:$0xff] }
 0x186   : > { %3113 = vmatprep.subr.bf16.mxu0 %v4241_v33  ;;  %3156 = vmatprep.subr.bf16.mxu1 %v4243_v34  ;;  %v1146_v32 = vld [vmem:[%s5373_s25 + $0x2f8] sm:$0xff]  ;;  %v4212_v33 = vcombine.low %v1097_v20, %v1113_v21  ;;  %v4214_v34 = vcombine.low %v1098_v22, %v1114_v23 }
 0x187   : > { %v4247_v36 = vcombine.high %v1130_v31, %v1146_v32  ;;  %v4246_v42 = vcombine.low %v1130_v31, %v1146_v32  ;;  %v1306_v20 = vld [vmem:[%s5373_s25 + $0x7f8] sm:$0xff] }
 0x189   : > { %3114 = vmatpush1.bf16.msra.mxu0 %v4240_v38  ;;  %3157 = vmatpush1.bf16.msra.mxu1 %v4242_v39  ;;  %v1162_v38 = vld [vmem:[%s5373_s25 + $0x378] sm:$0xff] }
 0x18a   : > { %3115 = vmatprep.subr.bf16.mxu0 %v4273_v40  ;;  %3158 = vmatprep.subr.bf16.mxu1 %v4275_v41  ;;  %v1178_v39 = vld [vmem:[%s5373_s25 + $0x3f8] sm:$0xff]  ;;  %v3289_v40 = vlaneseq  ;;  %v4244_v41 = vcombine.low %v1129_v29, %v1145_v30 }
 0x18b   : > { %v4279_v44 = vcombine.high %v1162_v38, %v1178_v39  ;;  %v4278_v50 = vcombine.low %v1162_v38, %v1178_v39 }
 0x18d   : > { %3116 = vmatpush1.bf16.msra.mxu0 %v4272_v46  ;;  %3159 = vmatpush1.bf16.msra.mxu1 %v4274_v47  ;;  %v1209_v46 = vld [vmem:[%s5373_s25 + $0x4f0] sm:$0xff]  ;;  %v1194_v47 = vld [vmem:[%s5373_s25 + $0x478] sm:$0xff] }
 0x18e   : > { %3117 = vmatprep.subr.bf16.mxu0 %v4305_v48  ;;  %3160 = vmatprep.subr.bf16.mxu1 %v4307_v49  ;;  %v1210_v48 = vld [vmem:[%s5373_s25 + $0x4f8] sm:$0xff]  ;;  %v5664_v49 = vshrl.u32 %v3289_v40, 7  ;;  %v4309_v51 = vcombine.high %v1193_v45, %v1209_v46  ;;  %v4308_v58 = vcombine.low %v1193_v45, %v1209_v46 }
 0x18f   : > { %v4311_v52 = vcombine.high %v1194_v47, %v1210_v48 }
 0x190   : > { %v5682_v60 = vsub.s32 1, %v5664_v49  ;;  %v5685_v61 = vsub.s32 2, %v5664_v49 }
 0x191   : > { %3118 = vmatpush1.bf16.msra.mxu0 %v4304_v54  ;;  %3161 = vmatpush1.bf16.msra.mxu1 %v4306_v55  ;;  %v1241_v54 = vld [vmem:[%s5373_s25 + $0x5f0] sm:$0xff]  ;;  %v5674_v55 = vsub.s32 0, %v5664_v49 }
 0x192   : > { %3119 = vmatprep.subr.bf16.mxu0 %v4337_v56  ;;  %3162 = vmatprep.subr.bf16.mxu1 %v4339_v57  ;;  %v1226_v56 = vld [vmem:[%s5373_s25 + $0x578] sm:$0xff] }
 0x193   : > { %v1242_v57 = vld [vmem:[%s5373_s25 + $0x5f8] sm:$0xff]  ;;  %v3292_v5 = vrot.slane %v5679_v59, %v5674_v55 }
 0x194   : > { %v4342_v12 = vcombine.low %v1226_v56, %v1242_v57 }
 0x195   : > { %3120 = vmatpush1.bf16.msra.mxu0 %v4336_v62  ;;  %3163 = vmatpush1.bf16.msra.mxu1 %v4338_v63  ;;  %v4310_v62 = vcombine.low %v1194_v47, %v1210_v48  ;;  %v4341_v63 = vcombine.high %v1225_v53, %v1241_v54 }
 0x196   : > { %3121 = vmatprep.subr.bf16.mxu0 %v4369_v1  ;;  %3164 = vmatprep.subr.bf16.mxu1 %v4371_v2  ;;  %v5688_v1 = vsub.s32 3, %v5664_v49  ;;  %v4343_v2 = vcombine.high %v1226_v56, %v1242_v57  ;;  %v3718_v57 = vld [vmem:[%s5708_s12 + $0x10] sm:$0xff] }
 0x198   : > { %v3304_v13 = vrot.slane %v5679_v59, %v5688_v1 }
 0x199   : > { %3122 = vmatpush1.bf16.msra.mxu0 %v4368_v7  ;;  %3165 = vmatpush1.bf16.msra.mxu1 %v4370_v8  ;;  %v1274_v7 = vld [vmem:[%s5373_s25 + $0x6f8] sm:$0xff]  ;;  %v3296_v8 = vrot.slane %v5679_v59, %v5682_v60 }
 0x19a   : > { %3123 = vmatprep.subr.bf16.mxu0 %v4401_v9  ;;  %3166 = vmatprep.subr.bf16.mxu1 %v4403_v11  ;;  %v4340_v9 = vcombine.low %v1225_v53, %v1241_v54  ;;  %v3300_v11 = vrot.slane %v5679_v59, %v5685_v61  ;;  %v4374_v30 = vcombine.low %v1258_v6, %v1274_v7  ;;  %v3748_v53 = vld [vmem:[%s5708_s12 + $0x100] sm:$0xff] }
 0x19d   : > { %3124 = vmatpush1.bf16.msra.mxu0 %v4400_v16  ;;  %3167 = vmatpush1.bf16.msra.mxu1 %v4402_v17  ;;  %v1305_v16 = vld [vmem:[%s5373_s25 + $0x7f0] sm:$0xff] }
 0x19e   : > { %3195 = vmatprep.subr.bf16.mxu0 %v4181_v18  ;;  %3238 = vmatprep.subr.bf16.mxu1 %v4183_v19  ;;  %v4375_v18 = vcombine.high %v1258_v6, %v1274_v7  ;;  %v1290_v19 = vld [vmem:[%s5373_s25 + $0x778] sm:$0xff]  ;;  %v4405_v31 = vcombine.high %v1289_v15, %v1305_v16  ;;  %v4404_v46 = vcombine.low %v1289_v15, %v1305_v16 }
 0x19f   : > { %v4406_v48 = vcombine.low %v1290_v19, %v1306_v20 }
 0x1a0   : > { %3142 = vmatmul.mubr.bf16.vlgmr.msra.gmra.mrb[24].mxu0 %v5605_v28  ;;  %3185 = vmatmul.mubr.bf16.vlgmr.msra.gmra.mrb[24].mxu1 %v5605_v28 }
 0x1a1   : > { %3196 = vmatpush1.bf16.msra.mxu0 %v4180_v24  ;;  %3239 = vmatpush1.bf16.msra.mxu1 %v4182_v25  ;;  %v4372_v24 = vcombine.low %v1257_v3, %v1273_v4 }
 0x1a2   : > { %3197 = vmatprep.subr.bf16.mxu0 %v4213_v26  ;;  %3240 = vmatprep.subr.bf16.mxu1 %v4215_v27 }
 0x1a3   : > { %3227 = vmatprep.mubr.bf16.mxu0 %v4628_v0  ;;  %3270 = vmatprep.mubr.bf16.mxu1 %v4628_v0  ;;  %v4276_v0 = vcombine.low %v1161_v10, %v1177_v37  ;;  %v4407_v10 = vcombine.high %v1290_v19, %v1306_v20 }
 0x1a5   : > { %3198 = vmatpush1.bf16.msra.mxu0 %v4212_v33  ;;  %3241 = vmatpush1.bf16.msra.mxu1 %v4214_v34 }
 0x1a6   : > { %3199 = vmatprep.subr.bf16.mxu0 %v4245_v35  ;;  %3242 = vmatprep.subr.bf16.mxu1 %v4247_v36 }
 0x1a9   : > { %3200 = vmatpush1.bf16.msra.mxu0 %v4244_v41  ;;  %3243 = vmatpush1.bf16.msra.mxu1 %v4246_v42 }
 0x1aa   : > { %3201 = vmatprep.subr.bf16.mxu0 %v4277_v43  ;;  %3244 = vmatprep.subr.bf16.mxu1 %v4279_v44 }
 0x1ad   : > { %3202 = vmatpush1.bf16.msra.mxu0 %v4276_v0  ;;  %3245 = vmatpush1.bf16.msra.mxu1 %v4278_v50  ;;  %v3716_v50 = vld [vmem:[%s5708_s12] sm:$0xff] }
 0x1ae   : > { %3203 = vmatprep.subr.bf16.mxu0 %v4309_v51  ;;  %3246 = vmatprep.subr.bf16.mxu1 %v4311_v52  ;;  %v3717_v51 = vld [vmem:[%s5708_s12 + $0x8] sm:$0xff] }
 0x1b1   : > { %3204 = vmatpush1.bf16.msra.mxu0 %v4308_v58  ;;  %3247 = vmatpush1.bf16.msra.mxu1 %v4310_v62 }
 0x1b2   : > { %3205 = vmatprep.subr.bf16.mxu0 %v4341_v63  ;;  %3248 = vmatprep.subr.bf16.mxu1 %v4343_v2  ;;  %v3749_v2 = vld [vmem:[%s5708_s12 + $0x108] sm:$0xff] }
 0x1b3   : > { %v2627_v17 = vpop.f32.mrb[0].mxu0  ;;  %v2670_v23 = vpop.f32.mrb[0].mxu1 }
 0x1b4   : > { %v3449_v21 = vmul.f32 %v3292_v5, %v2627_v17  ;;  %v2629_v22 = vpop.f32.mrb[1].mxu0  ;;  %v3451_v27 = vmul.f32 %v3300_v11, %v2670_v23  ;;  %v2672_v29 = vpop.f32.mrb[1].mxu1 }
 0x1b5   : > { %v3450_v25 = vmul.f32 %v3296_v8, %v2629_v22  ;;  %v2631_v26 = vpop.f32.mrb[2].mxu0  ;;  %3206 = vmatpush1.bf16.msra.mxu0 %v4340_v9  ;;  %v3452_v35 = vmul.f32 %v3304_v13, %v2672_v29  ;;  %3249 = vmatpush1.bf16.msra.mxu1 %v4342_v12  ;;  %v2674_v36 = vpop.f32.mrb[2].mxu1 }
 0x1b6   : > { %v3513_v32 = vmul.f32 1.442695, %v3449_v21  ;;  %v3481_v33 = vmul.f32 %v3292_v5, %v2631_v26  ;;  %v2633_v34 = vpop.f32.mrb[3].mxu0  ;;  %3207 = vmatprep.subr.bf16.mxu0 %v4373_v14  ;;  %v3517_v38 = vmul.f32 1.442695, %v3451_v27  ;;  %v3483_v40 = vmul.f32 %v3300_v11, %v2674_v36  ;;  %v2676_v41 = vpop.f32.mrb[3].mxu1  ;;  %3250 = vmatprep.subr.bf16.mxu1 %v4375_v18 }
 0x1b7   : > { %v3515_v37 = vmul.f32 1.442695, %v3450_v25  ;;  %v3482_v39 = vmul.f32 %v3296_v8, %v2633_v34  ;;  %v3484_v43 = vmul.f32 %v3304_v13, %v2676_v41  ;;  %v3519_v45 = vmul.f32 1.442695, %v3452_v35  ;;  %v3719_v5 = vld [vmem:[%s5708_s12 + $0x18] sm:$0xff]  ;;  %v3750_v11 = vld [vmem:[%s5708_s12 + $0x110] sm:$0xff] }
 0x1b8   : > { %4459 = vpow2.f32 %v3513_v32  ;;  %v3577_v42 = vmul.f32 1.442695, %v3481_v33  ;;  %v3581_v47 = vmul.f32 1.442695, %v3483_v40  ;;  %v3751_v18 = vld [vmem:[%s5708_s12 + $0x118] sm:$0xff]  ;;  %v5721_v27 = vsub.s32 4, %v5664_v49 }
 0x1b9   : > { %4461 = vpow2.f32 %v3515_v37  ;;  %v3579_v44 = vmul.f32 1.442695, %v3482_v39  ;;  %3208 = vmatpush1.bf16.msra.mxu0 %v4372_v24  ;;  %3251 = vmatpush1.bf16.msra.mxu1 %v4374_v30  ;;  %v3583_v0 = vmul.f32 1.442695, %v3484_v43  ;;  %v5724_v30 = vsub.s32 5, %v5664_v49 }
 0x1ba   : > { %4463 = vpow2.f32 %v3577_v42  ;;  %3209 = vmatprep.subr.bf16.mxu0 %v4405_v31  ;;  %3252 = vmatprep.subr.bf16.mxu1 %v4407_v10  ;;  %v5727_v31 = vsub.s32 6, %v5664_v49  ;;  %v5730_v32 = vsub.s32 7, %v5664_v49  ;;  %v3308_v33 = vrot.slane %v5679_v59, %v5721_v27 }
 0x1bb   : > { %4465 = vpow2.f32 %v3517_v38  ;;  %v3312_v34 = vrot.slane %v5679_v59, %v5724_v30 }
 0x1bc   : > { %4467 = vpow2.f32 %v3579_v44  ;;  %v3316_v35 = vrot.slane %v5679_v59, %v5727_v31  ;;  %v3320_v36 = vrot.slane %v5679_v59, %v5730_v32 }
 0x1bd   : > { %4469 = vpow2.f32 %v3519_v45  ;;  %3210 = vmatpush1.bf16.msra.mxu0 %v4404_v46  ;;  %3253 = vmatpush1.bf16.msra.mxu1 %v4406_v48 }
 0x1be   : > { %4471 = vpow2.f32 %v3581_v47 }
 0x1bf   : > { %4473 = vpow2.f32 %v3583_v0 }
 0x1c0   : > { %3228 = vmatmul.mubr.bf16.vlgmr.msra.gmra.mrb[28].mxu0 %v5605_v28  ;;  %3271 = vmatmul.mubr.bf16.vlgmr.msra.gmra.mrb[28].mxu1 %v5605_v28 }
 0x1c2   : > { %v4460_v52 = vpop.eup %4459 }
 0x1c3   : > { %v4462_v54 = vpop.eup %4461  ;;  %v3780_v56 = vmul.f32 %v4460_v52, %v3716_v50 }
 0x1c4   : > { %v4464_v58 = vpop.eup %4463  ;;  %v3643_v62 = vadd.f32 %v4462_v54, %v4460_v52  ;;  %v3781_v63 = vmul.f32 %v4462_v54, %v3717_v51 }
 0x1c5   : > { %v4466_v3 = vpop.eup %4465  ;;  %v3812_v4 = vmul.f32 %v4464_v58, %v3748_v53 }
 0x1c6   : > { %v4468_v6 = vpop.eup %4467  ;;  %v3844_v7 = vadd.f32 %v3781_v63, %v3780_v56  ;;  %v3644_v8 = vadd.f32 %v4466_v3, %v3643_v62  ;;  %v3782_v9 = vmul.f32 %v4466_v3, %v3718_v57  ;;  %v3720_v62 = vld [vmem:[%s5708_s12 + $0x20] sm:$0xff]  ;;  %v3721_v63 = vld [vmem:[%s5708_s12 + $0x28] sm:$0xff] }
 0x1c7   : > { %v4470_v28 = vpop.eup %4469  ;;  %v3676_v12 = vadd.f32 %v4468_v6, %v4464_v58  ;;  %v3813_v13 = vmul.f32 %v4468_v6, %v3749_v2  ;;  %v3752_v3 = vld [vmem:[%s5708_s12 + $0x120] sm:$0xff] }
 0x1c8   : > { %v4472_v14 = vpop.eup %4471  ;;  %v3845_v15 = vadd.f32 %v3844_v7, %v3782_v9  ;;  %v3645_v16 = vadd.f32 %v4470_v28, %v3644_v8  ;;  %v3783_v17 = vmul.f32 %v4470_v28, %v3719_v5  ;;  %v3722_v7 = vld [vmem:[%s5708_s12 + $0x30] sm:$0xff] }
 0x1c9   : > { %v4474_v19 = vpop.eup %4473  ;;  %v3877_v20 = vadd.f32 %v3813_v13, %v3812_v4  ;;  %v3677_v21 = vadd.f32 %v4472_v14, %v3676_v12  ;;  %v3814_v22 = vmul.f32 %v4472_v14, %v3750_v11 }
 0x1ca   : > { %v3846_v23 = vadd.f32 %v3845_v15, %v3783_v17  ;;  %v3815_v26 = vmul.f32 %v4474_v19, %v3751_v18  ;;  %v3753_v15 = vld [vmem:[%s5708_s12 + $0x128] sm:$0xff]  ;;  %v3723_v17 = vld [vmem:[%s5708_s12 + $0x38] sm:$0xff] }
 0x1cb   : > { %v3878_v24 = vadd.f32 %v3877_v20, %v3814_v22  ;;  %v3678_v25 = vadd.f32 %v4474_v19, %v3677_v21  ;;  %v3754_v20 = vld [vmem:[%s5708_s12 + $0x130] sm:$0xff] }
 0x1cd   : > { %v3879_v29 = vadd.f32 %v3878_v24, %v3815_v26 }
 0x1d3   : > { %v2713_v10 = vpop.f32.mrb[4].mxu0  ;;  %v2756_v39 = vpop.f32.mrb[4].mxu1 }
 0x1d4   : > { %v3453_v37 = vmul.f32 %v3308_v33, %v2713_v10  ;;  %v2715_v38 = vpop.f32.mrb[5].mxu0  ;;  %v3455_v49 = vmul.f32 %v3316_v35, %v2756_v39  ;;  %v2758_v42 = vpop.f32.mrb[5].mxu1 }
 0x1d5   : > { %v3454_v40 = vmul.f32 %v3312_v34, %v2715_v38  ;;  %v2717_v41 = vpop.f32.mrb[6].mxu0  ;;  %v3456_v46 = vmul.f32 %v3320_v36, %v2758_v42  ;;  %v2760_v47 = vpop.f32.mrb[6].mxu1  ;;  %v3755_v38 = vld [vmem:[%s5708_s12 + $0x138] sm:$0xff] }
 0x1d6   : > { %v3521_v43 = vmul.f32 1.442695, %v3453_v37  ;;  %v3485_v44 = vmul.f32 %v3308_v33, %v2717_v41  ;;  %v2719_v45 = vpop.f32.mrb[7].mxu0  ;;  %v3525_v0 = vmul.f32 1.442695, %v3455_v49  ;;  %v3487_v51 = vmul.f32 %v3316_v35, %v2760_v47  ;;  %v2762_v52 = vpop.f32.mrb[7].mxu1 }
 0x1d7   : > { %v3523_v48 = vmul.f32 1.442695, %v3454_v40  ;;  %v3486_v50 = vmul.f32 %v3312_v34, %v2719_v45  ;;  %v3488_v53 = vmul.f32 %v3320_v36, %v2762_v52  ;;  %v3527_v56 = vmul.f32 1.442695, %v3456_v46 }
 0x1d8   : > { %4475 = vpow2.f32 %v3521_v43  ;;  %v3585_v59 = vmul.f32 1.442695, %v3485_v44  ;;  %v3589_v57 = vmul.f32 1.442695, %v3487_v51  ;;  %v5749_v43 = vld [vmem:[%s5669_s10 + $0x8] sm:$0xff] }
 0x1d9   : > { %4477 = vpow2.f32 %v3523_v48  ;;  %v3587_v54 = vmul.f32 1.442695, %v3486_v50  ;;  %v3591_v58 = vmul.f32 1.442695, %v3488_v53  ;;  %v3324_v44 = vrot.slane %v5749_v43, %v5674_v55 }
 0x1da   : > { %4479 = vpow2.f32 %v3585_v59  ;;  %v3328_v45 = vrot.slane %v5749_v43, %v5682_v60  ;;  %v3332_v46 = vrot.slane %v5749_v43, %v5685_v61  ;;  %v3336_v47 = vrot.slane %v5749_v43, %v5688_v1 }
 0x1db   : > { %4481 = vpow2.f32 %v3525_v0 }
 0x1dc   : > { %4483 = vpow2.f32 %v3587_v54 }
 0x1dd   : > { %4485 = vpow2.f32 %v3527_v56 }
 0x1de   : > { %4487 = vpow2.f32 %v3589_v57 }
 0x1df   : > { %4489 = vpow2.f32 %v3591_v58 }
 0x1e2   : > { %v4476_v2 = vpop.eup %4475 }
 0x1e3   : > { %v4478_v4 = vpop.eup %4477  ;;  %v3646_v5 = vadd.f32 %v4476_v2, %v3645_v16  ;;  %v3784_v6 = vmul.f32 %v4476_v2, %v3720_v62 }
 0x1e4   : > { %v4480_v8 = vpop.eup %4479  ;;  %v3785_v9 = vmul.f32 %v4478_v4, %v3721_v63 }
 0x1e5   : > { %v4482_v11 = vpop.eup %4481  ;;  %v3847_v28 = vadd.f32 %v3846_v23, %v3784_v6  ;;  %v3647_v12 = vadd.f32 %v4478_v4, %v3646_v5  ;;  %v3679_v13 = vadd.f32 %v4480_v8, %v3678_v25  ;;  %v3816_v14 = vmul.f32 %v4480_v8, %v3752_v3 }
 0x1e6   : > { %v4484_v18 = vpop.eup %4483  ;;  %v3786_v19 = vmul.f32 %v4482_v11, %v3722_v7 }
 0x1e7   : > { %v4486_v21 = vpop.eup %4485  ;;  %v3848_v22 = vadd.f32 %v3847_v28, %v3785_v9  ;;  %v3880_v24 = vadd.f32 %v3879_v29, %v3816_v14  ;;  %v3648_v26 = vadd.f32 %v4482_v11, %v3647_v12  ;;  %v3680_v16 = vadd.f32 %v4484_v18, %v3679_v13  ;;  %v3724_v13 = vld [vmem:[%s5708_s12 + $0x40] sm:$0xff]  ;;  %v3725_v14 = vld [vmem:[%s5708_s12 + $0x48] sm:$0xff] }
 0x1e8   : > { %v4488_v33 = vpop.eup %4487  ;;  %v3817_v34 = vmul.f32 %v4484_v18, %v3753_v15  ;;  %v3787_v35 = vmul.f32 %v4486_v21, %v3723_v17  ;;  %v3756_v17 = vld [vmem:[%s5708_s12 + $0x140] sm:$0xff] }
 0x1e9   : > { %v4490_v36 = vpop.eup %4489  ;;  %v3849_v23 = vadd.f32 %v3848_v22, %v3786_v19  ;;  %v3649_v10 = vadd.f32 %v4486_v21, %v3648_v26  ;;  %v3681_v25 = vadd.f32 %v4488_v33, %v3680_v16  ;;  %v3818_v37 = vmul.f32 %v4488_v33, %v3754_v20  ;;  %v3726_v21 = vld [vmem:[%s5708_s12 + $0x50] sm:$0xff] }
 0x1ea   : > { %v3881_v39 = vadd.f32 %v3880_v24, %v3817_v34  ;;  %v3819_v42 = vmul.f32 %v4490_v36, %v3755_v38  ;;  %v3758_v38 = vld [vmem:[%s5708_s12 + $0x150] sm:$0xff] }
 0x1eb   : > { %v3850_v40 = vadd.f32 %v3849_v23, %v3787_v35  ;;  %v3682_v41 = vadd.f32 %v4490_v36, %v3681_v25  ;;  %v3757_v36 = vld [vmem:[%s5708_s12 + $0x148] sm:$0xff]  ;;  %v3727_v23 = vld [vmem:[%s5708_s12 + $0x58] sm:$0xff] }
 0x1ec   : > { %v3882_v49 = vadd.f32 %v3881_v39, %v3818_v37 }
 0x1ee   : > { %v3883_v29 = vadd.f32 %v3882_v49, %v3819_v42 }
 0x1f3   : > { %v2799_v48 = vpop.f32.mrb[8].mxu0  ;;  %v2842_v51 = vpop.f32.mrb[8].mxu1 }
 0x1f4   : > { %v3457_v0 = vmul.f32 %v3324_v44, %v2799_v48  ;;  %v2801_v50 = vpop.f32.mrb[9].mxu0  ;;  %v3459_v53 = vmul.f32 %v3332_v46, %v2842_v51  ;;  %v2844_v54 = vpop.f32.mrb[9].mxu1  ;;  %v3759_v51 = vld [vmem:[%s5708_s12 + $0x158] sm:$0xff] }
 0x1f5   : > { %v3458_v52 = vmul.f32 %v3328_v45, %v2801_v50  ;;  %v2803_v59 = vpop.f32.mrb[10].mxu0  ;;  %v3460_v62 = vmul.f32 %v3336_v47, %v2844_v54  ;;  %v2846_v63 = vpop.f32.mrb[10].mxu1 }
 0x1f6   : > { %v3529_v56 = vmul.f32 1.442695, %v3457_v0  ;;  %v3489_v57 = vmul.f32 %v3324_v44, %v2803_v59  ;;  %v2805_v58 = vpop.f32.mrb[11].mxu0  ;;  %v3533_v3 = vmul.f32 1.442695, %v3459_v53  ;;  %v3491_v5 = vmul.f32 %v3332_v46, %v2846_v63  ;;  %v2848_v6 = vpop.f32.mrb[11].mxu1 }
 0x1f7   : > { %v3531_v2 = vmul.f32 1.442695, %v3458_v52  ;;  %v3490_v4 = vmul.f32 %v3328_v45, %v2805_v58  ;;  %v3492_v8 = vmul.f32 %v3336_v47, %v2848_v6  ;;  %v3535_v11 = vmul.f32 1.442695, %v3460_v62 }
 0x1f8   : > { %4491 = vpow2.f32 %v3529_v56  ;;  %v3593_v7 = vmul.f32 1.442695, %v3489_v57  ;;  %v3597_v28 = vmul.f32 1.442695, %v3491_v5  ;;  %v3344_v58 = vrot.slane %v5749_v43, %v5724_v30 }
 0x1f9   : > { %4493 = vpow2.f32 %v3531_v2  ;;  %v3595_v9 = vmul.f32 1.442695, %v3490_v4  ;;  %v3599_v12 = vmul.f32 1.442695, %v3492_v8  ;;  %v3348_v62 = vrot.slane %v5749_v43, %v5727_v31 }
 0x1fa   : > { %4495 = vpow2.f32 %v3593_v7  ;;  %v3352_v63 = vrot.slane %v5749_v43, %v5730_v32 }
 0x1fb   : > { %4497 = vpow2.f32 %v3533_v3 }
 0x1fc   : > { %4499 = vpow2.f32 %v3595_v9 }
 0x1fd   : > { %4501 = vpow2.f32 %v3535_v11 }
 0x1fe   : > { %4503 = vpow2.f32 %v3597_v28 }
 0x1ff   : > { %4505 = vpow2.f32 %v3599_v12 }
 0x202   : > { %v4492_v15 = vpop.eup %4491 }
 0x203   : > { %v4494_v18 = vpop.eup %4493  ;;  %v3650_v19 = vadd.f32 %v4492_v15, %v3649_v10  ;;  %v3788_v20 = vmul.f32 %v4492_v15, %v3724_v13 }
 0x204   : > { %v4496_v22 = vpop.eup %4495  ;;  %v3789_v24 = vmul.f32 %v4494_v18, %v3725_v14 }
 0x205   : > { %v4498_v26 = vpop.eup %4497  ;;  %v3851_v16 = vadd.f32 %v3850_v40, %v3788_v20  ;;  %v3651_v33 = vadd.f32 %v4494_v18, %v3650_v19  ;;  %v3683_v34 = vadd.f32 %v4496_v22, %v3682_v41  ;;  %v3820_v35 = vmul.f32 %v4496_v22, %v3756_v17 }
 0x206   : > { %v4500_v25 = vpop.eup %4499  ;;  %v3790_v37 = vmul.f32 %v4498_v26, %v3726_v21 }
 0x207   : > { %v4502_v39 = vpop.eup %4501  ;;  %v3852_v49 = vadd.f32 %v3851_v16, %v3789_v24  ;;  %v3884_v42 = vadd.f32 %v3883_v29, %v3820_v35  ;;  %v3652_v44 = vadd.f32 %v4498_v26, %v3651_v33  ;;  %v3684_v10 = vadd.f32 %v4500_v25, %v3683_v34  ;;  %v3728_v33 = vld [vmem:[%s5708_s12 + $0x60] sm:$0xff]  ;;  %v3729_v34 = vld [vmem:[%s5708_s12 + $0x68] sm:$0xff] }
 0x208   : > { %v4504_v45 = vpop.eup %4503  ;;  %v3821_v46 = vmul.f32 %v4500_v25, %v3757_v36  ;;  %v3791_v47 = vmul.f32 %v4502_v39, %v3727_v23  ;;  %v3340_v29 = vrot.slane %v5749_v43, %v5721_v27  ;;  %v3760_v36 = vld [vmem:[%s5708_s12 + $0x160] sm:$0xff] }
 0x209   : > { %v4506_v48 = vpop.eup %4505  ;;  %v3853_v0 = vadd.f32 %v3852_v49, %v3790_v37  ;;  %v3653_v40 = vadd.f32 %v4502_v39, %v3652_v44  ;;  %v3685_v50 = vadd.f32 %v4504_v45, %v3684_v10  ;;  %v3822_v41 = vmul.f32 %v4504_v45, %v3758_v38  ;;  %v3730_v38 = vld [vmem:[%s5708_s12 + $0x70] sm:$0xff] }
 0x20a   : > { %v3885_v52 = vadd.f32 %v3884_v42, %v3821_v46  ;;  %v3823_v56 = vmul.f32 %v4506_v48, %v3759_v51 }
 0x20b   : > { %v3854_v59 = vadd.f32 %v3853_v0, %v3791_v47  ;;  %v3686_v53 = vadd.f32 %v4506_v48, %v3685_v50  ;;  %v3761_v47 = vld [vmem:[%s5708_s12 + $0x168] sm:$0xff]  ;;  %v3731_v48 = vld [vmem:[%s5708_s12 + $0x78] sm:$0xff] }
 0x20c   : > { %v3886_v54 = vadd.f32 %v3885_v52, %v3822_v41  ;;  %v3762_v41 = vld [vmem:[%s5708_s12 + $0x170] sm:$0xff] }
 0x20e   : > { %v3887_v57 = vadd.f32 %v3886_v54, %v3823_v56 }
 0x213   : > { %v2885_v2 = vpop.f32.mrb[12].mxu0  ;;  %v2928_v5 = vpop.f32.mrb[12].mxu1 }
 0x214   : > { %v3461_v3 = vmul.f32 %v3340_v29, %v2885_v2  ;;  %v2887_v4 = vpop.f32.mrb[13].mxu0  ;;  %v3463_v8 = vmul.f32 %v3348_v62, %v2928_v5  ;;  %v2930_v9 = vpop.f32.mrb[13].mxu1 }
 0x215   : > { %v3462_v6 = vmul.f32 %v3344_v58, %v2887_v4  ;;  %v2889_v7 = vpop.f32.mrb[14].mxu0  ;;  %v3464_v13 = vmul.f32 %v3352_v63, %v2930_v9  ;;  %v2932_v14 = vpop.f32.mrb[14].mxu1  ;;  %v3763_v4 = vld [vmem:[%s5708_s12 + $0x178] sm:$0xff] }
 0x216   : > { %v3537_v11 = vmul.f32 1.442695, %v3461_v3  ;;  %v3493_v28 = vmul.f32 %v3340_v29, %v2889_v7  ;;  %v2891_v12 = vpop.f32.mrb[15].mxu0  ;;  %v3541_v17 = vmul.f32 1.442695, %v3463_v8  ;;  %v3495_v19 = vmul.f32 %v3348_v62, %v2932_v14  ;;  %v2934_v20 = vpop.f32.mrb[15].mxu1 }
 0x217   : > { %v3539_v15 = vmul.f32 1.442695, %v3462_v6  ;;  %v3494_v18 = vmul.f32 %v3344_v58, %v2891_v12  ;;  %v3496_v21 = vmul.f32 %v3352_v63, %v2934_v20  ;;  %v3543_v24 = vmul.f32 1.442695, %v3464_v13 }
 0x218   : > { %4507 = vpow2.f32 %v3537_v11  ;;  %v3601_v43 = vmul.f32 1.442695, %v3493_v28  ;;  %v3605_v26 = vmul.f32 1.442695, %v3495_v19  ;;  %v5784_v11 = vld [vmem:[%s5669_s10 + $0x10] sm:$0xff] }
 0x219   : > { %4509 = vpow2.f32 %v3539_v15  ;;  %v3603_v22 = vmul.f32 1.442695, %v3494_v18  ;;  %v3607_v16 = vmul.f32 1.442695, %v3496_v21  ;;  %v3356_v28 = vrot.slane %v5784_v11, %v5674_v55 }
 0x21a   : > { %4511 = vpow2.f32 %v3601_v43  ;;  %v3360_v12 = vrot.slane %v5784_v11, %v5682_v60  ;;  %v3364_v13 = vrot.slane %v5784_v11, %v5685_v61  ;;  %v3368_v14 = vrot.slane %v5784_v11, %v5688_v1 }
 0x21b   : > { %4513 = vpow2.f32 %v3541_v17  ;;  %v4629_v15 = vmov 0.0  }
 0x21c   : > { %4515 = vpow2.f32 %v3603_v22  ;;  %1045 = vst.msk [vmem:[#allocation2] sm:$0xff] %vm1044_vm0, %v4629_v15  ;;  %1046 = vst.msk [vmem:[#allocation2 + $0x8] sm:$0xff] %vm1044_vm0, %v4629_v15 }
 0x21d   : > { %4517 = vpow2.f32 %v3543_v24  ;;  %1047 = vst.msk [vmem:[#allocation3] sm:$0xff] %vm1044_vm0, %v4629_v15  ;;  %1048 = vst.msk [vmem:[#allocation3 + $0x8] sm:$0xff] %vm1044_vm0, %v4629_v15 }
 0x21e   : > { %4519 = vpow2.f32 %v3605_v26 }
 0x21f   : > { %4521 = vpow2.f32 %v3607_v16 }
 0x222   : > { %v4508_v35 = vpop.eup %4507 }
 0x223   : > { %v4510_v23 = vpop.eup %4509  ;;  %v3654_v25 = vadd.f32 %v4508_v35, %v3653_v40  ;;  %v3792_v37 = vmul.f32 %v4508_v35, %v3728_v33 }
 0x224   : > { %v4512_v39 = vpop.eup %4511  ;;  %v3793_v49 = vmul.f32 %v4510_v23, %v3729_v34 }
 0x225   : > { %v4514_v42 = vpop.eup %4513  ;;  %v3855_v44 = vadd.f32 %v3854_v59, %v3792_v37  ;;  %v3655_v10 = vadd.f32 %v4510_v23, %v3654_v25  ;;  %v3687_v45 = vadd.f32 %v4512_v39, %v3686_v53  ;;  %v3824_v46 = vmul.f32 %v4512_v39, %v3760_v36 }
 0x226   : > { %v4516_v0 = vpop.eup %4515  ;;  %v3794_v50 = vmul.f32 %v4514_v42, %v3730_v38 }
 0x227   : > { %v4518_v51 = vpop.eup %4517  ;;  %v3856_v52 = vadd.f32 %v3855_v44, %v3793_v49  ;;  %v3888_v54 = vadd.f32 %v3887_v57, %v3824_v46  ;;  %v3656_v56 = vadd.f32 %v4514_v42, %v3655_v10  ;;  %v3688_v40 = vadd.f32 %v4516_v0, %v3687_v45  ;;  %v3732_v46 = vld [vmem:[%s5708_s12 + $0x80] sm:$0xff] }
 0x228   : > { %v4520_v29 = vpop.eup %4519  ;;  %v3825_v58 = vmul.f32 %v4516_v0, %v3761_v47  ;;  %v3795_v62 = vmul.f32 %v4518_v51, %v3731_v48  ;;  %v3733_v47 = vld [vmem:[%s5708_s12 + $0x88] sm:$0xff]  ;;  %v3764_v0 = vld [vmem:[%s5708_s12 + $0x180] sm:$0xff] }
 0x229   : > { %v4522_v63 = vpop.eup %4521  ;;  %v3857_v59 = vadd.f32 %v3856_v52, %v3794_v50  ;;  %v3657_v2 = vadd.f32 %v4518_v51, %v3656_v56  ;;  %v3689_v53 = vadd.f32 %v4520_v29, %v3688_v40  ;;  %v3826_v3 = vmul.f32 %v4520_v29, %v3762_v41  ;;  %v3734_v52 = vld [vmem:[%s5708_s12 + $0x90] sm:$0xff] }
 0x22a   : > { %v3889_v5 = vadd.f32 %v3888_v54, %v3825_v58  ;;  %v3827_v9 = vmul.f32 %v4522_v63, %v3763_v4 }
 0x22b   : > { %v3858_v6 = vadd.f32 %v3857_v59, %v3795_v62  ;;  %v3690_v7 = vadd.f32 %v4522_v63, %v3689_v53  ;;  %v3765_v59 = vld [vmem:[%s5708_s12 + $0x188] sm:$0xff]  ;;  %v3735_v53 = vld [vmem:[%s5708_s12 + $0x98] sm:$0xff] }
 0x22c   : > { %v3890_v8 = vadd.f32 %v3889_v5, %v3826_v3  ;;  %v3766_v5 = vld [vmem:[%s5708_s12 + $0x190] sm:$0xff] }
 0x22e   : > { %v5786_v57 = vadd.f32 %v3890_v8, %v3827_v9 }
 0x233   : > { %v2971_v17 = vpop.f32.mrb[16].mxu0  ;;  %v3014_v20 = vpop.f32.mrb[16].mxu1 }
 0x234   : > { %v3465_v18 = vmul.f32 %v3356_v28, %v2971_v17  ;;  %v2973_v19 = vpop.f32.mrb[17].mxu0  ;;  %v3467_v22 = vmul.f32 %v3364_v13, %v3014_v20  ;;  %v3016_v24 = vpop.f32.mrb[17].mxu1  ;;  %v3767_v20 = vld [vmem:[%s5708_s12 + $0x198] sm:$0xff] }
 0x235   : > { %v3466_v43 = vmul.f32 %v3360_v12, %v2973_v19  ;;  %v2975_v21 = vpop.f32.mrb[18].mxu0  ;;  %v3468_v34 = vmul.f32 %v3368_v14, %v3016_v24  ;;  %v3018_v35 = vpop.f32.mrb[18].mxu1 }
 0x236   : > { %v3545_v26 = vmul.f32 1.442695, %v3465_v18  ;;  %v3497_v16 = vmul.f32 %v3356_v28, %v2975_v21  ;;  %v2977_v33 = vpop.f32.mrb[19].mxu0  ;;  %v3549_v23 = vmul.f32 1.442695, %v3467_v22  ;;  %v3499_v37 = vmul.f32 %v3364_v13, %v3018_v35  ;;  %v3020_v38 = vpop.f32.mrb[19].mxu1 }
 0x237   : > { %v3547_v36 = vmul.f32 1.442695, %v3466_v43  ;;  %v3498_v25 = vmul.f32 %v3360_v12, %v2977_v33  ;;  %v3500_v49 = vmul.f32 %v3368_v14, %v3020_v38  ;;  %v3551_v44 = vmul.f32 1.442695, %v3468_v34 }
 0x238   : > { %4523 = vpow2.f32 %v3545_v26  ;;  %v3609_v39 = vmul.f32 1.442695, %v3497_v16  ;;  %v3613_v10 = vmul.f32 1.442695, %v3499_v37  ;;  %v3376_v33 = vrot.slane %v5784_v11, %v5724_v30 }
 0x239   : > { %4525 = vpow2.f32 %v3547_v36  ;;  %v3611_v42 = vmul.f32 1.442695, %v3498_v25  ;;  %v3615_v45 = vmul.f32 1.442695, %v3500_v49  ;;  %v3380_v34 = vrot.slane %v5784_v11, %v5727_v31 }
 0x23a   : > { %4527 = vpow2.f32 %v3609_v39  ;;  %v3384_v35 = vrot.slane %v5784_v11, %v5730_v32 }
 0x23b   : > { %4529 = vpow2.f32 %v3549_v23 }
 0x23c   : > { %4531 = vpow2.f32 %v3611_v42 }
 0x23d   : > { %4533 = vpow2.f32 %v3551_v44 }
 0x23e   : > { %4535 = vpow2.f32 %v3613_v10 }
 0x23f   : > { %4537 = vpow2.f32 %v3615_v45 }
 0x242   : > { %v4524_v48 = vpop.eup %4523 }
 0x243   : > { %v4526_v50 = vpop.eup %4525  ;;  %v3658_v41 = vadd.f32 %v4524_v48, %v3657_v2  ;;  %v3796_v51 = vmul.f32 %v4524_v48, %v3732_v46 }
 0x244   : > { %v4528_v54 = vpop.eup %4527  ;;  %v3797_v56 = vmul.f32 %v4526_v50, %v3733_v47 }
 0x245   : > { %v4530_v40 = vpop.eup %4529  ;;  %v3859_v29 = vadd.f32 %v3858_v6, %v3796_v51  ;;  %v3659_v58 = vadd.f32 %v4526_v50, %v3658_v41  ;;  %v3691_v62 = vadd.f32 %v4528_v54, %v3690_v7  ;;  %v3828_v63 = vmul.f32 %v4528_v54, %v3764_v0 }
 0x246   : > { %v4532_v3 = vpop.eup %4531  ;;  %v3798_v4 = vmul.f32 %v4530_v40, %v3734_v52 }
 0x247   : > { %v4534_v8 = vpop.eup %4533  ;;  %v3860_v9 = vadd.f32 %v3859_v29, %v3797_v56  ;;  %v3892_v28 = vadd.f32 %v5786_v57, %v3828_v63  ;;  %v3660_v2 = vadd.f32 %v4530_v40, %v3659_v58  ;;  %v3692_v12 = vadd.f32 %v4532_v3, %v3691_v62  ;;  %v3736_v58 = vld [vmem:[%s5708_s12 + $0xa0] sm:$0xff]  ;;  %v3737_v62 = vld [vmem:[%s5708_s12 + $0xa8] sm:$0xff] }
 0x248   : > { %v4536_v13 = vpop.eup %4535  ;;  %v3829_v14 = vmul.f32 %v4532_v3, %v3765_v59  ;;  %v3799_v15 = vmul.f32 %v4534_v8, %v3735_v53  ;;  %v3372_v57 = vrot.slane %v5784_v11, %v5721_v27  ;;  %v3768_v59 = vld [vmem:[%s5708_s12 + $0x1a0] sm:$0xff] }
 0x249   : > { %v4538_v17 = vpop.eup %4537  ;;  %v3861_v6 = vadd.f32 %v3860_v9, %v3798_v4  ;;  %v3661_v18 = vadd.f32 %v4534_v8, %v3660_v2  ;;  %v3693_v7 = vadd.f32 %v4536_v13, %v3692_v12  ;;  %v3830_v19 = vmul.f32 %v4536_v13, %v3766_v5  ;;  %v3738_v5 = vld [vmem:[%s5708_s12 + $0xb0] sm:$0xff] }
 0x24a   : > { %v3893_v43 = vadd.f32 %v3892_v28, %v3829_v14  ;;  %v3831_v26 = vmul.f32 %v4538_v17, %v3767_v20 }
 0x24b   : > { %v3862_v21 = vadd.f32 %v3861_v6, %v3799_v15  ;;  %v3694_v22 = vadd.f32 %v4538_v17, %v3693_v7  ;;  %v3769_v15 = vld [vmem:[%s5708_s12 + $0x1a8] sm:$0xff]  ;;  %v3739_v17 = vld [vmem:[%s5708_s12 + $0xb8] sm:$0xff] }
 0x24c   : > { %v3894_v24 = vadd.f32 %v3893_v43, %v3830_v19  ;;  %v3770_v19 = vld [vmem:[%s5708_s12 + $0x1b0] sm:$0xff] }
 0x24e   : > { %v3895_v16 = vadd.f32 %v3894_v24, %v3831_v26 }
 0x253   : > { %v3057_v36 = vpop.f32.mrb[20].mxu0  ;;  %v3100_v37 = vpop.f32.mrb[20].mxu1 }
 0x254   : > { %v3469_v23 = vmul.f32 %v3372_v57, %v3057_v36  ;;  %v3059_v25 = vpop.f32.mrb[21].mxu0  ;;  %v3471_v49 = vmul.f32 %v3380_v34, %v3100_v37  ;;  %v3102_v42 = vpop.f32.mrb[21].mxu1 }
 0x255   : > { %v3470_v38 = vmul.f32 %v3376_v33, %v3059_v25  ;;  %v3061_v39 = vpop.f32.mrb[22].mxu0  ;;  %v3472_v46 = vmul.f32 %v3384_v35, %v3102_v42  ;;  %v3104_v47 = vpop.f32.mrb[22].mxu1  ;;  %v3771_v25 = vld [vmem:[%s5708_s12 + $0x1b8] sm:$0xff] }
 0x256   : > { %v3553_v44 = vmul.f32 1.442695, %v3469_v23  ;;  %v3501_v10 = vmul.f32 %v3372_v57, %v3061_v39  ;;  %v3063_v45 = vpop.f32.mrb[23].mxu0  ;;  %v3557_v0 = vmul.f32 1.442695, %v3471_v49  ;;  %v3503_v41 = vmul.f32 %v3380_v34, %v3104_v47  ;;  %v3106_v51 = vpop.f32.mrb[23].mxu1 }
 0x257   : > { %v3555_v48 = vmul.f32 1.442695, %v3470_v38  ;;  %v3502_v50 = vmul.f32 %v3376_v33, %v3063_v45  ;;  %v3504_v52 = vmul.f32 %v3384_v35, %v3106_v51  ;;  %v3559_v56 = vmul.f32 1.442695, %v3472_v46 }
 0x258   : > { %4539 = vpow2.f32 %v3553_v44  ;;  %v3617_v11 = vmul.f32 1.442695, %v3501_v10  ;;  %v3621_v40 = vmul.f32 1.442695, %v3503_v41  ;;  %v5826_v44 = vld [vmem:[%s5669_s10 + $0x18] sm:$0xff] }
 0x259   : > { %4541 = vpow2.f32 %v3555_v48  ;;  %v3619_v54 = vmul.f32 1.442695, %v3502_v50  ;;  %v3623_v29 = vmul.f32 1.442695, %v3504_v52  ;;  %v3388_v10 = vrot.slane %v5826_v44, %v5674_v55 }
 0x25a   : > { %4543 = vpow2.f32 %v3617_v11  ;;  %v3392_v45 = vrot.slane %v5826_v44, %v5682_v60  ;;  %v3396_v46 = vrot.slane %v5826_v44, %v5685_v61  ;;  %v3400_v47 = vrot.slane %v5826_v44, %v5688_v1 }
 0x25b   : > { %4545 = vpow2.f32 %v3557_v0 }
 0x25c   : > { %4547 = vpow2.f32 %v3619_v54 }
 0x25d   : > { %4549 = vpow2.f32 %v3559_v56 }
 0x25e   : > { %4551 = vpow2.f32 %v3621_v40 }
 0x25f   : > { %4553 = vpow2.f32 %v3623_v29 }
 0x262   : > { %v4540_v63 = vpop.eup %4539 }
 0x263   : > { %v4542_v53 = vpop.eup %4541  ;;  %v3662_v3 = vadd.f32 %v4540_v63, %v3661_v18  ;;  %v3800_v4 = vmul.f32 %v4540_v63, %v3736_v58 }
 0x264   : > { %v4544_v8 = vpop.eup %4543  ;;  %v3801_v9 = vmul.f32 %v4542_v53, %v3737_v62 }
 0x265   : > { %v4546_v28 = vpop.eup %4545  ;;  %v3863_v2 = vadd.f32 %v3862_v21, %v3800_v4  ;;  %v3663_v12 = vadd.f32 %v4542_v53, %v3662_v3  ;;  %v3695_v13 = vadd.f32 %v4544_v8, %v3694_v22  ;;  %v3832_v14 = vmul.f32 %v4544_v8, %v3768_v59 }
 0x266   : > { %v4548_v6 = vpop.eup %4547  ;;  %v3802_v7 = vmul.f32 %v4546_v28, %v3738_v5 }
 0x267   : > { %v4550_v20 = vpop.eup %4549  ;;  %v3864_v43 = vadd.f32 %v3863_v2, %v3801_v9  ;;  %v3896_v24 = vadd.f32 %v3895_v16, %v3832_v14  ;;  %v3664_v26 = vadd.f32 %v4546_v28, %v3663_v12  ;;  %v3696_v18 = vadd.f32 %v4548_v6, %v3695_v13  ;;  %v3740_v9 = vld [vmem:[%s5708_s12 + $0xc0] sm:$0xff]  ;;  %v3741_v28 = vld [vmem:[%s5708_s12 + $0xc8] sm:$0xff] }
 0x268   : > { %v4552_v57 = vpop.eup %4551  ;;  %v3833_v33 = vmul.f32 %v4548_v6, %v3769_v15  ;;  %v3803_v34 = vmul.f32 %v4550_v20, %v3739_v17  ;;  %v3772_v12 = vld [vmem:[%s5708_s12 + $0x1c0] sm:$0xff]  ;;  %v3742_v17 = vld [vmem:[%s5708_s12 + $0xd0] sm:$0xff] }
 0x269   : > { %v4554_v35 = vpop.eup %4553  ;;  %v3865_v21 = vadd.f32 %v3864_v43, %v3802_v7  ;;  %v3665_v36 = vadd.f32 %v4550_v20, %v3664_v26  ;;  %v3697_v22 = vadd.f32 %v4552_v57, %v3696_v18  ;;  %v3834_v23 = vmul.f32 %v4552_v57, %v3770_v19  ;;  %v3773_v19 = vld [vmem:[%s5708_s12 + $0x1c8] sm:$0xff]  ;;  %v3743_v18 = vld [vmem:[%s5708_s12 + $0xd8] sm:$0xff] }
 0x26a   : > { %v3897_v37 = vadd.f32 %v3896_v24, %v3833_v33  ;;  %v3835_v42 = vmul.f32 %v4554_v35, %v3771_v25 }
 0x26b   : > { %v3866_v38 = vadd.f32 %v3865_v21, %v3803_v34  ;;  %v3698_v39 = vadd.f32 %v4554_v35, %v3697_v22  ;;  %v3774_v34 = vld [vmem:[%s5708_s12 + $0x1d0] sm:$0xff] }
 0x26c   : > { %v3898_v49 = vadd.f32 %v3897_v37, %v3834_v23 }
 0x26e   : > { %v3899_v16 = vadd.f32 %v3898_v49, %v3835_v42 }
 0x273   : > { %v3143_v48 = vpop.f32.mrb[24].mxu0  ;;  %v3186_v41 = vpop.f32.mrb[24].mxu1 }
 0x274   : > { %v3473_v0 = vmul.f32 %v3388_v10, %v3143_v48  ;;  %v3145_v50 = vpop.f32.mrb[25].mxu0  ;;  %v3475_v52 = vmul.f32 %v3396_v46, %v3186_v41  ;;  %v3188_v54 = vpop.f32.mrb[25].mxu1 }
 0x275   : > { %v3474_v51 = vmul.f32 %v3392_v45, %v3145_v50  ;;  %v3147_v11 = vpop.f32.mrb[26].mxu0  ;;  %v3476_v29 = vmul.f32 %v3400_v47, %v3188_v54  ;;  %v3190_v58 = vpop.f32.mrb[26].mxu1  ;;  %v3412_v54 = vrot.slane %v5826_v44, %v5727_v31 }
 0x276   : > { %v3561_v56 = vmul.f32 1.442695, %v3473_v0  ;;  %v3505_v40 = vmul.f32 %v3388_v10, %v3147_v11  ;;  %v3149_v55 = vpop.f32.mrb[27].mxu0  ;;  %v3565_v62 = vmul.f32 1.442695, %v3475_v52  ;;  %v3507_v61 = vmul.f32 %v3396_v46, %v3190_v58  ;;  %v3192_v59 = vpop.f32.mrb[27].mxu1 }
 0x277   : > { %v3563_v60 = vmul.f32 1.442695, %v3474_v51  ;;  %v3506_v63 = vmul.f32 %v3392_v45, %v3149_v55  ;;  %v3508_v53 = vmul.f32 %v3400_v47, %v3192_v59  ;;  %v3567_v4 = vmul.f32 1.442695, %v3476_v29  ;;  %v3775_v10 = vld [vmem:[%s5708_s12 + $0x1d8] sm:$0xff] }
 0x278   : > { %4555 = vpow2.f32 %v3561_v56  ;;  %v3625_v1 = vmul.f32 1.442695, %v3505_v40  ;;  %v3629_v5 = vmul.f32 1.442695, %v3507_v61  ;;  %v3408_v52 = vrot.slane %v5826_v44, %v5724_v30 }
 0x279   : > { %4557 = vpow2.f32 %v3563_v60  ;;  %v3627_v3 = vmul.f32 1.442695, %v3506_v63  ;;  %v3631_v8 = vmul.f32 1.442695, %v3508_v53  ;;  %v3416_v56 = vrot.slane %v5826_v44, %v5730_v32 }
 0x27a   : > { %4559 = vpow2.f32 %v3625_v1 }
 0x27b   : > { %4561 = vpow2.f32 %v3565_v62 }
 0x27c   : > { %4563 = vpow2.f32 %v3627_v3 }
 0x27d   : > { %4565 = vpow2.f32 %v3567_v4 }
 0x27e   : > { %4567 = vpow2.f32 %v3629_v5 }
 0x27f   : > { %4569 = vpow2.f32 %v3631_v8 }
 0x282   : > { %v4556_v2 = vpop.eup %4555 }
 0x283   : > { %v4558_v13 = vpop.eup %4557  ;;  %v3666_v14 = vadd.f32 %v4556_v2, %v3665_v36  ;;  %v3804_v15 = vmul.f32 %v4556_v2, %v3740_v9 }
 0x284   : > { %v4560_v6 = vpop.eup %4559  ;;  %v3805_v7 = vmul.f32 %v4558_v13, %v3741_v28 }
 0x285   : > { %v4562_v20 = vpop.eup %4561  ;;  %v3699_v43 = vadd.f32 %v4560_v6, %v3698_v39  ;;  %v3836_v24 = vmul.f32 %v4560_v6, %v3772_v12  ;;  %v3667_v26 = vadd.f32 %v4558_v13, %v3666_v14  ;;  %v3867_v57 = vadd.f32 %v3866_v38, %v3804_v15  ;;  %v3744_v13 = vld [vmem:[%s5708_s12 + $0xe0] sm:$0xff]  ;;  %v3745_v14 = vld [vmem:[%s5708_s12 + $0xe8] sm:$0xff] }
 0x286   : > { %v4564_v33 = vpop.eup %4563  ;;  %v3806_v35 = vmul.f32 %v4562_v20, %v3742_v17  ;;  %v3746_v17 = vld [vmem:[%s5708_s12 + $0xf0] sm:$0xff] }
 0x287   : > { %v4566_v21 = vpop.eup %4565  ;;  %v3900_v22 = vadd.f32 %v3899_v16, %v3836_v24  ;;  %v3700_v23 = vadd.f32 %v4564_v33, %v3699_v43  ;;  %v3837_v25 = vmul.f32 %v4564_v33, %v3773_v19  ;;  %v3668_v36 = vadd.f32 %v4562_v20, %v3667_v26  ;;  %v3776_v20 = vld [vmem:[%s5708_s12 + $0x1e0] sm:$0xff] }
 0x288   : > { %v4568_v37 = vpop.eup %4567  ;;  %v3807_v49 = vmul.f32 %v4566_v21, %v3743_v18  ;;  %v3868_v42 = vadd.f32 %v3867_v57, %v3805_v7  ;;  %v3404_v16 = vrot.slane %v5826_v44, %v5721_v27 }
 0x289   : > { %v4570_v45 = vpop.eup %4569  ;;  %v3838_v46 = vmul.f32 %v4568_v37, %v3774_v34  ;;  %v3669_v39 = vadd.f32 %v4566_v21, %v3668_v36  ;;  %v3701_v47 = vadd.f32 %v4568_v37, %v3700_v23  ;;  %v3901_v48 = vadd.f32 %v3900_v22, %v3837_v25  ;;  %v3777_v34 = vld [vmem:[%s5708_s12 + $0x1e8] sm:$0xff]  ;;  %v3747_v21 = vld [vmem:[%s5708_s12 + $0xf8] sm:$0xff] }
 0x28a   : > { %v3869_v0 = vadd.f32 %v3868_v42, %v3806_v35  ;;  %v3839_v38 = vmul.f32 %v4570_v45, %v3775_v10  ;;  %v3779_v42 = vld [vmem:[%s5708_s12 + $0x1f8] sm:$0xff] }
 0x28b   : > { %v3702_v50 = vadd.f32 %v4570_v45, %v3701_v47  ;;  %v3902_v41 = vadd.f32 %v3901_v48, %v3838_v46 }
 0x28c   : > { %v3870_v51 = vadd.f32 %v3869_v0, %v3807_v49  ;;  %v3778_v49 = vld [vmem:[%s5708_s12 + $0x1f0] sm:$0xff] }
 0x28d   : > { %v5844_v11 = vadd.f32 %v3902_v41, %v3839_v38 }
 0x293   : > { %v3229_v40 = vpop.f32.mrb[28].mxu0  ;;  %v3272_v58 = vpop.f32.mrb[28].mxu1 }
 0x294   : > { %v3477_v55 = vmul.f32 %v3404_v16, %v3229_v40  ;;  %v3231_v29 = vpop.f32.mrb[29].mxu0  ;;  %v3479_v62 = vmul.f32 %v3412_v54, %v3272_v58  ;;  %v3274_v61 = vpop.f32.mrb[29].mxu1  ;;  %v3714_v58 = vld [vmem:[#allocation3] sm:$0xff] }
 0x295   : > { %v3478_v60 = vmul.f32 %v3408_v52, %v3231_v29  ;;  %v3233_v63 = vpop.f32.mrb[30].mxu0  ;;  %v3480_v27 = vmul.f32 %v3416_v56, %v3274_v61  ;;  %v3276_v3 = vpop.f32.mrb[30].mxu1 }
 0x296   : > { %v3569_v59 = vmul.f32 1.442695, %v3477_v55  ;;  %v3509_v1 = vmul.f32 %v3404_v16, %v3233_v63  ;;  %v3235_v53 = vpop.f32.mrb[31].mxu0  ;;  %v3573_v4 = vmul.f32 1.442695, %v3479_v62  ;;  %v3511_v31 = vmul.f32 %v3412_v54, %v3276_v3  ;;  %v3278_v8 = vpop.f32.mrb[31].mxu1 }
 0x297   : > { %v3571_v30 = vmul.f32 1.442695, %v3478_v60  ;;  %v3510_v5 = vmul.f32 %v3408_v52, %v3235_v53  ;;  %v3575_v44 = vmul.f32 1.442695, %v3480_v27  ;;  %v3512_v9 = vmul.f32 %v3416_v56, %v3278_v8  ;;  %v3641_v55 = vld [vmem:[#allocation2] sm:$0xff]  ;;  %v3642_v62 = vld [vmem:[#allocation2 + $0x8] sm:$0xff] }
 0x298   : > { %4571 = vpow2.f32 %v3569_v59  ;;  %v3633_v32 = vmul.f32 1.442695, %v3509_v1  ;;  %v3637_v2 = vmul.f32 1.442695, %v3511_v31  ;;  %v3715_v59 = vld [vmem:[#allocation3 + $0x8] sm:$0xff] }
 0x299   : > { %4573 = vpow2.f32 %v3571_v30  ;;  %v3635_v28 = vmul.f32 1.442695, %v3510_v5  ;;  %v3639_v12 = vmul.f32 1.442695, %v3512_v9 }
 0x29a   : > { %4575 = vpow2.f32 %v3573_v4 }
 0x29b   : > { %4577 = vpow2.f32 %v3633_v32 }
 0x29c   : > { %4579 = vpow2.f32 %v3575_v44 }
 0x29d   : > { %4581 = vpow2.f32 %v3635_v28 }
 0x29e   : > { %4583 = vpow2.f32 %v3637_v2 }
 0x29f   : > { %4585 = vpow2.f32 %v3639_v12 }
 0x2a2   : > { %v4572_v15 = vpop.eup %4571 }
 0x2a3   : > { %v4574_v6 = vpop.eup %4573  ;;  %v3670_v7 = vadd.f32 %v4572_v15, %v3669_v39  ;;  %v3808_v19 = vmul.f32 %v4572_v15, %v3744_v13 }
 0x2a4   : > { %v4576_v43 = vpop.eup %4575  ;;  %v3809_v24 = vmul.f32 %v4574_v6, %v3745_v14 }
 0x2a5   : > { %v4578_v26 = vpop.eup %4577  ;;  %v3671_v18 = vadd.f32 %v4574_v6, %v3670_v7  ;;  %v3810_v57 = vmul.f32 %v4576_v43, %v3746_v17  ;;  %v3871_v33 = vadd.f32 %v3870_v51, %v3808_v19 }
 0x2a6   : > { %v4580_v35 = vpop.eup %4579  ;;  %v3703_v22 = vadd.f32 %v4578_v26, %v3702_v50  ;;  %v3840_v23 = vmul.f32 %v4578_v26, %v3776_v20 }
 0x2a7   : > { %v4582_v25 = vpop.eup %4581  ;;  %v3672_v36 = vadd.f32 %v4576_v43, %v3671_v18  ;;  %v3872_v37 = vadd.f32 %v3871_v33, %v3809_v24  ;;  %v3811_v0 = vmul.f32 %v4580_v35, %v3747_v21 }
 0x2a8   : > { %v4584_v10 = vpop.eup %4583  ;;  %v3704_v45 = vadd.f32 %v4582_v25, %v3703_v22  ;;  %v3841_v46 = vmul.f32 %v4582_v25, %v3777_v34  ;;  %v3904_v39 = vadd.f32 %v5844_v11, %v3840_v23 }
 0x2a9   : > { %v4586_v47 = vpop.eup %4585  ;;  %v3673_v48 = vadd.f32 %v4580_v35, %v3672_v36  ;;  %v3873_v38 = vadd.f32 %v3872_v37, %v3810_v57  ;;  %v3842_v51 = vmul.f32 %v4584_v10, %v3778_v49 }
 0x2aa   : > { %v3705_v41 = vadd.f32 %v4584_v10, %v3704_v45  ;;  %v3843_v16 = vmul.f32 %v4586_v47, %v3779_v42  ;;  %v3905_v52 = vadd.f32 %v3904_v39, %v3841_v46 }
 0x2ab   : > { %3674 = vadd.xlane.f32.xlu0 %v3673_v48  ;;  %v3874_v50 = vadd.f32 %v3873_v38, %v3811_v0 }
 0x2ac   : > { %v3706_v54 = vadd.f32 %v4586_v47, %v3705_v41  ;;  %v3906_v56 = vadd.f32 %v3905_v52, %v3842_v51 }
 0x2ad   : > { %3875 = vadd.xlane.f32.xlu1 %v3874_v50 }
 0x2ae   : > { %v3907_v40 = vadd.f32 %v3906_v56, %v3843_v16 }
 0x2af   : > { %3707 = vadd.xlane.f32.xlu0 %v3706_v54 }
 0x2b1   : > { %3908 = vadd.xlane.f32.xlu1 %v3907_v40 }
 0x338   : > { %v3675_v29 = vpop.xlane.xlu0 %3674 }
 0x339   : > { %v3709_v11 = vadd.f32 %v3675_v29, %v3641_v55 }
 0x33a   : > { %v3876_v60 = vpop.xlane.xlu1 %3875 }
 0x33b   : > { %3712 = vst.msk [vmem:[#allocation2] sm:$0xff] %vm1044_vm0, %v3709_v11  ;;  %v3910_v63 = vadd.f32 %v3876_v60, %v3714_v58 }
 0x33c   : > { %v3708_v61 = vpop.xlane.xlu0 %3707 }
 0x33d   : > { %3912 = vst.msk [vmem:[#allocation3] sm:$0xff] %vm1044_vm0, %v3910_v63  ;;  %v3710_v1 = vadd.f32 %v3708_v61, %v3642_v62 }
 0x33e   : > { %v3909_v27 = vpop.xlane.xlu1 %3908 }
 0x33f   : > { %3713 = vst.msk [vmem:[#allocation2 + $0x8] sm:$0xff] %vm1044_vm0, %v3710_v1  ;;  %v3911_v53 = vadd.f32 %v3909_v27, %v3715_v59 }
 0x341   : > { %3913 = vst.msk [vmem:[#allocation3 + $0x8] sm:$0xff] %vm1044_vm0, %v3911_v53 }
 0x342   : > { %v3931_v3 = vld [vmem:[#allocation2] sm:$0xff] }
 0x343   : > { %3935 = vperm.xlu1 %4457, %v3931_v3  }
 0x344   : > { %v3917_v30 = vld [vmem:[#allocation3] sm:$0xff] }
 0x345   : > { %3921 = vperm.xlu0 %4456, %v3917_v30  }
 0x346   : > { %v3932_v5 = vld [vmem:[#allocation2 + $0x8] sm:$0xff] }
 0x348   : > { %v3918_v4 = vld [vmem:[#allocation3 + $0x8] sm:$0xff] }
 0x349   : > { %3926 = vperm.xlu1 %4457, %v3918_v4  }
 0x34d   : > { %3940 = vperm.xlu1 %4457, %v3932_v5  }
 0x3c2   : > { %v3936_v31 = vpop.permute.xlu1 %3935 }
 0x3c3   : > { %3943 = vst [vmem:[%s1037_s15] sm:$0xff] %v3936_v31 }
 0x3c4   : > { %v3922_v8 = vpop.permute.xlu0 %3921 }
 0x3c5   : > { %3929 = vst [vmem:[%s1027_s24] sm:$0xff] %v3922_v8 }
 0x3c8   : > { %v3927_v32 = vpop.permute.xlu1 %3926 }
 0x3c9   : > { %3930 = vst [vmem:[%s1027_s24 + $0x8] sm:$0xff] %v3927_v32 }
 0x3cc   : > { %v3941_v44 = vpop.permute.xlu1 %3940 }
 0x3cd   : > { %3944 = vst [vmem:[%s1037_s15 + $0x8] sm:$0xff] %v3941_v44 }
 0x3ce PF: > { %s16_s22 = sadd.s32 1, %s4626_s22   ;;  %s5898_s18 = smov %s4614_s19 }
 0x3cf   : > { %p13_p11 = scmp.ge.s32.totalorder %s16_s22, 4   ;;  %s5899_s19 = smov %s4699_s27 }
 0x3d0   : > { %s5900_s20 = smov %s4622_s21  ;;  %s5901_s21 = smov %s5903_s23 }
 0x3d1   :  { %15 = sbr.rel (!%p13_p11) target bundleno = 3 (0x3), region = 151 }

</bundles_post_ra>
